<compile_context>
chip_gen: v7x
topology: tpu7x:2x2x1
jax: 0.10.0
libtpu: 0.0.40
codegen_flags: <defaults>
</compile_context>

<pallas_src>
import functools
import math

import jax
import jax.numpy as jnp
from jax.experimental import pallas as pl
from jax.experimental.pallas import tpu as pltpu


# ----------------------------- helpers -----------------------------

def _ln(x, g, b, eps):
    """LayerNorm over the last axis, f32 math. x: (M, H), g/b: (1, H)."""
    mu = jnp.mean(x, axis=-1, keepdims=True)
    var = jnp.mean(jnp.square(x - mu), axis=-1, keepdims=True)
    return (x - mu) * jax.lax.rsqrt(var + eps) * g + b


# ----------------------------- embedding LayerNorm kernel -----------------------------

def _layernorm_kernel(x_ref, g_ref, b_ref, o_ref, *, eps):
    x = x_ref[...].astype(jnp.float32)
    o_ref[...] = _ln(x, g_ref[...], b_ref[...], eps).astype(o_ref.dtype)


def pallas_layernorm(x, gamma, beta, eps):
    """x: (M, H), gamma/beta: (1, H) -> (M, H)."""
    M, H = x.shape
    kernel = functools.partial(_layernorm_kernel, eps=eps)
    return pl.pallas_call(
        kernel,
        out_shape=jax.ShapeDtypeStruct((M, H), jnp.float32),
        grid=(1,),
        in_specs=[
            pl.BlockSpec((M, H), lambda i: (0, 0)),
            pl.BlockSpec((1, H), lambda i: (0, 0)),
            pl.BlockSpec((1, H), lambda i: (0, 0)),
        ],
        out_specs=pl.BlockSpec((M, H), lambda i: (0, 0)),
    )(x, gamma, beta)


# ----------------------------- fused transformer layer kernel -----------------------------

def _layer_kernel(x_ref, mask_ref,
                  wq_ref, wk_ref, wv_ref,
                  bq_ref, bk_ref, bv_ref,
                  wo_ref, bo_ref,
                  ln1_g_ref, ln1_b_ref,
                  w1_ref, b1_ref,
                  w2_ref, b2_ref,
                  ln2_g_ref, ln2_b_ref,
                  o_ref, *, nh, hd, scale, eps):
    f32 = jnp.float32
    bf16 = jnp.bfloat16

    x = x_ref[0].astype(f32)                     # (S, H)
    x_b = x.astype(bf16)
    S, H = x.shape

    # additive mask: 0 where attended, -1e9 where padded   (1, S)
    mask_add = (mask_ref[0].astype(f32) - 1.0) * 1e9

    # ---- multi-head self-attention (heads statically unrolled: LLO visibility) ----
    attn = jnp.zeros((S, H), f32)
    for h in range(nh):
        wq_h = wq_ref[h].astype(bf16)            # (H, hd)
        wk_h = wk_ref[h].astype(bf16)
        wv_h = wv_ref[h].astype(bf16)
        qh = jnp.dot(x_b, wq_h, preferred_element_type=f32) + bq_ref[h]   # (S, hd)
        kh = jnp.dot(x_b, wk_h, preferred_element_type=f32) + bk_ref[h]
        vh = jnp.dot(x_b, wv_h, preferred_element_type=f32) + bv_ref[h]

        # scores = q . k^T  (contract head_dim)
        s = jax.lax.dot_general(qh.astype(bf16), kh.astype(bf16),
                                (((1,), (1,)), ((), ())),
                                preferred_element_type=f32)               # (S, S)
        s = s * scale + mask_add
        s = s - jnp.max(s, axis=-1, keepdims=True)
        p = jnp.exp(s)
        p = p * pl.reciprocal(jnp.sum(p, axis=-1, keepdims=True), approx=True)

        ctx = jnp.dot(p.astype(bf16), vh.astype(bf16),
                      preferred_element_type=f32)                         # (S, hd)
        # output projection per head, accumulated over heads (avoids lane concat)
        attn = attn + jnp.dot(ctx.astype(bf16), wo_ref[h].astype(bf16),
                              preferred_element_type=f32)                 # (S, H)
    attn = attn + bo_ref[...]

    # ---- residual + LayerNorm (fused) ----
    x1 = _ln(x + attn, ln1_g_ref[...], ln1_b_ref[...], eps)

    # ---- feed-forward ----
    h1 = jnp.dot(x1.astype(bf16), w1_ref[...].astype(bf16),
                 preferred_element_type=f32) + b1_ref[...]                # (S, F)
    h1 = jax.nn.gelu(h1, approximate=True)
    ffn = jnp.dot(h1.astype(bf16), w2_ref[...].astype(bf16),
                  preferred_element_type=f32) + b2_ref[...]               # (S, H)

    # ---- residual + LayerNorm (fused) ----
    x2 = _ln(x1 + ffn, ln2_g_ref[...], ln2_b_ref[...], eps)
    o_ref[0] = x2.astype(o_ref.dtype)


def pallas_transformer_layer(x, mask, layer, *, nh, hd, scale, eps):
    """x: (B, S, H) f32, mask: (B, 1, S) f32 -> (B, S, H) f32."""
    B, S, H = x.shape
    F = layer["w1"].shape[1]
    kernel = functools.partial(_layer_kernel, nh=nh, hd=hd, scale=scale, eps=eps)

    def full2(shape):
        return pl.BlockSpec(shape, lambda b: (0, 0))

    def full3(shape):
        return pl.BlockSpec(shape, lambda b: (0, 0, 0))

    return pl.pallas_call(
        kernel,
        out_shape=jax.ShapeDtypeStruct((B, S, H), jnp.float32),
        grid=(B,),
        in_specs=[
            pl.BlockSpec((1, S, H), lambda b: (b, 0, 0)),   # x (one batch row)
            pl.BlockSpec((1, 1, S), lambda b: (b, 0, 0)),   # mask
            full3((nh, H, hd)), full3((nh, H, hd)), full3((nh, H, hd)),   # wq wk wv
            full3((nh, 1, hd)), full3((nh, 1, hd)), full3((nh, 1, hd)),   # bq bk bv
            full3((nh, hd, H)), full2((1, H)),                            # wo bo
            full2((1, H)), full2((1, H)),                                 # ln1 g/b
            full2((H, F)), full2((1, F)),                                 # w1 b1
            full2((F, H)), full2((1, H)),                                 # w2 b2
            full2((1, H)), full2((1, H)),                                 # ln2 g/b
        ],
        out_specs=pl.BlockSpec((1, S, H), lambda b: (b, 0, 0)),
        compiler_params=pltpu.CompilerParams(dimension_semantics=("parallel",)),
    )(x, mask,
      layer["wq"], layer["wk"], layer["wv"],
      layer["bq"], layer["bk"], layer["bv"],
      layer["wo"], layer["bo"],
      layer["ln1_g"], layer["ln1_b"],
      layer["w1"], layer["b1"],
      layer["w2"], layer["b2"],
      layer["ln2_g"], layer["ln2_b"])


# ----------------------------- CLS projection kernel (token 0 -> Linear(H, 512)) -----------------------------

def _cls_proj_kernel(x_ref, w_ref, b_ref, o_ref):
    cls = x_ref[0][0:1, :].astype(jnp.float32)              # (1, H) — token 0 of this batch row
    y = jnp.dot(cls.astype(jnp.bfloat16), w_ref[...].astype(jnp.bfloat16),
                preferred_element_type=jnp.float32) + b_ref[...]
    o_ref[0] = y.astype(o_ref.dtype)                        # lane-dense (1, 512) store


def pallas_cls_projection(x, w, b):
    """x: (B, S, H), w: (H, N), b: (1, N) -> (B, 1, N)."""
    B, S, H = x.shape
    N = w.shape[1]
    return pl.pallas_call(
        _cls_proj_kernel,
        out_shape=jax.ShapeDtypeStruct((B, 1, N), jnp.float32),
        grid=(B,),
        in_specs=[
            pl.BlockSpec((1, S, H), lambda b: (b, 0, 0)),
            pl.BlockSpec((H, N), lambda b: (0, 0)),
            pl.BlockSpec((1, N), lambda b: (0, 0)),
        ],
        out_specs=pl.BlockSpec((1, 1, N), lambda b: (b, 0, 0)),
        compiler_params=pltpu.CompilerParams(dimension_semantics=("parallel",)),
    )(x, w, b)


# ----------------------------- Model definition -----------------------------

CFG = dict(
    vocab_size=128,
    hidden=128,      # lane-dense: one full vreg lane width
    heads=4,
    head_dim=32,
    ffn=256,         # lane-dense FFN width
    layers=2,
    proj_out=512,    # nn.Linear(hidden_size, 512)
    eps=1e-7,        # DeBERTa layer_norm_eps
)


def init_params(key, cfg):
    H, nh, hd, F = cfg["hidden"], cfg["heads"], cfg["head_dim"], cfg["ffn"]
    assert H == nh * hd

    def dense(k, fan_in, fan_out):
        w = jax.random.normal(k, (fan_in, fan_out), jnp.float32) * 0.02
        b = jnp.zeros((1, fan_out), jnp.float32)
        return w, b

    keys = jax.random.split(key, 2 + cfg["layers"])
    params = {
        "word_emb": jax.random.normal(keys[0], (cfg["vocab_size"], H), jnp.float32) * 0.02,
        "emb_ln_g": jnp.ones((1, H), jnp.float32),
        "emb_ln_b": jnp.zeros((1, H), jnp.float32),
    }

    layers = []
    for li in range(cfg["layers"]):
        lk = jax.random.split(keys[1 + li], 6)
        wq, bq = dense(lk[0], H, H)
        wk, bk = dense(lk[1], H, H)
        wv, bv = dense(lk[2], H, H)
        wo, bo = dense(lk[3], H, H)
        w1, b1 = dense(lk[4], H, F)
        w2, b2 = dense(lk[5], F, H)
        layers.append({
            # per-head stacked layouts so the fused kernel never lane-slices
            "wq": wq.reshape(H, nh, hd).transpose(1, 0, 2),   # (nh, H, hd)
            "wk": wk.reshape(H, nh, hd).transpose(1, 0, 2),
            "wv": wv.reshape(H, nh, hd).transpose(1, 0, 2),
            "bq": bq.reshape(nh, 1, hd),
            "bk": bk.reshape(nh, 1, hd),
            "bv": bv.reshape(nh, 1, hd),
            "wo": wo.reshape(nh, hd, H),                      # (nh, hd, H)
            "bo": bo,
            "ln1_g": jnp.ones((1, H), jnp.float32),
            "ln1_b": jnp.zeros((1, H), jnp.float32),
            "w1": w1, "b1": b1,
            "w2": w2, "b2": b2,
            "ln2_g": jnp.ones((1, H), jnp.float32),
            "ln2_b": jnp.zeros((1, H), jnp.float32),
        })
    params["layers"] = layers

    params["proj_w"], params["proj_b"] = dense(keys[1 + cfg["layers"]], H, cfg["proj_out"])
    return params


def text_encoder_forward(params, input_ids, attention_mask):
    cfg = CFG
    B, S = input_ids.shape
    H, nh, hd = cfg["hidden"], cfg["heads"], cfg["head_dim"]
    eps = float(cfg["eps"])
    scale = 1.0 / math.sqrt(hd)           # Python float — never captured as a tracer

    # ---- embeddings (gather stays in XLA) + embedding LayerNorm (Pallas) ----
    x = jnp.take(params["word_emb"], input_ids, axis=0)           # (B, S, H)
    x2d = pallas_layernorm(x.reshape(B * S, H),
                           params["emb_ln_g"], params["emb_ln_b"], eps)
    x = x2d.reshape(B, S, H)

    # attention mask passed once as (B, 1, S); additive -1e9 computed in-kernel
    mask = attention_mask.astype(jnp.float32).reshape(B, 1, S)

    # ---- fused transformer layers (one pallas_call each) ----
    for layer in params["layers"]:
        x = pallas_transformer_layer(x, mask, layer,
                                     nh=nh, hd=hd, scale=scale, eps=eps)

    # ---- last_hidden_state[:, 0, :] -> Linear(H, 512), fused in one kernel ----
    out = pallas_cls_projection(x, params["proj_w"], params["proj_b"])   # (B, 1, 512)
    return out.reshape(B, cfg["proj_out"])


# ----------------------------- Driver -----------------------------

if __name__ == "__main__":
    key = jax.random.PRNGKey(0)
    k_param, k_ids = jax.random.split(key)

    params = init_params(k_param, CFG)

    B, S = 2, 8
    input_ids = jax.random.randint(k_ids, (B, S), 0, CFG["vocab_size"], dtype=jnp.int32)
    # second example has two padded positions at the end to exercise masking
    attention_mask = jnp.array(
        [[1, 1, 1, 1, 1, 1, 1, 1],
         [1, 1, 1, 1, 1, 1, 0, 0]], dtype=jnp.int32)

    fwd = jax.jit(text_encoder_forward)
    out = jax.block_until_ready(fwd(params, input_ids, attention_mask))

    assert out.shape == (B, CFG["proj_out"]), out.shape
    assert bool(jnp.all(jnp.isfinite(out)))
    print("KERNEL_OK")
</pallas_src>

<mosaic_0001>
module attributes {stable_mosaic.version = 11 : i64} {
  func.func @_layernorm_kernel(%arg0: i32, %arg1: memref<16x128xf32, #tpu.memory_space<vmem>>, %arg2: memref<1x128xf32, #tpu.memory_space<vmem>>, %arg3: memref<1x128xf32, #tpu.memory_space<vmem>>, %arg4: memref<16x128xf32, #tpu.memory_space<vmem>>) attributes {dimension_semantics = [#tpu.dimension_semantics<arbitrary>], iteration_bounds = array<i64: 1>, scalar_prefetch = 0 : i64, scratch_operands = 0 : i64, tpu.core_type = #tpu.core_type<tc>, window_params = [{pipeline_mode = #tpu.pipeline_mode<synchronous>, transform_indices = @transform_0, window_bounds = array<i64: 16, 128>}, {pipeline_mode = #tpu.pipeline_mode<synchronous>, transform_indices = @transform_1, window_bounds = array<i64: 1, 128>}, {pipeline_mode = #tpu.pipeline_mode<synchronous>, transform_indices = @transform_2, window_bounds = array<i64: 1, 128>}, {pipeline_mode = #tpu.pipeline_mode<synchronous>, transform_indices = @transform_3, window_bounds = array<i64: 16, 128>}]} {
    %c0 = arith.constant 0 : index
    %c0_0 = arith.constant 0 : index
    %0 = vector.load %arg1[%c0, %c0_0] : memref<16x128xf32, #tpu.memory_space<vmem>>, vector<16x128xf32>
    %c0_1 = arith.constant 0 : index
    %c0_2 = arith.constant 0 : index
    %1 = vector.load %arg2[%c0_1, %c0_2] : memref<1x128xf32, #tpu.memory_space<vmem>>, vector<1x128xf32>
    %c0_3 = arith.constant 0 : index
    %c0_4 = arith.constant 0 : index
    %2 = vector.load %arg3[%c0_3, %c0_4] : memref<1x128xf32, #tpu.memory_space<vmem>>, vector<1x128xf32>
    %cst = arith.constant dense<0.000000e+00> : vector<16xf32>
    %3 = vector.multi_reduction <add>, %0, %cst [1] : vector<16x128xf32> to vector<16xf32>
    %4 = vector.shape_cast %3 : vector<16xf32> to vector<16x1xf32>
    %cst_5 = arith.constant 1.280000e+02 : f32
    %5 = vector.broadcast %cst_5 : f32 to vector<16x1xf32>
    %6 = arith.divf %4, %5 : vector<16x1xf32>
    %7 = vector.broadcast %6 : vector<16x1xf32> to vector<16x128xf32>
    %8 = arith.subf %0, %7 : vector<16x128xf32>
    %9 = arith.mulf %8, %8 : vector<16x128xf32>
    %cst_6 = arith.constant dense<0.000000e+00> : vector<16xf32>
    %10 = vector.multi_reduction <add>, %9, %cst_6 [1] : vector<16x128xf32> to vector<16xf32>
    %11 = vector.shape_cast %10 : vector<16xf32> to vector<16x1xf32>
    %cst_7 = arith.constant 1.280000e+02 : f32
    %12 = vector.broadcast %cst_7 : f32 to vector<16x1xf32>
    %13 = arith.divf %11, %12 : vector<16x1xf32>
    %14 = vector.broadcast %6 : vector<16x1xf32> to vector<16x128xf32>
    %15 = arith.subf %0, %14 : vector<16x128xf32>
    %cst_8 = arith.constant 1.000000e-07 : f32
    %16 = vector.broadcast %cst_8 : f32 to vector<16x1xf32>
    %17 = arith.addf %13, %16 : vector<16x1xf32>
    %18 = math.rsqrt %17 : vector<16x1xf32>
    %19 = vector.broadcast %18 : vector<16x1xf32> to vector<16x128xf32>
    %20 = arith.mulf %15, %19 : vector<16x128xf32>
    %21 = vector.broadcast %1 : vector<1x128xf32> to vector<16x128xf32>
    %22 = arith.mulf %20, %21 : vector<16x128xf32>
    %23 = vector.broadcast %2 : vector<1x128xf32> to vector<16x128xf32>
    %24 = arith.addf %22, %23 : vector<16x128xf32>
    %c0_9 = arith.constant 0 : index
    %c0_10 = arith.constant 0 : index
    %25 = vector.load %arg4[%c0_9, %c0_10] : memref<16x128xf32, #tpu.memory_space<vmem>>, vector<16x128xf32>
    tpu.vector_store %arg4[%c0_9, %c0_10], %24 {strides = array<i32>} : memref<16x128xf32, #tpu.memory_space<vmem>>, vector<16x128xf32>,
    return
  }
  func.func @transform_0(%arg0: i32) -> (i32, i32) {
    %c0_i32 = arith.constant 0 : i32
    %c0_i32_0 = arith.constant 0 : i32
    %c0_i32_1 = arith.constant 0 : i32
    return %c0_i32, %c0_i32_0 : i32, i32
  }
  func.func @transform_1(%arg0: i32) -> (i32, i32) {
    %c0_i32 = arith.constant 0 : i32
    %c0_i32_0 = arith.constant 0 : i32
    %c0_i32_1 = arith.constant 0 : i32
    return %c0_i32, %c0_i32_0 : i32, i32
  }
  func.func @transform_2(%arg0: i32) -> (i32, i32) {
    %c0_i32 = arith.constant 0 : i32
    %c0_i32_0 = arith.constant 0 : i32
    %c0_i32_1 = arith.constant 0 : i32
    return %c0_i32, %c0_i32_0 : i32, i32
  }
  func.func @transform_3(%arg0: i32) -> (i32, i32) {
    %c0_i32 = arith.constant 0 : i32
    %c0_i32_0 = arith.constant 0 : i32
    %c0_i32_1 = arith.constant 0 : i32
    return %c0_i32, %c0_i32_0 : i32, i32
  }
}

module attributes {stable_mosaic.version = 11 : i64} {
  func.func @_cls_proj_kernel(%arg0: i32, %arg1: memref<1x8x128xf32, #tpu.memory_space<vmem>>, %arg2: memref<128x512xf32, #tpu.memory_space<vmem>>, %arg3: memref<1x512xf32, #tpu.memory_space<vmem>>, %arg4: memref<1x1x512xf32, #tpu.memory_space<vmem>>) attributes {dimension_semantics = [#tpu.dimension_semantics<parallel>], iteration_bounds = array<i64: 2>, scalar_prefetch = 0 : i64, scratch_operands = 0 : i64, tpu.core_type = #tpu.core_type<tc>, window_params = [{transform_indices = @transform_0, window_bounds = array<i64: 1, 8, 128>}, {pipeline_mode = #tpu.pipeline_mode<synchronous>, transform_indices = @transform_1, window_bounds = array<i64: 128, 512>}, {pipeline_mode = #tpu.pipeline_mode<synchronous>, transform_indices = @transform_2, window_bounds = array<i64: 1, 512>}, {transform_indices = @transform_3, window_bounds = array<i64: 1, 1, 512>}]} {
    %c0 = arith.constant 0 : index
    %c0_0 = arith.constant 0 : index
    %c0_1 = arith.constant 0 : index
    %0 = vector.load %arg1[%c0, %c0_0, %c0_1] : memref<1x8x128xf32, #tpu.memory_space<vmem>>, vector<1x8x128xf32>
    %1 = vector.shape_cast %0 : vector<1x8x128xf32> to vector<8x128xf32>
    %2 = vector.extract_strided_slice %1 {offsets = [0, 0], sizes = [1, 128], strides = [1, 1]} : vector<8x128xf32> to vector<1x128xf32>
    %3 = arith.truncf %2 : vector<1x128xf32> to vector<1x128xbf16>
    %c0_2 = arith.constant 0 : index
    %c0_3 = arith.constant 0 : index
    %4 = vector.load %arg2[%c0_2, %c0_3] : memref<128x512xf32, #tpu.memory_space<vmem>>, vector<128x512xf32>
    %5 = arith.truncf %4 : vector<128x512xf32> to vector<128x512xbf16>
    %cst = arith.constant dense<0.000000e+00> : vector<1x512xf32>
    %6 = tpu.matmul %3, %5, %cst {dimension_numbers = #tpu.dot_dimension_numbers<[1], [0], [0], [1], [0, 0, 1, 1], [], []>} : vector<1x128xbf16>, vector<128x512xbf16>, vector<1x512xf32> -> vector<1x512xf32>
    %c0_4 = arith.constant 0 : index
    %c0_5 = arith.constant 0 : index
    %7 = vector.load %arg3[%c0_4, %c0_5] : memref<1x512xf32, #tpu.memory_space<vmem>>, vector<1x512xf32>
    %8 = arith.addf %6, %7 : vector<1x512xf32>
    %c0_6 = arith.constant 0 : index
    %c0_7 = arith.constant 0 : index
    %c0_8 = arith.constant 0 : index
    %9 = vector.load %arg4[%c0_6, %c0_7, %c0_8] : memref<1x1x512xf32, #tpu.memory_space<vmem>>, vector<1x1x512xf32>
    %10 = vector.shape_cast %9 : vector<1x1x512xf32> to vector<1x512xf32>
    %11 = vector.shape_cast %8 : vector<1x512xf32> to vector<1x1x512xf32>
    tpu.vector_store %arg4[%c0_6, %c0_7, %c0_8], %11 {strides = array<i32>} : memref<1x1x512xf32, #tpu.memory_space<vmem>>, vector<1x1x512xf32>,
    return
  }
  func.func @transform_0(%arg0: i32) -> (i32, i32, i32) {
    %c0_i32 = arith.constant 0 : i32
    %c0_i32_0 = arith.constant 0 : i32
    %c0_i32_1 = arith.constant 0 : i32
    return %arg0, %c0_i32, %c0_i32_0 : i32, i32, i32
  }
  func.func @transform_1(%arg0: i32) -> (i32, i32) {
    %c0_i32 = arith.constant 0 : i32
    %c0_i32_0 = arith.constant 0 : i32
    %c0_i32_1 = arith.constant 0 : i32
    return %c0_i32, %c0_i32_0 : i32, i32
  }
  func.func @transform_2(%arg0: i32) -> (i32, i32) {
    %c0_i32 = arith.constant 0 : i32
    %c0_i32_0 = arith.constant 0 : i32
    %c0_i32_1 = arith.constant 0 : i32
    return %c0_i32, %c0_i32_0 : i32, i32
  }
  func.func @transform_3(%arg0: i32) -> (i32, i32, i32) {
    %c0_i32 = arith.constant 0 : i32
    %c0_i32_0 = arith.constant 0 : i32
    %c0_i32_1 = arith.constant 0 : i32
    return %arg0, %c0_i32, %c0_i32_0 : i32, i32, i32
  }
}

module attributes {stable_mosaic.version = 11 : i64} {
  func.func @_layer_kernel(%arg0: i32, %arg1: memref<1x8x128xf32, #tpu.memory_space<vmem>>, %arg2: memref<1x1x8xf32, #tpu.memory_space<vmem>>, %arg3: memref<4x128x32xf32, #tpu.memory_space<vmem>>, %arg4: memref<4x128x32xf32, #tpu.memory_space<vmem>>, %arg5: memref<4x128x32xf32, #tpu.memory_space<vmem>>, %arg6: memref<4x1x32xf32, #tpu.memory_space<vmem>>, %arg7: memref<4x1x32xf32, #tpu.memory_space<vmem>>, %arg8: memref<4x1x32xf32, #tpu.memory_space<vmem>>, %arg9: memref<4x32x128xf32, #tpu.memory_space<vmem>>, %arg10: memref<1x128xf32, #tpu.memory_space<vmem>>, %arg11: memref<1x128xf32, #tpu.memory_space<vmem>>, %arg12: memref<1x128xf32, #tpu.memory_space<vmem>>, %arg13: memref<128x256xf32, #tpu.memory_space<vmem>>, %arg14: memref<1x256xf32, #tpu.memory_space<vmem>>, %arg15: memref<256x128xf32, #tpu.memory_space<vmem>>, %arg16: memref<1x128xf32, #tpu.memory_space<vmem>>, %arg17: memref<1x128xf32, #tpu.memory_space<vmem>>, %arg18: memref<1x128xf32, #tpu.memory_space<vmem>>, %arg19: memref<1x8x128xf32, #tpu.memory_space<vmem>>) attributes {dimension_semantics = [#tpu.dimension_semantics<parallel>], iteration_bounds = array<i64: 2>, scalar_prefetch = 0 : i64, scratch_operands = 0 : i64, tpu.core_type = #tpu.core_type<tc>, window_params = [{transform_indices = @transform_0, window_bounds = array<i64: 1, 8, 128>}, {transform_indices = @transform_1, window_bounds = array<i64: 1, 1, 8>}, {pipeline_mode = #tpu.pipeline_mode<synchronous>, transform_indices = @transform_2, window_bounds = array<i64: 4, 128, 32>}, {pipeline_mode = #tpu.pipeline_mode<synchronous>, transform_indices = @transform_3, window_bounds = array<i64: 4, 128, 32>}, {pipeline_mode = #tpu.pipeline_mode<synchronous>, transform_indices = @transform_4, window_bounds = array<i64: 4, 128, 32>}, {pipeline_mode = #tpu.pipeline_mode<synchronous>, transform_indices = @transform_5, window_bounds = array<i64: 4, 1, 32>}, {pipeline_mode = #tpu.pipeline_mode<synchronous>, transform_indices = @transform_6, window_bounds = array<i64: 4, 1, 32>}, {pipeline_mode = #tpu.pipeline_mode<synchronous>, transform_indices = @transform_7, window_bounds = array<i64: 4, 1, 32>}, {pipeline_mode = #tpu.pipeline_mode<synchronous>, transform_indices = @transform_8, window_bounds = array<i64: 4, 32, 128>}, {pipeline_mode = #tpu.pipeline_mode<synchronous>, transform_indices = @transform_9, window_bounds = array<i64: 1, 128>}, {pipeline_mode = #tpu.pipeline_mode<synchronous>, transform_indices = @transform_10, window_bounds = array<i64: 1, 128>}, {pipeline_mode = #tpu.pipeline_mode<synchronous>, transform_indices = @transform_11, window_bounds = array<i64: 1, 128>}, {pipeline_mode = #tpu.pipeline_mode<synchronous>, transform_indices = @transform_12, window_bounds = array<i64: 128, 256>}, {pipeline_mode = #tpu.pipeline_mode<synchronous>, transform_indices = @transform_13, window_bounds = array<i64: 1, 256>}, {pipeline_mode = #tpu.pipeline_mode<synchronous>, transform_indices = @transform_14, window_bounds = array<i64: 256, 128>}, {pipeline_mode = #tpu.pipeline_mode<synchronous>, transform_indices = @transform_15, window_bounds = array<i64: 1, 128>}, {pipeline_mode = #tpu.pipeline_mode<synchronous>, transform_indices = @transform_16, window_bounds = array<i64: 1, 128>}, {pipeline_mode = #tpu.pipeline_mode<synchronous>, transform_indices = @transform_17, window_bounds = array<i64: 1, 128>}, {transform_indices = @transform_18, window_bounds = array<i64: 1, 8, 128>}]} {
    %c0 = arith.constant 0 : index
    %c0_0 = arith.constant 0 : index
    %c0_1 = arith.constant 0 : index
    %0 = vector.load %arg1[%c0, %c0_0, %c0_1] : memref<1x8x128xf32, #tpu.memory_space<vmem>>, vector<1x8x128xf32>
    %1 = vector.shape_cast %0 : vector<1x8x128xf32> to vector<8x128xf32>
    %2 = arith.truncf %1 : vector<8x128xf32> to vector<8x128xbf16>
    %c0_2 = arith.constant 0 : index
    %c0_3 = arith.constant 0 : index
    %c0_4 = arith.constant 0 : index
    %3 = vector.load %arg2[%c0_2, %c0_3, %c0_4] : memref<1x1x8xf32, #tpu.memory_space<vmem>>, vector<1x1x8xf32>
    %4 = vector.shape_cast %3 : vector<1x1x8xf32> to vector<1x8xf32>
    %cst = arith.constant 1.000000e+00 : f32
    %5 = vector.broadcast %cst : f32 to vector<1x8xf32>
    %6 = arith.subf %4, %5 : vector<1x8xf32>
    %cst_5 = arith.constant 1.000000e+09 : f32
    %7 = vector.broadcast %cst_5 : f32 to vector<1x8xf32>
    %8 = arith.mulf %6, %7 : vector<1x8xf32>
    %cst_6 = arith.constant 0.000000e+00 : f32
    %9 = vector.broadcast %cst_6 : f32 to vector<8x128xf32>
    %c0_7 = arith.constant 0 : index
    %c0_8 = arith.constant 0 : index
    %c0_9 = arith.constant 0 : index
    %10 = vector.load %arg3[%c0_7, %c0_8, %c0_9] : memref<4x128x32xf32, #tpu.memory_space<vmem>>, vector<1x128x32xf32>
    %11 = vector.shape_cast %10 : vector<1x128x32xf32> to vector<128x32xf32>
    %12 = arith.truncf %11 : vector<128x32xf32> to vector<128x32xbf16>
    %c0_10 = arith.constant 0 : index
    %c0_11 = arith.constant 0 : index
    %c0_12 = arith.constant 0 : index
    %13 = vector.load %arg4[%c0_10, %c0_11, %c0_12] : memref<4x128x32xf32, #tpu.memory_space<vmem>>, vector<1x128x32xf32>
    %14 = vector.shape_cast %13 : vector<1x128x32xf32> to vector<128x32xf32>
    %15 = arith.truncf %14 : vector<128x32xf32> to vector<128x32xbf16>
    %c0_13 = arith.constant 0 : index
    %c0_14 = arith.constant 0 : index
    %c0_15 = arith.constant 0 : index
    %16 = vector.load %arg5[%c0_13, %c0_14, %c0_15] : memref<4x128x32xf32, #tpu.memory_space<vmem>>, vector<1x128x32xf32>
    %17 = vector.shape_cast %16 : vector<1x128x32xf32> to vector<128x32xf32>
    %18 = arith.truncf %17 : vector<128x32xf32> to vector<128x32xbf16>
    %cst_16 = arith.constant dense<0.000000e+00> : vector<8x32xf32>
    %19 = tpu.matmul %2, %12, %cst_16 {dimension_numbers = #tpu.dot_dimension_numbers<[1], [0], [0], [1], [0, 0, 1, 1], [], []>} : vector<8x128xbf16>, vector<128x32xbf16>, vector<8x32xf32> -> vector<8x32xf32>
    %c0_17 = arith.constant 0 : index
    %c0_18 = arith.constant 0 : index
    %c0_19 = arith.constant 0 : index
    %20 = vector.load %arg6[%c0_17, %c0_18, %c0_19] : memref<4x1x32xf32, #tpu.memory_space<vmem>>, vector<1x1x32xf32>
    %21 = vector.shape_cast %20 : vector<1x1x32xf32> to vector<1x32xf32>
    %22 = vector.broadcast %21 : vector<1x32xf32> to vector<8x32xf32>
    %23 = arith.addf %19, %22 : vector<8x32xf32>
    %cst_20 = arith.constant dense<0.000000e+00> : vector<8x32xf32>
    %24 = tpu.matmul %2, %15, %cst_20 {dimension_numbers = #tpu.dot_dimension_numbers<[1], [0], [0], [1], [0, 0, 1, 1], [], []>} : vector<8x128xbf16>, vector<128x32xbf16>, vector<8x32xf32> -> vector<8x32xf32>
    %c0_21 = arith.constant 0 : index
    %c0_22 = arith.constant 0 : index
    %c0_23 = arith.constant 0 : index
    %25 = vector.load %arg7[%c0_21, %c0_22, %c0_23] : memref<4x1x32xf32, #tpu.memory_space<vmem>>, vector<1x1x32xf32>
    %26 = vector.shape_cast %25 : vector<1x1x32xf32> to vector<1x32xf32>
    %27 = vector.broadcast %26 : vector<1x32xf32> to vector<8x32xf32>
    %28 = arith.addf %24, %27 : vector<8x32xf32>
    %cst_24 = arith.constant dense<0.000000e+00> : vector<8x32xf32>
    %29 = tpu.matmul %2, %18, %cst_24 {dimension_numbers = #tpu.dot_dimension_numbers<[1], [0], [0], [1], [0, 0, 1, 1], [], []>} : vector<8x128xbf16>, vector<128x32xbf16>, vector<8x32xf32> -> vector<8x32xf32>
    %c0_25 = arith.constant 0 : index
    %c0_26 = arith.constant 0 : index
    %c0_27 = arith.constant 0 : index
    %30 = vector.load %arg8[%c0_25, %c0_26, %c0_27] : memref<4x1x32xf32, #tpu.memory_space<vmem>>, vector<1x1x32xf32>
    %31 = vector.shape_cast %30 : vector<1x1x32xf32> to vector<1x32xf32>
    %32 = vector.broadcast %31 : vector<1x32xf32> to vector<8x32xf32>
    %33 = arith.addf %29, %32 : vector<8x32xf32>
    %34 = arith.truncf %23 : vector<8x32xf32> to vector<8x32xbf16>
    %35 = arith.truncf %28 : vector<8x32xf32> to vector<8x32xbf16>
    %cst_28 = arith.constant dense<0.000000e+00> : vector<8x8xf32>
    %36 = tpu.matmul %34, %35, %cst_28 {dimension_numbers = #tpu.dot_dimension_numbers<[1], [1], [0], [0], [0, 0, 1, 0], [], []>} : vector<8x32xbf16>, vector<8x32xbf16>, vector<8x8xf32> -> vector<8x8xf32>
    %cst_29 = arith.constant 0.176776692 : f32
    %37 = vector.broadcast %cst_29 : f32 to vector<8x8xf32>
    %38 = arith.mulf %36, %37 : vector<8x8xf32>
    %39 = vector.broadcast %8 : vector<1x8xf32> to vector<8x8xf32>
    %40 = arith.addf %38, %39 : vector<8x8xf32>
    %cst_30 = arith.constant dense<0xFF800000> : vector<8xf32>
    %41 = vector.multi_reduction <maximumf>, %40, %cst_30 [1] : vector<8x8xf32> to vector<8xf32>
    %42 = vector.shape_cast %41 : vector<8xf32> to vector<8x1xf32>
    %43 = vector.broadcast %42 : vector<8x1xf32> to vector<8x8xf32>
    %44 = arith.subf %40, %43 : vector<8x8xf32>
    %45 = math.exp %44 : vector<8x8xf32>
    %cst_31 = arith.constant dense<0.000000e+00> : vector<8xf32>
    %46 = vector.multi_reduction <add>, %45, %cst_31 [1] : vector<8x8xf32> to vector<8xf32>
    %47 = vector.shape_cast %46 : vector<8xf32> to vector<8x1xf32>
    %48 = tpu.reciprocal %47 {approx = true} : vector<8x1xf32> -> vector<8x1xf32>
    %49 = vector.broadcast %48 : vector<8x1xf32> to vector<8x8xf32>
    %50 = arith.mulf %45, %49 : vector<8x8xf32>
    %51 = arith.truncf %50 : vector<8x8xf32> to vector<8x8xbf16>
    %52 = arith.truncf %33 : vector<8x32xf32> to vector<8x32xbf16>
    %cst_32 = arith.constant dense<0.000000e+00> : vector<8x32xf32>
    %53 = tpu.matmul %51, %52, %cst_32 {dimension_numbers = #tpu.dot_dimension_numbers<[1], [0], [0], [1], [0, 0, 1, 1], [], []>} : vector<8x8xbf16>, vector<8x32xbf16>, vector<8x32xf32> -> vector<8x32xf32>
    %54 = arith.truncf %53 : vector<8x32xf32> to vector<8x32xbf16>
    %c0_33 = arith.constant 0 : index
    %c0_34 = arith.constant 0 : index
    %c0_35 = arith.constant 0 : index
    %55 = vector.load %arg9[%c0_33, %c0_34, %c0_35] : memref<4x32x128xf32, #tpu.memory_space<vmem>>, vector<1x32x128xf32>
    %56 = vector.shape_cast %55 : vector<1x32x128xf32> to vector<32x128xf32>
    %57 = arith.truncf %56 : vector<32x128xf32> to vector<32x128xbf16>
    %cst_36 = arith.constant dense<0.000000e+00> : vector<8x128xf32>
    %58 = tpu.matmul %54, %57, %cst_36 {dimension_numbers = #tpu.dot_dimension_numbers<[1], [0], [0], [1], [0, 0, 1, 1], [], []>} : vector<8x32xbf16>, vector<32x128xbf16>, vector<8x128xf32> -> vector<8x128xf32>
    %59 = arith.addf %9, %58 : vector<8x128xf32>
    %c1 = arith.constant 1 : index
    %c0_37 = arith.constant 0 : index
    %c0_38 = arith.constant 0 : index
    %60 = vector.load %arg3[%c1, %c0_37, %c0_38] : memref<4x128x32xf32, #tpu.memory_space<vmem>>, vector<1x128x32xf32>
    %61 = vector.shape_cast %60 : vector<1x128x32xf32> to vector<128x32xf32>
    %62 = arith.truncf %61 : vector<128x32xf32> to vector<128x32xbf16>
    %c1_39 = arith.constant 1 : index
    %c0_40 = arith.constant 0 : index
    %c0_41 = arith.constant 0 : index
    %63 = vector.load %arg4[%c1_39, %c0_40, %c0_41] : memref<4x128x32xf32, #tpu.memory_space<vmem>>, vector<1x128x32xf32>
    %64 = vector.shape_cast %63 : vector<1x128x32xf32> to vector<128x32xf32>
    %65 = arith.truncf %64 : vector<128x32xf32> to vector<128x32xbf16>
    %c1_42 = arith.constant 1 : index
    %c0_43 = arith.constant 0 : index
    %c0_44 = arith.constant 0 : index
    %66 = vector.load %arg5[%c1_42, %c0_43, %c0_44] : memref<4x128x32xf32, #tpu.memory_space<vmem>>, vector<1x128x32xf32>
    %67 = vector.shape_cast %66 : vector<1x128x32xf32> to vector<128x32xf32>
    %68 = arith.truncf %67 : vector<128x32xf32> to vector<128x32xbf16>
    %cst_45 = arith.constant dense<0.000000e+00> : vector<8x32xf32>
    %69 = tpu.matmul %2, %62, %cst_45 {dimension_numbers = #tpu.dot_dimension_numbers<[1], [0], [0], [1], [0, 0, 1, 1], [], []>} : vector<8x128xbf16>, vector<128x32xbf16>, vector<8x32xf32> -> vector<8x32xf32>
    %c1_46 = arith.constant 1 : index
    %c0_47 = arith.constant 0 : index
    %c0_48 = arith.constant 0 : index
    %70 = vector.load %arg6[%c1_46, %c0_47, %c0_48] : memref<4x1x32xf32, #tpu.memory_space<vmem>>, vector<1x1x32xf32>
    %71 = vector.shape_cast %70 : vector<1x1x32xf32> to vector<1x32xf32>
    %72 = vector.broadcast %71 : vector<1x32xf32> to vector<8x32xf32>
    %73 = arith.addf %69, %72 : vector<8x32xf32>
    %cst_49 = arith.constant dense<0.000000e+00> : vector<8x32xf32>
    %74 = tpu.matmul %2, %65, %cst_49 {dimension_numbers = #tpu.dot_dimension_numbers<[1], [0], [0], [1], [0, 0, 1, 1], [], []>} : vector<8x128xbf16>, vector<128x32xbf16>, vector<8x32xf32> -> vector<8x32xf32>
    %c1_50 = arith.constant 1 : index
    %c0_51 = arith.constant 0 : index
    %c0_52 = arith.constant 0 : index
    %75 = vector.load %arg7[%c1_50, %c0_51, %c0_52] : memref<4x1x32xf32, #tpu.memory_space<vmem>>, vector<1x1x32xf32>
    %76 = vector.shape_cast %75 : vector<1x1x32xf32> to vector<1x32xf32>
    %77 = vector.broadcast %76 : vector<1x32xf32> to vector<8x32xf32>
    %78 = arith.addf %74, %77 : vector<8x32xf32>
    %cst_53 = arith.constant dense<0.000000e+00> : vector<8x32xf32>
    %79 = tpu.matmul %2, %68, %cst_53 {dimension_numbers = #tpu.dot_dimension_numbers<[1], [0], [0], [1], [0, 0, 1, 1], [], []>} : vector<8x128xbf16>, vector<128x32xbf16>, vector<8x32xf32> -> vector<8x32xf32>
    %c1_54 = arith.constant 1 : index
    %c0_55 = arith.constant 0 : index
    %c0_56 = arith.constant 0 : index
    %80 = vector.load %arg8[%c1_54, %c0_55, %c0_56] : memref<4x1x32xf32, #tpu.memory_space<vmem>>, vector<1x1x32xf32>
    %81 = vector.shape_cast %80 : vector<1x1x32xf32> to vector<1x32xf32>
    %82 = vector.broadcast %81 : vector<1x32xf32> to vector<8x32xf32>
    %83 = arith.addf %79, %82 : vector<8x32xf32>
    %84 = arith.truncf %73 : vector<8x32xf32> to vector<8x32xbf16>
    %85 = arith.truncf %78 : vector<8x32xf32> to vector<8x32xbf16>
    %cst_57 = arith.constant dense<0.000000e+00> : vector<8x8xf32>
    %86 = tpu.matmul %84, %85, %cst_57 {dimension_numbers = #tpu.dot_dimension_numbers<[1], [1], [0], [0], [0, 0, 1, 0], [], []>} : vector<8x32xbf16>, vector<8x32xbf16>, vector<8x8xf32> -> vector<8x8xf32>
    %cst_58 = arith.constant 0.176776692 : f32
    %87 = vector.broadcast %cst_58 : f32 to vector<8x8xf32>
    %88 = arith.mulf %86, %87 : vector<8x8xf32>
    %89 = vector.broadcast %8 : vector<1x8xf32> to vector<8x8xf32>
    %90 = arith.addf %88, %89 : vector<8x8xf32>
    %cst_59 = arith.constant dense<0xFF800000> : vector<8xf32>
    %91 = vector.multi_reduction <maximumf>, %90, %cst_59 [1] : vector<8x8xf32> to vector<8xf32>
    %92 = vector.shape_cast %91 : vector<8xf32> to vector<8x1xf32>
    %93 = vector.broadcast %92 : vector<8x1xf32> to vector<8x8xf32>
    %94 = arith.subf %90, %93 : vector<8x8xf32>
    %95 = math.exp %94 : vector<8x8xf32>
    %cst_60 = arith.constant dense<0.000000e+00> : vector<8xf32>
    %96 = vector.multi_reduction <add>, %95, %cst_60 [1] : vector<8x8xf32> to vector<8xf32>
    %97 = vector.shape_cast %96 : vector<8xf32> to vector<8x1xf32>
    %98 = tpu.reciprocal %97 {approx = true} : vector<8x1xf32> -> vector<8x1xf32>
    %99 = vector.broadcast %98 : vector<8x1xf32> to vector<8x8xf32>
    %100 = arith.mulf %95, %99 : vector<8x8xf32>
    %101 = arith.truncf %100 : vector<8x8xf32> to vector<8x8xbf16>
    %102 = arith.truncf %83 : vector<8x32xf32> to vector<8x32xbf16>
    %cst_61 = arith.constant dense<0.000000e+00> : vector<8x32xf32>
    %103 = tpu.matmul %101, %102, %cst_61 {dimension_numbers = #tpu.dot_dimension_numbers<[1], [0], [0], [1], [0, 0, 1, 1], [], []>} : vector<8x8xbf16>, vector<8x32xbf16>, vector<8x32xf32> -> vector<8x32xf32>
    %104 = arith.truncf %103 : vector<8x32xf32> to vector<8x32xbf16>
    %c1_62 = arith.constant 1 : index
    %c0_63 = arith.constant 0 : index
    %c0_64 = arith.constant 0 : index
    %105 = vector.load %arg9[%c1_62, %c0_63, %c0_64] : memref<4x32x128xf32, #tpu.memory_space<vmem>>, vector<1x32x128xf32>
    %106 = vector.shape_cast %105 : vector<1x32x128xf32> to vector<32x128xf32>
    %107 = arith.truncf %106 : vector<32x128xf32> to vector<32x128xbf16>
    %cst_65 = arith.constant dense<0.000000e+00> : vector<8x128xf32>
    %108 = tpu.matmul %104, %107, %cst_65 {dimension_numbers = #tpu.dot_dimension_numbers<[1], [0], [0], [1], [0, 0, 1, 1], [], []>} : vector<8x32xbf16>, vector<32x128xbf16>, vector<8x128xf32> -> vector<8x128xf32>
    %109 = arith.addf %59, %108 : vector<8x128xf32>
    %c2 = arith.constant 2 : index
    %c0_66 = arith.constant 0 : index
    %c0_67 = arith.constant 0 : index
    %110 = vector.load %arg3[%c2, %c0_66, %c0_67] : memref<4x128x32xf32, #tpu.memory_space<vmem>>, vector<1x128x32xf32>
    %111 = vector.shape_cast %110 : vector<1x128x32xf32> to vector<128x32xf32>
    %112 = arith.truncf %111 : vector<128x32xf32> to vector<128x32xbf16>
    %c2_68 = arith.constant 2 : index
    %c0_69 = arith.constant 0 : index
    %c0_70 = arith.constant 0 : index
    %113 = vector.load %arg4[%c2_68, %c0_69, %c0_70] : memref<4x128x32xf32, #tpu.memory_space<vmem>>, vector<1x128x32xf32>
    %114 = vector.shape_cast %113 : vector<1x128x32xf32> to vector<128x32xf32>
    %115 = arith.truncf %114 : vector<128x32xf32> to vector<128x32xbf16>
    %c2_71 = arith.constant 2 : index
    %c0_72 = arith.constant 0 : index
    %c0_73 = arith.constant 0 : index
    %116 = vector.load %arg5[%c2_71, %c0_72, %c0_73] : memref<4x128x32xf32, #tpu.memory_space<vmem>>, vector<1x128x32xf32>
    %117 = vector.shape_cast %116 : vector<1x128x32xf32> to vector<128x32xf32>
    %118 = arith.truncf %117 : vector<128x32xf32> to vector<128x32xbf16>
    %cst_74 = arith.constant dense<0.000000e+00> : vector<8x32xf32>
    %119 = tpu.matmul %2, %112, %cst_74 {dimension_numbers = #tpu.dot_dimension_numbers<[1], [0], [0], [1], [0, 0, 1, 1], [], []>} : vector<8x128xbf16>, vector<128x32xbf16>, vector<8x32xf32> -> vector<8x32xf32>
    %c2_75 = arith.constant 2 : index
    %c0_76 = arith.constant 0 : index
    %c0_77 = arith.constant 0 : index
    %120 = vector.load %arg6[%c2_75, %c0_76, %c0_77] : memref<4x1x32xf32, #tpu.memory_space<vmem>>, vector<1x1x32xf32>
    %121 = vector.shape_cast %120 : vector<1x1x32xf32> to vector<1x32xf32>
    %122 = vector.broadcast %121 : vector<1x32xf32> to vector<8x32xf32>
    %123 = arith.addf %119, %122 : vector<8x32xf32>
    %cst_78 = arith.constant dense<0.000000e+00> : vector<8x32xf32>
    %124 = tpu.matmul %2, %115, %cst_78 {dimension_numbers = #tpu.dot_dimension_numbers<[1], [0], [0], [1], [0, 0, 1, 1], [], []>} : vector<8x128xbf16>, vector<128x32xbf16>, vector<8x32xf32> -> vector<8x32xf32>
    %c2_79 = arith.constant 2 : index
    %c0_80 = arith.constant 0 : index
    %c0_81 = arith.constant 0 : index
    %125 = vector.load %arg7[%c2_79, %c0_80, %c0_81] : memref<4x1x32xf32, #tpu.memory_space<vmem>>, vector<1x1x32xf32>
    %126 = vector.shape_cast %125 : vector<1x1x32xf32> to vector<1x32xf32>
    %127 = vector.broadcast %126 : vector<1x32xf32> to vector<8x32xf32>
    %128 = arith.addf %124, %127 : vector<8x32xf32>
    %cst_82 = arith.constant dense<0.000000e+00> : vector<8x32xf32>
    %129 = tpu.matmul %2, %118, %cst_82 {dimension_numbers = #tpu.dot_dimension_numbers<[1], [0], [0], [1], [0, 0, 1, 1], [], []>} : vector<8x128xbf16>, vector<128x32xbf16>, vector<8x32xf32> -> vector<8x32xf32>
    %c2_83 = arith.constant 2 : index
    %c0_84 = arith.constant 0 : index
    %c0_85 = arith.constant 0 : index
    %130 = vector.load %arg8[%c2_83, %c0_84, %c0_85] : memref<4x1x32xf32, #tpu.memory_space<vmem>>, vector<1x1x32xf32>
    %131 = vector.shape_cast %130 : vector<1x1x32xf32> to vector<1x32xf32>
    %132 = vector.broadcast %131 : vector<1x32xf32> to vector<8x32xf32>
    %133 = arith.addf %129, %132 : vector<8x32xf32>
    %134 = arith.truncf %123 : vector<8x32xf32> to vector<8x32xbf16>
    %135 = arith.truncf %128 : vector<8x32xf32> to vector<8x32xbf16>
    %cst_86 = arith.constant dense<0.000000e+00> : vector<8x8xf32>
    %136 = tpu.matmul %134, %135, %cst_86 {dimension_numbers = #tpu.dot_dimension_numbers<[1], [1], [0], [0], [0, 0, 1, 0], [], []>} : vector<8x32xbf16>, vector<8x32xbf16>, vector<8x8xf32> -> vector<8x8xf32>
    %cst_87 = arith.constant 0.176776692 : f32
    %137 = vector.broadcast %cst_87 : f32 to vector<8x8xf32>
    %138 = arith.mulf %136, %137 : vector<8x8xf32>
    %139 = vector.broadcast %8 : vector<1x8xf32> to vector<8x8xf32>
    %140 = arith.addf %138, %139 : vector<8x8xf32>
    %cst_88 = arith.constant dense<0xFF800000> : vector<8xf32>
    %141 = vector.multi_reduction <maximumf>, %140, %cst_88 [1] : vector<8x8xf32> to vector<8xf32>
    %142 = vector.shape_cast %141 : vector<8xf32> to vector<8x1xf32>
    %143 = vector.broadcast %142 : vector<8x1xf32> to vector<8x8xf32>
    %144 = arith.subf %140, %143 : vector<8x8xf32>
    %145 = math.exp %144 : vector<8x8xf32>
    %cst_89 = arith.constant dense<0.000000e+00> : vector<8xf32>
    %146 = vector.multi_reduction <add>, %145, %cst_89 [1] : vector<8x8xf32> to vector<8xf32>
    %147 = vector.shape_cast %146 : vector<8xf32> to vector<8x1xf32>
    %148 = tpu.reciprocal %147 {approx = true} : vector<8x1xf32> -> vector<8x1xf32>
    %149 = vector.broadcast %148 : vector<8x1xf32> to vector<8x8xf32>
    %150 = arith.mulf %145, %149 : vector<8x8xf32>
    %151 = arith.truncf %150 : vector<8x8xf32> to vector<8x8xbf16>
    %152 = arith.truncf %133 : vector<8x32xf32> to vector<8x32xbf16>
    %cst_90 = arith.constant dense<0.000000e+00> : vector<8x32xf32>
    %153 = tpu.matmul %151, %152, %cst_90 {dimension_numbers = #tpu.dot_dimension_numbers<[1], [0], [0], [1], [0, 0, 1, 1], [], []>} : vector<8x8xbf16>, vector<8x32xbf16>, vector<8x32xf32> -> vector<8x32xf32>
    %154 = arith.truncf %153 : vector<8x32xf32> to vector<8x32xbf16>
    %c2_91 = arith.constant 2 : index
    %c0_92 = arith.constant 0 : index
    %c0_93 = arith.constant 0 : index
    %155 = vector.load %arg9[%c2_91, %c0_92, %c0_93] : memref<4x32x128xf32, #tpu.memory_space<vmem>>, vector<1x32x128xf32>
    %156 = vector.shape_cast %155 : vector<1x32x128xf32> to vector<32x128xf32>
    %157 = arith.truncf %156 : vector<32x128xf32> to vector<32x128xbf16>
    %cst_94 = arith.constant dense<0.000000e+00> : vector<8x128xf32>
    %158 = tpu.matmul %154, %157, %cst_94 {dimension_numbers = #tpu.dot_dimension_numbers<[1], [0], [0], [1], [0, 0, 1, 1], [], []>} : vector<8x32xbf16>, vector<32x128xbf16>, vector<8x128xf32> -> vector<8x128xf32>
    %159 = arith.addf %109, %158 : vector<8x128xf32>
    %c3 = arith.constant 3 : index
    %c0_95 = arith.constant 0 : index
    %c0_96 = arith.constant 0 : index
    %160 = vector.load %arg3[%c3, %c0_95, %c0_96] : memref<4x128x32xf32, #tpu.memory_space<vmem>>, vector<1x128x32xf32>
    %161 = vector.shape_cast %160 : vector<1x128x32xf32> to vector<128x32xf32>
    %162 = arith.truncf %161 : vector<128x32xf32> to vector<128x32xbf16>
    %c3_97 = arith.constant 3 : index
    %c0_98 = arith.constant 0 : index
    %c0_99 = arith.constant 0 : index
    %163 = vector.load %arg4[%c3_97, %c0_98, %c0_99] : memref<4x128x32xf32, #tpu.memory_space<vmem>>, vector<1x128x32xf32>
    %164 = vector.shape_cast %163 : vector<1x128x32xf32> to vector<128x32xf32>
    %165 = arith.truncf %164 : vector<128x32xf32> to vector<128x32xbf16>
    %c3_100 = arith.constant 3 : index
    %c0_101 = arith.constant 0 : index
    %c0_102 = arith.constant 0 : index
    %166 = vector.load %arg5[%c3_100, %c0_101, %c0_102] : memref<4x128x32xf32, #tpu.memory_space<vmem>>, vector<1x128x32xf32>
    %167 = vector.shape_cast %166 : vector<1x128x32xf32> to vector<128x32xf32>
    %168 = arith.truncf %167 : vector<128x32xf32> to vector<128x32xbf16>
    %cst_103 = arith.constant dense<0.000000e+00> : vector<8x32xf32>
    %169 = tpu.matmul %2, %162, %cst_103 {dimension_numbers = #tpu.dot_dimension_numbers<[1], [0], [0], [1], [0, 0, 1, 1], [], []>} : vector<8x128xbf16>, vector<128x32xbf16>, vector<8x32xf32> -> vector<8x32xf32>
    %c3_104 = arith.constant 3 : index
    %c0_105 = arith.constant 0 : index
    %c0_106 = arith.constant 0 : index
    %170 = vector.load %arg6[%c3_104, %c0_105, %c0_106] : memref<4x1x32xf32, #tpu.memory_space<vmem>>, vector<1x1x32xf32>
    %171 = vector.shape_cast %170 : vector<1x1x32xf32> to vector<1x32xf32>
    %172 = vector.broadcast %171 : vector<1x32xf32> to vector<8x32xf32>
    %173 = arith.addf %169, %172 : vector<8x32xf32>
    %cst_107 = arith.constant dense<0.000000e+00> : vector<8x32xf32>
    %174 = tpu.matmul %2, %165, %cst_107 {dimension_numbers = #tpu.dot_dimension_numbers<[1], [0], [0], [1], [0, 0, 1, 1], [], []>} : vector<8x128xbf16>, vector<128x32xbf16>, vector<8x32xf32> -> vector<8x32xf32>
    %c3_108 = arith.constant 3 : index
    %c0_109 = arith.constant 0 : index
    %c0_110 = arith.constant 0 : index
    %175 = vector.load %arg7[%c3_108, %c0_109, %c0_110] : memref<4x1x32xf32, #tpu.memory_space<vmem>>, vector<1x1x32xf32>
    %176 = vector.shape_cast %175 : vector<1x1x32xf32> to vector<1x32xf32>
    %177 = vector.broadcast %176 : vector<1x32xf32> to vector<8x32xf32>
    %178 = arith.addf %174, %177 : vector<8x32xf32>
    %cst_111 = arith.constant dense<0.000000e+00> : vector<8x32xf32>
    %179 = tpu.matmul %2, %168, %cst_111 {dimension_numbers = #tpu.dot_dimension_numbers<[1], [0], [0], [1], [0, 0, 1, 1], [], []>} : vector<8x128xbf16>, vector<128x32xbf16>, vector<8x32xf32> -> vector<8x32xf32>
    %c3_112 = arith.constant 3 : index
    %c0_113 = arith.constant 0 : index
    %c0_114 = arith.constant 0 : index
    %180 = vector.load %arg8[%c3_112, %c0_113, %c0_114] : memref<4x1x32xf32, #tpu.memory_space<vmem>>, vector<1x1x32xf32>
    %181 = vector.shape_cast %180 : vector<1x1x32xf32> to vector<1x32xf32>
    %182 = vector.broadcast %181 : vector<1x32xf32> to vector<8x32xf32>
    %183 = arith.addf %179, %182 : vector<8x32xf32>
    %184 = arith.truncf %173 : vector<8x32xf32> to vector<8x32xbf16>
    %185 = arith.truncf %178 : vector<8x32xf32> to vector<8x32xbf16>
    %cst_115 = arith.constant dense<0.000000e+00> : vector<8x8xf32>
    %186 = tpu.matmul %184, %185, %cst_115 {dimension_numbers = #tpu.dot_dimension_numbers<[1], [1], [0], [0], [0, 0, 1, 0], [], []>} : vector<8x32xbf16>, vector<8x32xbf16>, vector<8x8xf32> -> vector<8x8xf32>
    %cst_116 = arith.constant 0.176776692 : f32
    %187 = vector.broadcast %cst_116 : f32 to vector<8x8xf32>
    %188 = arith.mulf %186, %187 : vector<8x8xf32>
    %189 = vector.broadcast %8 : vector<1x8xf32> to vector<8x8xf32>
    %190 = arith.addf %188, %189 : vector<8x8xf32>
    %cst_117 = arith.constant dense<0xFF800000> : vector<8xf32>
    %191 = vector.multi_reduction <maximumf>, %190, %cst_117 [1] : vector<8x8xf32> to vector<8xf32>
    %192 = vector.shape_cast %191 : vector<8xf32> to vector<8x1xf32>
    %193 = vector.broadcast %192 : vector<8x1xf32> to vector<8x8xf32>
    %194 = arith.subf %190, %193 : vector<8x8xf32>
    %195 = math.exp %194 : vector<8x8xf32>
    %cst_118 = arith.constant dense<0.000000e+00> : vector<8xf32>
    %196 = vector.multi_reduction <add>, %195, %cst_118 [1] : vector<8x8xf32> to vector<8xf32>
    %197 = vector.shape_cast %196 : vector<8xf32> to vector<8x1xf32>
    %198 = tpu.reciprocal %197 {approx = true} : vector<8x1xf32> -> vector<8x1xf32>
    %199 = vector.broadcast %198 : vector<8x1xf32> to vector<8x8xf32>
    %200 = arith.mulf %195, %199 : vector<8x8xf32>
    %201 = arith.truncf %200 : vector<8x8xf32> to vector<8x8xbf16>
    %202 = arith.truncf %183 : vector<8x32xf32> to vector<8x32xbf16>
    %cst_119 = arith.constant dense<0.000000e+00> : vector<8x32xf32>
    %203 = tpu.matmul %201, %202, %cst_119 {dimension_numbers = #tpu.dot_dimension_numbers<[1], [0], [0], [1], [0, 0, 1, 1], [], []>} : vector<8x8xbf16>, vector<8x32xbf16>, vector<8x32xf32> -> vector<8x32xf32>
    %204 = arith.truncf %203 : vector<8x32xf32> to vector<8x32xbf16>
    %c3_120 = arith.constant 3 : index
    %c0_121 = arith.constant 0 : index
    %c0_122 = arith.constant 0 : index
    %205 = vector.load %arg9[%c3_120, %c0_121, %c0_122] : memref<4x32x128xf32, #tpu.memory_space<vmem>>, vector<1x32x128xf32>
    %206 = vector.shape_cast %205 : vector<1x32x128xf32> to vector<32x128xf32>
    %207 = arith.truncf %206 : vector<32x128xf32> to vector<32x128xbf16>
    %cst_123 = arith.constant dense<0.000000e+00> : vector<8x128xf32>
    %208 = tpu.matmul %204, %207, %cst_123 {dimension_numbers = #tpu.dot_dimension_numbers<[1], [0], [0], [1], [0, 0, 1, 1], [], []>} : vector<8x32xbf16>, vector<32x128xbf16>, vector<8x128xf32> -> vector<8x128xf32>
    %209 = arith.addf %159, %208 : vector<8x128xf32>
    %c0_124 = arith.constant 0 : index
    %c0_125 = arith.constant 0 : index
    %210 = vector.load %arg10[%c0_124, %c0_125] : memref<1x128xf32, #tpu.memory_space<vmem>>, vector<1x128xf32>
    %211 = vector.broadcast %210 : vector<1x128xf32> to vector<8x128xf32>
    %212 = arith.addf %209, %211 : vector<8x128xf32>
    %213 = arith.addf %1, %212 : vector<8x128xf32>
    %c0_126 = arith.constant 0 : index
    %c0_127 = arith.constant 0 : index
    %214 = vector.load %arg11[%c0_126, %c0_127] : memref<1x128xf32, #tpu.memory_space<vmem>>, vector<1x128xf32>
    %c0_128 = arith.constant 0 : index
    %c0_129 = arith.constant 0 : index
    %215 = vector.load %arg12[%c0_128, %c0_129] : memref<1x128xf32, #tpu.memory_space<vmem>>, vector<1x128xf32>
    %cst_130 = arith.constant dense<0.000000e+00> : vector<8xf32>
    %216 = vector.multi_reduction <add>, %213, %cst_130 [1] : vector<8x128xf32> to vector<8xf32>
    %217 = vector.shape_cast %216 : vector<8xf32> to vector<8x1xf32>
    %cst_131 = arith.constant 1.280000e+02 : f32
    %218 = vector.broadcast %cst_131 : f32 to vector<8x1xf32>
    %219 = arith.divf %217, %218 : vector<8x1xf32>
    %220 = vector.broadcast %219 : vector<8x1xf32> to vector<8x128xf32>
    %221 = arith.subf %213, %220 : vector<8x128xf32>
    %222 = arith.mulf %221, %221 : vector<8x128xf32>
    %cst_132 = arith.constant dense<0.000000e+00> : vector<8xf32>
    %223 = vector.multi_reduction <add>, %222, %cst_132 [1] : vector<8x128xf32> to vector<8xf32>
    %224 = vector.shape_cast %223 : vector<8xf32> to vector<8x1xf32>
    %cst_133 = arith.constant 1.280000e+02 : f32
    %225 = vector.broadcast %cst_133 : f32 to vector<8x1xf32>
    %226 = arith.divf %224, %225 : vector<8x1xf32>
    %227 = vector.broadcast %219 : vector<8x1xf32> to vector<8x128xf32>
    %228 = arith.subf %213, %227 : vector<8x128xf32>
    %cst_134 = arith.constant 1.000000e-07 : f32
    %229 = vector.broadcast %cst_134 : f32 to vector<8x1xf32>
    %230 = arith.addf %226, %229 : vector<8x1xf32>
    %231 = math.rsqrt %230 : vector<8x1xf32>
    %232 = vector.broadcast %231 : vector<8x1xf32> to vector<8x128xf32>
    %233 = arith.mulf %228, %232 : vector<8x128xf32>
    %234 = vector.broadcast %214 : vector<1x128xf32> to vector<8x128xf32>
    %235 = arith.mulf %233, %234 : vector<8x128xf32>
    %236 = vector.broadcast %215 : vector<1x128xf32> to vector<8x128xf32>
    %237 = arith.addf %235, %236 : vector<8x128xf32>
    %238 = arith.truncf %237 : vector<8x128xf32> to vector<8x128xbf16>
    %c0_135 = arith.constant 0 : index
    %c0_136 = arith.constant 0 : index
    %239 = vector.load %arg13[%c0_135, %c0_136] : memref<128x256xf32, #tpu.memory_space<vmem>>, vector<128x256xf32>
    %240 = arith.truncf %239 : vector<128x256xf32> to vector<128x256xbf16>
    %cst_137 = arith.constant dense<0.000000e+00> : vector<8x256xf32>
    %241 = tpu.matmul %238, %240, %cst_137 {dimension_numbers = #tpu.dot_dimension_numbers<[1], [0], [0], [1], [0, 0, 1, 1], [], []>} : vector<8x128xbf16>, vector<128x256xbf16>, vector<8x256xf32> -> vector<8x256xf32>
    %c0_138 = arith.constant 0 : index
    %c0_139 = arith.constant 0 : index
    %242 = vector.load %arg14[%c0_138, %c0_139] : memref<1x256xf32, #tpu.memory_space<vmem>>, vector<1x256xf32>
    %243 = vector.broadcast %242 : vector<1x256xf32> to vector<8x256xf32>
    %244 = arith.addf %241, %243 : vector<8x256xf32>
    %245 = arith.mulf %244, %244 : vector<8x256xf32>
    %246 = arith.mulf %244, %245 : vector<8x256xf32>
    %cst_140 = arith.constant 4.471500e-02 : f32
    %247 = vector.broadcast %cst_140 : f32 to vector<8x256xf32>
    %248 = arith.mulf %247, %246 : vector<8x256xf32>
    %249 = arith.addf %244, %248 : vector<8x256xf32>
    %cst_141 = arith.constant 0.797884583 : f32
    %250 = vector.broadcast %cst_141 : f32 to vector<8x256xf32>
    %251 = arith.mulf %250, %249 : vector<8x256xf32>
    %252 = math.tanh %251 : vector<8x256xf32>
    %cst_142 = arith.constant 1.000000e+00 : f32
    %253 = vector.broadcast %cst_142 : f32 to vector<8x256xf32>
    %254 = arith.addf %253, %252 : vector<8x256xf32>
    %cst_143 = arith.constant 5.000000e-01 : f32
    %255 = vector.broadcast %cst_143 : f32 to vector<8x256xf32>
    %256 = arith.mulf %255, %254 : vector<8x256xf32>
    %257 = arith.mulf %244, %256 : vector<8x256xf32>
    %258 = arith.truncf %257 : vector<8x256xf32> to vector<8x256xbf16>
    %c0_144 = arith.constant 0 : index
    %c0_145 = arith.constant 0 : index
    %259 = vector.load %arg15[%c0_144, %c0_145] : memref<256x128xf32, #tpu.memory_space<vmem>>, vector<256x128xf32>
    %260 = arith.truncf %259 : vector<256x128xf32> to vector<256x128xbf16>
    %cst_146 = arith.constant dense<0.000000e+00> : vector<8x128xf32>
    %261 = tpu.matmul %258, %260, %cst_146 {dimension_numbers = #tpu.dot_dimension_numbers<[1], [0], [0], [1], [0, 0, 1, 1], [], []>} : vector<8x256xbf16>, vector<256x128xbf16>, vector<8x128xf32> -> vector<8x128xf32>
    %c0_147 = arith.constant 0 : index
    %c0_148 = arith.constant 0 : index
    %262 = vector.load %arg16[%c0_147, %c0_148] : memref<1x128xf32, #tpu.memory_space<vmem>>, vector<1x128xf32>
    %263 = vector.broadcast %262 : vector<1x128xf32> to vector<8x128xf32>
    %264 = arith.addf %261, %263 : vector<8x128xf32>
    %265 = arith.addf %237, %264 : vector<8x128xf32>
    %c0_149 = arith.constant 0 : index
    %c0_150 = arith.constant 0 : index
    %266 = vector.load %arg17[%c0_149, %c0_150] : memref<1x128xf32, #tpu.memory_space<vmem>>, vector<1x128xf32>
    %c0_151 = arith.constant 0 : index
    %c0_152 = arith.constant 0 : index
    %267 = vector.load %arg18[%c0_151, %c0_152] : memref<1x128xf32, #tpu.memory_space<vmem>>, vector<1x128xf32>
    %cst_153 = arith.constant dense<0.000000e+00> : vector<8xf32>
    %268 = vector.multi_reduction <add>, %265, %cst_153 [1] : vector<8x128xf32> to vector<8xf32>
    %269 = vector.shape_cast %268 : vector<8xf32> to vector<8x1xf32>
    %cst_154 = arith.constant 1.280000e+02 : f32
    %270 = vector.broadcast %cst_154 : f32 to vector<8x1xf32>
    %271 = arith.divf %269, %270 : vector<8x1xf32>
    %272 = vector.broadcast %271 : vector<8x1xf32> to vector<8x128xf32>
    %273 = arith.subf %265, %272 : vector<8x128xf32>
    %274 = arith.mulf %273, %273 : vector<8x128xf32>
    %cst_155 = arith.constant dense<0.000000e+00> : vector<8xf32>
    %275 = vector.multi_reduction <add>, %274, %cst_155 [1] : vector<8x128xf32> to vector<8xf32>
    %276 = vector.shape_cast %275 : vector<8xf32> to vector<8x1xf32>
    %cst_156 = arith.constant 1.280000e+02 : f32
    %277 = vector.broadcast %cst_156 : f32 to vector<8x1xf32>
    %278 = arith.divf %276, %277 : vector<8x1xf32>
    %279 = vector.broadcast %271 : vector<8x1xf32> to vector<8x128xf32>
    %280 = arith.subf %265, %279 : vector<8x128xf32>
    %cst_157 = arith.constant 1.000000e-07 : f32
    %281 = vector.broadcast %cst_157 : f32 to vector<8x1xf32>
    %282 = arith.addf %278, %281 : vector<8x1xf32>
    %283 = math.rsqrt %282 : vector<8x1xf32>
    %284 = vector.broadcast %283 : vector<8x1xf32> to vector<8x128xf32>
    %285 = arith.mulf %280, %284 : vector<8x128xf32>
    %286 = vector.broadcast %266 : vector<1x128xf32> to vector<8x128xf32>
    %287 = arith.mulf %285, %286 : vector<8x128xf32>
    %288 = vector.broadcast %267 : vector<1x128xf32> to vector<8x128xf32>
    %289 = arith.addf %287, %288 : vector<8x128xf32>
    %c0_158 = arith.constant 0 : index
    %c0_159 = arith.constant 0 : index
    %c0_160 = arith.constant 0 : index
    %290 = vector.load %arg19[%c0_158, %c0_159, %c0_160] : memref<1x8x128xf32, #tpu.memory_space<vmem>>, vector<1x8x128xf32>
    %291 = vector.shape_cast %290 : vector<1x8x128xf32> to vector<8x128xf32>
    %292 = vector.shape_cast %289 : vector<8x128xf32> to vector<1x8x128xf32>
    tpu.vector_store %arg19[%c0_158, %c0_159, %c0_160], %292 {strides = array<i32>} : memref<1x8x128xf32, #tpu.memory_space<vmem>>, vector<1x8x128xf32>,
    return
  }
  func.func @transform_0(%arg0: i32) -> (i32, i32, i32) {
    %c0_i32 = arith.constant 0 : i32
    %c0_i32_0 = arith.constant 0 : i32
    %c0_i32_1 = arith.constant 0 : i32
    return %arg0, %c0_i32, %c0_i32_0 : i32, i32, i32
  }
  func.func @transform_1(%arg0: i32) -> (i32, i32, i32) {
    %c0_i32 = arith.constant 0 : i32
    %c0_i32_0 = arith.constant 0 : i32
    %c0_i32_1 = arith.constant 0 : i32
    return %arg0, %c0_i32, %c0_i32_0 : i32, i32, i32
  }
  func.func @transform_2(%arg0: i32) -> (i32, i32, i32) {
    %c0_i32 = arith.constant 0 : i32
    %c0_i32_0 = arith.constant 0 : i32
    %c0_i32_1 = arith.constant 0 : i32
    %c0_i32_2 = arith.constant 0 : i32
    return %c0_i32, %c0_i32_0, %c0_i32_1 : i32, i32, i32
  }
  func.func @transform_3(%arg0: i32) -> (i32, i32, i32) {
    %c0_i32 = arith.constant 0 : i32
    %c0_i32_0 = arith.constant 0 : i32
    %c0_i32_1 = arith.constant 0 : i32
    %c0_i32_2 = arith.constant 0 : i32
    return %c0_i32, %c0_i32_0, %c0_i32_1 : i32, i32, i32
  }
  func.func @transform_4(%arg0: i32) -> (i32, i32, i32) {
    %c0_i32 = arith.constant 0 : i32
    %c0_i32_0 = arith.constant 0 : i32
    %c0_i32_1 = arith.constant 0 : i32
    %c0_i32_2 = arith.constant 0 : i32
    return %c0_i32, %c0_i32_0, %c0_i32_1 : i32, i32, i32
  }
  func.func @transform_5(%arg0: i32) -> (i32, i32, i32) {
    %c0_i32 = arith.constant 0 : i32
    %c0_i32_0 = arith.constant 0 : i32
    %c0_i32_1 = arith.constant 0 : i32
    %c0_i32_2 = arith.constant 0 : i32
    return %c0_i32, %c0_i32_0, %c0_i32_1 : i32, i32, i32
  }
  func.func @transform_6(%arg0: i32) -> (i32, i32, i32) {
    %c0_i32 = arith.constant 0 : i32
    %c0_i32_0 = arith.constant 0 : i32
    %c0_i32_1 = arith.constant 0 : i32
    %c0_i32_2 = arith.constant 0 : i32
    return %c0_i32, %c0_i32_0, %c0_i32_1 : i32, i32, i32
  }
  func.func @transform_7(%arg0: i32) -> (i32, i32, i32) {
    %c0_i32 = arith.constant 0 : i32
    %c0_i32_0 = arith.constant 0 : i32
    %c0_i32_1 = arith.constant 0 : i32
    %c0_i32_2 = arith.constant 0 : i32
    return %c0_i32, %c0_i32_0, %c0_i32_1 : i32, i32, i32
  }
  func.func @transform_8(%arg0: i32) -> (i32, i32, i32) {
    %c0_i32 = arith.constant 0 : i32
    %c0_i32_0 = arith.constant 0 : i32
    %c0_i32_1 = arith.constant 0 : i32
    %c0_i32_2 = arith.constant 0 : i32
    return %c0_i32, %c0_i32_0, %c0_i32_1 : i32, i32, i32
  }
  func.func @transform_9(%arg0: i32) -> (i32, i32) {
    %c0_i32 = arith.constant 0 : i32
    %c0_i32_0 = arith.constant 0 : i32
    %c0_i32_1 = arith.constant 0 : i32
    return %c0_i32, %c0_i32_0 : i32, i32
  }
  func.func @transform_10(%arg0: i32) -> (i32, i32) {
    %c0_i32 = arith.constant 0 : i32
    %c0_i32_0 = arith.constant 0 : i32
    %c0_i32_1 = arith.constant 0 : i32
    return %c0_i32, %c0_i32_0 : i32, i32
  }
  func.func @transform_11(%arg0: i32) -> (i32, i32) {
    %c0_i32 = arith.constant 0 : i32
    %c0_i32_0 = arith.constant 0 : i32
    %c0_i32_1 = arith.constant 0 : i32
    return %c0_i32, %c0_i32_0 : i32, i32
  }
  func.func @transform_12(%arg0: i32) -> (i32, i32) {
    %c0_i32 = arith.constant 0 : i32
    %c0_i32_0 = arith.constant 0 : i32
    %c0_i32_1 = arith.constant 0 : i32
    return %c0_i32, %c0_i32_0 : i32, i32
  }
  func.func @transform_13(%arg0: i32) -> (i32, i32) {
    %c0_i32 = arith.constant 0 : i32
    %c0_i32_0 = arith.constant 0 : i32
    %c0_i32_1 = arith.constant 0 : i32
    return %c0_i32, %c0_i32_0 : i32, i32
  }
  func.func @transform_14(%arg0: i32) -> (i32, i32) {
    %c0_i32 = arith.constant 0 : i32
    %c0_i32_0 = arith.constant 0 : i32
    %c0_i32_1 = arith.constant 0 : i32
    return %c0_i32, %c0_i32_0 : i32, i32
  }
  func.func @transform_15(%arg0: i32) -> (i32, i32) {
    %c0_i32 = arith.constant 0 : i32
    %c0_i32_0 = arith.constant 0 : i32
    %c0_i32_1 = arith.constant 0 : i32
    return %c0_i32, %c0_i32_0 : i32, i32
  }
  func.func @transform_16(%arg0: i32) -> (i32, i32) {
    %c0_i32 = arith.constant 0 : i32
    %c0_i32_0 = arith.constant 0 : i32
    %c0_i32_1 = arith.constant 0 : i32
    return %c0_i32, %c0_i32_0 : i32, i32
  }
  func.func @transform_17(%arg0: i32) -> (i32, i32) {
    %c0_i32 = arith.constant 0 : i32
    %c0_i32_0 = arith.constant 0 : i32
    %c0_i32_1 = arith.constant 0 : i32
    return %c0_i32, %c0_i32_0 : i32, i32
  }
  func.func @transform_18(%arg0: i32) -> (i32, i32, i32) {
    %c0_i32 = arith.constant 0 : i32
    %c0_i32_0 = arith.constant 0 : i32
    %c0_i32_1 = arith.constant 0 : i32
    return %arg0, %c0_i32, %c0_i32_0 : i32, i32, i32
  }
}

</mosaic_0001>

<bundles_post_ra>
// kernel: text_encoder_forward.4
= control target key start
LH: loop header
LB: loop body
LE: loop exit
PB: predicated region body
PF: predicated region fallthrough
CT: control target
= control target key end

     0   :  { %s107_s0 = inlined_call_operand.vmem [shape: f32[16,128], index: 0, kind: input, shape index: {}]   ;;  %s108_s1 = inlined_call_operand.vmem [shape: f32[1,128], index: 1, kind: input, shape index: {}]   ;;  %s109_s2 = inlined_call_operand.vmem [shape: f32[1,128], index: 2, kind: input, shape index: {}]   ;;  %s110_s3 = inlined_call_operand.vmem [shape: f32[16,128], index: 3, kind: output, shape index: {}]  }
   0x1   :  { %v14_v0 = vld [vmem:[%s107_s0] sm:$0xff]  ;;  %v15_v1 = vld [vmem:[%s107_s0 + $0x8] sm:$0xff] }
   0x2   :  { %18 = vadd.xlane.f32.xlu0 %v14_v0  ;;  %v63_v17 = vld [vmem:[%s108_s1] ss:$0 sm:$0xff] }
   0x3   :  { %v64_v19 = vld [vmem:[%s109_s2] ss:$0 sm:$0xff] }
   0x6   :  { %20 = vadd.xlane.f32.xlu0 %v15_v1 }
  0x8f   :  { %v19_v2 = vpop.xlane.xlu0 %18 }
  0x90   :  { %v23_v3 = vmul.f32 0.0078125, %v19_v2 }
  0x92   :  { %v25_v4 = vsub.f32 %v14_v0, %v23_v3 }
  0x93   :  { %v21_v5 = vpop.xlane.xlu0 %20 }
  0x94   :  { %v24_v6 = vmul.f32 0.0078125, %v21_v5  ;;  %v27_v7 = vmul.f32 %v25_v4, %v25_v4 }
  0x96   :  { %v26_v8 = vsub.f32 %v15_v1, %v24_v6  ;;  %29 = vadd.xlane.f32.xlu1 %v27_v7 }
  0x98   :  { %v28_v9 = vmul.f32 %v26_v8, %v26_v8 }
  0x9a   :  { %31 = vadd.xlane.f32.xlu1 %v28_v9 }
 0x123   :  { %v30_v10 = vpop.xlane.xlu1 %29 }
 0x124   :  { %v33_v11 = vmul.f32 0.0078125, %v30_v10 }
 0x126   :  { %v35_v12 = vadd.f32 1e-07, %v33_v11 }
 0x127   :  { %v32_v13 = vpop.xlane.xlu1 %31 }
 0x128   :  { %65 = vrsqrt.f32 %v35_v12  ;;  %v34_v14 = vmul.f32 0.0078125, %v32_v13 }
 0x12a   :  { %v36_v15 = vadd.f32 1e-07, %v34_v14 }
 0x12c   :  { %67 = vrsqrt.f32 %v36_v15 }
 0x132   :  { %v66_v16 = vpop.eup %65 }
 0x133   :  { %v39_v18 = vmul.f32 %v66_v16, %v25_v4 }
 0x135   :  { %v47_v20 = vmul.f32 %v63_v17, %v39_v18 }
 0x136   :  { %v68_v21 = vpop.eup %67 }
 0x137   :  { %v55_v22 = vadd.f32 %v64_v19, %v47_v20  ;;  %v40_v23 = vmul.f32 %v68_v21, %v26_v8 }
 0x139   :  { %57 = vst [vmem:[%s110_s3] sm:$0xff] %v55_v22  ;;  %v48_v24 = vmul.f32 %v63_v17, %v40_v23 }
 0x13b   :  { %v56_v25 = vadd.f32 %v64_v19, %v48_v24 }
 0x13d   :  { %58 = vst [vmem:[%s110_s3 + $0x8] sm:$0xff] %v56_v25 }

// kernel: text_encoder_forward.7
= control target key start
LH: loop header
LB: loop body
LE: loop exit
PB: predicated region body
PF: predicated region fallthrough
CT: control target
= control target key end

     0   :  { %s505_s12 = smov 0   ;;  %s731_s0 = inlined_call_operand.vmem [shape: f32[2,8,128], index: 0, kind: input, shape index: {}]   ;;  %s732_s1 = inlined_call_operand.vmem [shape: f32[128,512], index: 1, kind: input, shape index: {}]   ;;  %s733_s2 = inlined_call_operand.vmem [shape: f32[1,512], index: 2, kind: input, shape index: {}]   ;;  %s734_s3 = inlined_call_operand.vmem [shape: f32[2,1,512], index: 3, kind: output, shape index: {}]  }
   0x1 LB: > { %s456_s13 = sadd.s32 4294967295, %s481_s12   ;;  %p460_p0 = scmp.ge.s32.totalorder %s481_s12, 1  ;;  %s481_s12 = sphi %s505_s12, %s13_s12  }
   0x2   : > { %p136_p1 = scmp.lt.s32.totalorder %s481_s12, 3 }
   0x4   : > { %p137_p2 = pnand %p460_p0, %p136_p1 }
   0x5   : > { %v170_v0 = vld [vmem:[%s732_s1 + $0x8] sm:$0xff] (!%p137_p2)  ;;  %v172_v2 = vld [vmem:[%s732_s1 + $0x18] sm:$0xff] (!%p137_p2)  ;;  %v169_v5 = vld [vmem:[%s732_s1] sm:$0xff] (!%p137_p2)  ;;  %v483_v7 = vmov (!%p137_p2), 0   ;;  %p641_p3 = scmp.lt.s32.totalorder (!%p137_p2), %s456_s13, 1 }
   0x6   : > { %140 = sbr.rel (%p137_p2) target bundleno = 266 (0x10a), region = 32  ;;  %v174_v1 = vld [vmem:[%s732_s1 + $0x28] sm:$0xff] (!%p137_p2)  ;;  %v176_v4 = vld [vmem:[%s732_s1 + $0x38] sm:$0xff] (!%p137_p2)  ;;  %v173_v6 = vld [vmem:[%s732_s1 + $0x20] sm:$0xff] (!%p137_p2)  ;;  %319 = vmatprep.mubr.bf16.mxu0 (!%p137_p2), %v483_v7  ;;  %360 = vmatprep.mubr.bf16.mxu1 (!%p137_p2), %v483_v7 }
   0x7   : > { %v234_v3 = vpack.c.bf16 (!%p137_p2), %v174_v1, %v170_v0  ;;  %v236_v8 = vpack.c.bf16 (!%p137_p2), %v176_v4, %v172_v2  ;;  %v233_v9 = vpack.c.bf16 (!%p137_p2), %v173_v6, %v169_v5  ;;  %v171_v10 = vld [vmem:[%s732_s1 + $0x10] sm:$0xff] (!%p137_p2)  ;;  %v178_v12 = vld [vmem:[%s732_s1 + $0x48] sm:$0xff] (!%p137_p2)  ;;  %v180_v15 = vld [vmem:[%s732_s1 + $0x58] sm:$0xff] (!%p137_p2) }
   0x8   : > { %v175_v11 = vld [vmem:[%s732_s1 + $0x30] sm:$0xff] (!%p137_p2)  ;;  %v182_v14 = vld [vmem:[%s732_s1 + $0x68] sm:$0xff] (!%p137_p2)  ;;  %v184_v16 = vld [vmem:[%s732_s1 + $0x78] sm:$0xff] (!%p137_p2) }
   0x9   : > { %287 = vmatprep.subr.bf16.mxu0 (!%p137_p2), %v234_v3  ;;  %v235_v13 = vpack.c.bf16 (!%p137_p2), %v175_v11, %v171_v10  ;;  %328 = vmatprep.subr.bf16.mxu1 (!%p137_p2), %v236_v8  ;;  %v238_v17 = vpack.c.bf16 (!%p137_p2), %v182_v14, %v178_v12  ;;  %v240_v18 = vpack.c.bf16 (!%p137_p2), %v184_v16, %v180_v15  ;;  %v177_v19 = vld [vmem:[%s732_s1 + $0x40] sm:$0xff] (!%p137_p2)  ;;  %v179_v21 = vld [vmem:[%s732_s1 + $0x50] sm:$0xff] (!%p137_p2)  ;;  %v186_v24 = vld [vmem:[%s732_s1 + $0x88] sm:$0xff] (!%p137_p2) }
   0xa   : > { %288 = vmatpush1.bf16.msra.mxu0 (!%p137_p2), %v233_v9  ;;  %v181_v20 = vld [vmem:[%s732_s1 + $0x60] sm:$0xff] (!%p137_p2)  ;;  %v183_v23 = vld [vmem:[%s732_s1 + $0x70] sm:$0xff] (!%p137_p2)  ;;  %v190_v25 = vld [vmem:[%s732_s1 + $0xa8] sm:$0xff] (!%p137_p2) }
   0xb   : > { %329 = vmatpush1.bf16.msra.mxu1 (!%p137_p2), %v235_v13  ;;  %v237_v22 = vpack.c.bf16 (!%p137_p2), %v181_v20, %v177_v19  ;;  %289 = vmatprep.subr.bf16.mxu0 (!%p137_p2), %v238_v17  ;;  %v239_v26 = vpack.c.bf16 (!%p137_p2), %v183_v23, %v179_v21  ;;  %v242_v27 = vpack.c.bf16 (!%p137_p2), %v190_v25, %v186_v24  ;;  %v188_v28 = vld [vmem:[%s732_s1 + $0x98] sm:$0xff] (!%p137_p2)  ;;  %v185_v30 = vld [vmem:[%s732_s1 + $0x80] sm:$0xff] (!%p137_p2)  ;;  %v187_v33 = vld [vmem:[%s732_s1 + $0x90] sm:$0xff] (!%p137_p2) }
   0xc   : > { %330 = vmatprep.subr.bf16.mxu1 (!%p137_p2), %v240_v18  ;;  %v192_v29 = vld [vmem:[%s732_s1 + $0xb8] sm:$0xff] (!%p137_p2)  ;;  %v189_v32 = vld [vmem:[%s732_s1 + $0xa0] sm:$0xff] (!%p137_p2)  ;;  %v191_v34 = vld [vmem:[%s732_s1 + $0xb0] sm:$0xff] (!%p137_p2) }
   0xd   : > { %v244_v31 = vpack.c.bf16 %v192_v29, %v188_v28  ;;  %v241_v35 = vpack.c.bf16 %v189_v32, %v185_v30  ;;  %v194_v36 = vld [vmem:[%s732_s1 + $0xc8] sm:$0xff]  ;;  %v196_v38 = vld [vmem:[%s732_s1 + $0xd8] sm:$0xff]  ;;  %v243_v39 = vpack.c.bf16 %v191_v34, %v187_v33  ;;  %v193_v42 = vld [vmem:[%s732_s1 + $0xc0] sm:$0xff]  ;;  %s737_s13 = smov (!%p641_p3, %s456_s13), 1 }
   0xe   : > { %290 = vmatpush1.bf16.msra.mxu0 %v237_v22  ;;  %v198_v37 = vld [vmem:[%s732_s1 + $0xe8] sm:$0xff]  ;;  %v200_v41 = vld [vmem:[%s732_s1 + $0xf8] sm:$0xff]  ;;  %v197_v43 = vld [vmem:[%s732_s1 + $0xe0] sm:$0xff]  ;;  %s461_s4 = sshll.u32 %s737_s13, 3  ;;  %s462_s24 = sshll.u32 %s737_s13, 2 }
   0xf   : > { %331 = vmatpush1.bf16.msra.mxu1 %v239_v26  ;;  %291 = vmatprep.subr.bf16.mxu0 %v242_v27  ;;  %v246_v40 = vpack.c.bf16 %v198_v37, %v194_v36  ;;  %v248_v44 = vpack.c.bf16 %v200_v41, %v196_v38  ;;  %v195_v45 = vld [vmem:[%s732_s1 + $0xd0] sm:$0xff]  ;;  %v202_v47 = vld [vmem:[%s732_s1 + $0x108] sm:$0xff]  ;;  %v204_v49 = vld [vmem:[%s732_s1 + $0x118] sm:$0xff]  ;;  %v245_v51 = vpack.c.bf16 %v197_v43, %v193_v42  ;;  %s161_s17 = scalar_lea.vmem %s731_s0, %s461_s4  ;;  %v484_v41 = vmov 1966171168   ;;  %s165_s27 = scalar_lea.vmem %s734_s3, %s462_s24 }
  0x10   : > { %332 = vmatprep.subr.bf16.mxu1 %v244_v31  ;;  %v199_v46 = vld [vmem:[%s732_s1 + $0xf0] sm:$0xff]  ;;  %v206_v48 = vld [vmem:[%s732_s1 + $0x128] sm:$0xff]  ;;  %v208_v50 = vld [vmem:[%s732_s1 + $0x138] sm:$0xff]  ;;  %v376_v42 = vunpack.c.l.s4 %v484_v41 }
  0x11   : > { %v247_v52 = vpack.c.bf16 %v199_v46, %v195_v45  ;;  %v250_v53 = vpack.c.bf16 %v206_v48, %v202_v47  ;;  %v201_v54 = vld [vmem:[%s732_s1 + $0x100] sm:$0xff]  ;;  %v203_v56 = vld [vmem:[%s732_s1 + $0x110] sm:$0xff]  ;;  %v252_v57 = vpack.c.bf16 %v208_v50, %v204_v49  ;;  %v210_v59 = vld [vmem:[%s732_s1 + $0x148] sm:$0xff] }
  0x12   : > { %292 = vmatpush1.bf16.msra.mxu0 %v241_v35  ;;  %v205_v55 = vld [vmem:[%s732_s1 + $0x120] sm:$0xff]  ;;  %v207_v58 = vld [vmem:[%s732_s1 + $0x130] sm:$0xff]  ;;  %v214_v60 = vld [vmem:[%s732_s1 + $0x168] sm:$0xff]  ;;  %v267_v35 = vlaneseq  ;;  %v377_v47 = vunpack.c.0.s8 %v376_v42 }
  0x13   : > { %333 = vmatpush1.bf16.msra.mxu1 %v243_v39  ;;  %293 = vmatprep.subr.bf16.mxu0 %v246_v40  ;;  %v212_v61 = vld [vmem:[%s732_s1 + $0x158] sm:$0xff]  ;;  %v249_v63 = vpack.c.bf16 %v205_v55, %v201_v54  ;;  %v251_v0 = vpack.c.bf16 %v207_v58, %v203_v56  ;;  %v254_v1 = vpack.c.bf16 %v214_v60, %v210_v59  ;;  %v209_v2 = vld [vmem:[%s732_s1 + $0x140] sm:$0xff]  ;;  %v211_v4 = vld [vmem:[%s732_s1 + $0x150] sm:$0xff] }
  0x14   : > { %334 = vmatprep.subr.bf16.mxu1 %v248_v44  ;;  %v216_v62 = vld [vmem:[%s732_s1 + $0x178] sm:$0xff]  ;;  %v213_v3 = vld [vmem:[%s732_s1 + $0x160] sm:$0xff]  ;;  %v215_v6 = vld [vmem:[%s732_s1 + $0x170] sm:$0xff]  ;;  %v268_v36 = vshrl.u32 %v267_v35, 7  ;;  %vm400_vm0 = vcmp.lt.s32.totalorder %v267_v35, 512 }
  0x15   : > { %v256_v5 = vpack.c.bf16 %v216_v62, %v212_v61  ;;  %v218_v7 = vld [vmem:[%s732_s1 + $0x188] sm:$0xff]  ;;  %v220_v9 = vld [vmem:[%s732_s1 + $0x198] sm:$0xff]  ;;  %v253_v11 = vpack.c.bf16 %v213_v3, %v209_v2  ;;  %v255_v12 = vpack.c.bf16 %v215_v6, %v211_v4  ;;  %v217_v14 = vld [vmem:[%s732_s1 + $0x180] sm:$0xff] }
  0x16   : > { %294 = vmatpush1.bf16.msra.mxu0 %v245_v51  ;;  %v222_v8 = vld [vmem:[%s732_s1 + $0x1a8] sm:$0xff]  ;;  %v224_v10 = vld [vmem:[%s732_s1 + $0x1b8] sm:$0xff]  ;;  %v221_v15 = vld [vmem:[%s732_s1 + $0x1a0] sm:$0xff]  ;;  %v269_v37 = vsub.s32 0, %v268_v36  ;;  %v277_v39 = vsub.s32 2, %v268_v36  ;;  %v273_v40 = vsub.s32 1, %v268_v36  ;;  %v380_v55 = vsub.s32 %v377_v47, %v268_v36 }
  0x17   : > { %335 = vmatpush1.bf16.msra.mxu1 %v247_v52  ;;  %295 = vmatprep.subr.bf16.mxu0 %v250_v53  ;;  %v258_v13 = vpack.c.bf16 %v222_v8, %v218_v7  ;;  %v219_v16 = vld [vmem:[%s732_s1 + $0x190] sm:$0xff]  ;;  %v260_v17 = vpack.c.bf16 %v224_v10, %v220_v9  ;;  %v226_v19 = vld [vmem:[%s732_s1 + $0x1c8] sm:$0xff]  ;;  %v228_v21 = vld [vmem:[%s732_s1 + $0x1d8] sm:$0xff]  ;;  %v257_v23 = vpack.c.bf16 %v221_v15, %v217_v14  ;;  %v281_v43 = vsub.s32 3, %v268_v36 }
  0x18   : > { %336 = vmatprep.subr.bf16.mxu1 %v252_v57  ;;  %v223_v18 = vld [vmem:[%s732_s1 + $0x1b0] sm:$0xff]  ;;  %v230_v20 = vld [vmem:[%s732_s1 + $0x1e8] sm:$0xff]  ;;  %v232_v22 = vld [vmem:[%s732_s1 + $0x1f8] sm:$0xff] }
  0x19   : > { %v259_v24 = vpack.c.bf16 %v223_v18, %v219_v16  ;;  %v262_v25 = vpack.c.bf16 %v230_v20, %v226_v19  ;;  %v225_v26 = vld [vmem:[%s732_s1 + $0x1c0] sm:$0xff]  ;;  %v264_v28 = vpack.c.bf16 %v232_v22, %v228_v21  ;;  %v227_v29 = vld [vmem:[%s732_s1 + $0x1d0] sm:$0xff] }
  0x1a   : > { %296 = vmatpush1.bf16.msra.mxu0 %v249_v63  ;;  %v229_v27 = vld [vmem:[%s732_s1 + $0x1e0] sm:$0xff]  ;;  %v231_v30 = vld [vmem:[%s732_s1 + $0x1f0] sm:$0xff] }
  0x1b   : > { %337 = vmatpush1.bf16.msra.mxu1 %v251_v0  ;;  %297 = vmatprep.subr.bf16.mxu0 %v254_v1  ;;  %v261_v31 = vpack.c.bf16 %v229_v27, %v225_v26  ;;  %v167_v32 = vld [vmem:[%s161_s17] sm:$0xff]  ;;  %v263_v33 = vpack.c.bf16 %v231_v30, %v227_v29 }
  0x1c   : > { %338 = vmatprep.subr.bf16.mxu1 %v256_v5  ;;  %v168_v34 = vpack.c.bf16 %v167_v32, %v167_v32  ;;  %v265_v38 = vld [vmem:[%s733_s2] sm:$0xf] }
  0x1d   : > { %v270_v44 = vrot.slane %v265_v38, %v269_v37  ;;  %v278_v45 = vrot.slane %v265_v38, %v277_v39  ;;  %v274_v46 = vrot.slane %v265_v38, %v273_v40  ;;  %v282_v48 = vrot.slane %v265_v38, %v281_v43 }
  0x1e   : > { %298 = vmatpush1.bf16.msra.mxu0 %v253_v11 }
  0x1f   : > { %339 = vmatpush1.bf16.msra.mxu1 %v255_v12  ;;  %299 = vmatprep.subr.bf16.mxu0 %v258_v13 }
  0x20   : > { %340 = vmatprep.subr.bf16.mxu1 %v260_v17 }
  0x22   : > { %300 = vmatpush1.bf16.msra.mxu0 %v257_v23 }
  0x23   : > { %341 = vmatpush1.bf16.msra.mxu1 %v259_v24  ;;  %301 = vmatprep.subr.bf16.mxu0 %v262_v25 }
  0x24   : > { %342 = vmatprep.subr.bf16.mxu1 %v264_v28 }
  0x26   : > { %302 = vmatpush1.bf16.msra.mxu0 %v261_v31 }
  0x27   : > { %343 = vmatpush1.bf16.msra.mxu1 %v263_v33 }
  0x29   : > { %320 = vmatmul.mubr.bf16.vlgmr.msra.gmra.mrb[0].mxu0 %v168_v34 }
  0x2a   : > { %361 = vmatmul.mubr.bf16.vlgmr.msra.gmra.mrb[0].mxu1 %v168_v34 }
  0xfc   : > { %v321_v49 = vpop.f32.mrb[0].mxu0 }
  0xfd   : > { %v322_v50 = vadd.f32 %v321_v49, %v270_v44  ;;  %v362_v51 = vpop.f32.mrb[0].mxu1  ;;  %v323_v52 = vpop.f32.mrb[1].mxu0 }
  0xfe   : > { %v363_v53 = vadd.f32 %v362_v51, %v278_v45  ;;  %v324_v54 = vadd.f32 %v323_v52, %v274_v46  ;;  %v364_v56 = vpop.f32.mrb[1].mxu1  ;;  %v325_v57 = vpop.f32.mrb[2].mxu0 }
  0xff   : > { %v365_v58 = vadd.f32 %v364_v56, %v282_v48  ;;  %v366_v59 = vpop.f32.mrb[2].mxu1  ;;  %v326_v60 = vpop.f32.mrb[3].mxu0 }
 0x100   : > { %v373_v61 = vcombine.low %v322_v50, %v324_v54  ;;  %v367_v62 = vpop.f32.mrb[3].mxu1 }
 0x101   : > { %v374_v63 = vcombine.low %v363_v53, %v365_v58 }
 0x102   : > { %v381_v0 = vrot.slane %v373_v61, %v380_v55 }
 0x103   : > { %v388_v1 = vrot.slane %v374_v63, %v380_v55 }
 0x105   : > { %v389_v2 = vcombine.low %v381_v0, %v388_v1 }
 0x107   : > { %v396_v3 = vrot.slane %v389_v2, %v380_v55 }
 0x109   : > { %402 = vst.msk [vmem:[%s165_s27] sm:$0xf] %vm400_vm0, %v396_v3 }
 0x10a PF: > { %s13_s12 = sadd.s32 1, %s481_s12  }
 0x10b   : > { %p10_p4 = scmp.ge.s32.totalorder %s13_s12, 4  }
 0x10d   :  { %12 = sbr.rel (!%p10_p4) target bundleno = 1 (0x1), region = 62 }

// kernel: text_encoder_forward.5
= control target key start
LH: loop header
LB: loop body
LE: loop exit
PB: predicated region body
PF: predicated region fallthrough
CT: control target
= control target key end

     0   :  { %s3281_s27 = smov 0   ;;  %s4420_s0 = inlined_call_operand.vmem [shape: f32[2,8,128], index: 0, kind: input, shape index: {}]   ;;  %s4421_s1 = inlined_call_operand.vmem [shape: f32[2,1,8], index: 1, kind: input, shape index: {}]   ;;  %s4422_s2 = inlined_call_operand.vmem [shape: f32[4,128,32], index: 2, kind: input, shape index: {}]   ;;  %s4423_s3 = inlined_call_operand.vmem [shape: f32[4,128,32], index: 3, kind: input, shape index: {}]   ;;  %s4424_s4 = inlined_call_operand.vmem [shape: f32[4,128,32], index: 4, kind: input, shape index: {}]   ;;  %s4425_s5 = inlined_call_operand.vmem [shape: f32[4,1,32], index: 5, kind: input, shape index: {}]   ;;  %s4426_s6 = inlined_call_operand.vmem [shape: f32[4,1,32], index: 6, kind: input, shape index: {}]   ;;  %s4427_s7 = inlined_call_operand.vmem [shape: f32[4,1,32], index: 7, kind: input, shape index: {}]   ;;  %s4428_s8 = inlined_call_operand.vmem [shape: f32[4,32,128], index: 8, kind: input, shape index: {}]   ;;  %s4429_s9 = inlined_call_operand.vmem [shape: f32[1,128], index: 9, kind: input, shape index: {}]   ;;  %s4430_s10 = inlined_call_operand.vmem [shape: f32[1,128], index: 10, kind: input, shape index: {}]   ;;  %s4431_s11 = inlined_call_operand.vmem [shape: f32[1,128], index: 11, kind: input, shape index: {}]   ;;  %s4432_s12 = inlined_call_operand.vmem [shape: f32[128,256], index: 12, kind: input, shape index: {}]   ;;  %s4433_s13 = inlined_call_operand.vmem [shape: f32[1,256], index: 13, kind: input, shape index: {}]   ;;  %s4434_s14 = inlined_call_operand.vmem [shape: f32[256,128], index: 14, kind: input, shape index: {}]   ;;  %s4435_s15 = inlined_call_operand.vmem [shape: f32[1,128], index: 15, kind: input, shape index: {}]   ;;  %s4436_s16 = inlined_call_operand.vmem [shape: f32[1,128], index: 16, kind: input, shape index: {}]   ;;  %s4437_s17 = inlined_call_operand.vmem [shape: f32[1,128], index: 17, kind: input, shape index: {}]   ;;  %s4438_s18 = inlined_call_operand.vmem [shape: f32[2,8,128], index: 18, kind: output, shape index: {}]  }
   0x1   :  { %4440 = sst [smem:[#allocation2_spill]] %s4420_s0 }
   0x2   :  { %4441 = sst [smem:[#allocation3_spill]] %s4421_s1 }
   0x3   :  { %4442 = sst [smem:[#allocation4_spill]] %s4422_s2 }
   0x4 LB: > { %s2456_s28 = sadd.s32 4294967295, %s3181_s27   ;;  %p2460_p0 = scmp.ge.s32.totalorder %s3181_s27, 1  ;;  %s3181_s27 = sphi %s3281_s27, %s28_s27  }
   0x5   : > { %p519_p1 = scmp.lt.s32.totalorder %s3181_s27, 3 }
   0x7   : > { %p520_p2 = pnand %p2460_p0, %p519_p1 }
   0x8   : > { %v615_v0 = vld [vmem:[%s4423_s3] sm:$0xff] (!%p520_p2)  ;;  %v616_v1 = vld [vmem:[%s4423_s3 + $0x8] sm:$0xff] (!%p520_p2)  ;;  %v617_v2 = vld [vmem:[%s4423_s3 + $0x10] sm:$0xff] (!%p520_p2)  ;;  %v3183_v3 = vmov (!%p520_p2), 0.0   ;;  %s4443_s24 = sld [smem:[#allocation4_spill]] (!%p520_p2)  ;;  %vm3184_vm0 = vmmov (!%p520_p2), 0  }
   0x9   : > { %523 = sbr.rel (%p520_p2) target bundleno = 5087 (0x13df), region = 92  ;;  %2839 = vmatprep.subr.bf16.mxu1 (!%p520_p2), %v3183_v3  ;;  %v631_v4 = vpack.c.bf16 (!%p520_p2), %v616_v1, %v615_v0  ;;  %v618_v5 = vld [vmem:[%s4423_s3 + $0x18] sm:$0xff] (!%p520_p2)  ;;  %2819 = vmatprep.subr.bf16.mxu0 (!%p520_p2), %v3183_v3  ;;  %v619_v12 = vld [vmem:[%s4423_s3 + $0x20] sm:$0xff] (!%p520_p2)  ;;  %v620_v13 = vld [vmem:[%s4423_s3 + $0x28] sm:$0xff] (!%p520_p2)  ;;  %p574_p3 = scmp.lt.s32.totalorder (!%p520_p2), %s2456_s28, 1  ;;  %vm806_vm1 = vcmask (!%p520_p2), 261120  }
   0xa   : > { %2855 = vmatprep.mubr.msk.bf16.mxu1 (!%p520_p2), %vm3184_vm0, %v3183_v3  ;;  %2835 = vmatprep.mubr.msk.bf16.mxu0 (!%p520_p2), %vm3184_vm0, %v3183_v3  ;;  %v632_v10 = vpack.c.bf16 (!%p520_p2), %v618_v5, %v617_v2  ;;  %v633_v17 = vpack.c.bf16 (!%p520_p2), %v620_v13, %v619_v12  ;;  %v621_v18 = vld [vmem:[%s4423_s3 + $0x30] sm:$0xff] (!%p520_p2)  ;;  %v622_v19 = vld [vmem:[%s4423_s3 + $0x38] sm:$0xff] (!%p520_p2)  ;;  %v623_v24 = vld [vmem:[%s4423_s3 + $0x40] sm:$0xff] (!%p520_p2)  ;;  %s4444_s19 = sld [smem:[#allocation2_spill]] (!%p520_p2)  ;;  %s4445_s22 = sld [smem:[#allocation3_spill]] (!%p520_p2)  ;;  %vm861_vm2 = vcmask (!%p520_p2), 64512  }
   0xb   : > { %2840 = vmatpush3.bf16.msra.mxu1 (!%p520_p2), %v631_v4  ;;  %v634_v23 = vpack.c.bf16 (!%p520_p2), %v622_v19, %v621_v18  ;;  %v624_v25 = vld [vmem:[%s4423_s3 + $0x48] sm:$0xff] (!%p520_p2)  ;;  %v625_v30 = vld [vmem:[%s4423_s3 + $0x50] sm:$0xff] (!%p520_p2)  ;;  %v626_v31 = vld [vmem:[%s4423_s3 + $0x58] sm:$0xff] (!%p520_p2)  ;;  %vm878_vm3 = vcmask (!%p520_p2), 1043456  }
   0xc   : > { %2841 = vmatprep.subr.bf16.mxu1 (!%p520_p2), %v3183_v3  ;;  %v635_v29 = vpack.c.bf16 (!%p520_p2), %v624_v25, %v623_v24  ;;  %v636_v35 = vpack.c.bf16 (!%p520_p2), %v626_v31, %v625_v30  ;;  %v627_v36 = vld [vmem:[%s4423_s3 + $0x60] sm:$0xff] (!%p520_p2)  ;;  %v628_v37 = vld [vmem:[%s4423_s3 + $0x68] sm:$0xff] (!%p520_p2)  ;;  %v629_v42 = vld [vmem:[%s4423_s3 + $0x70] sm:$0xff] (!%p520_p2) }
   0xd   : > { %v637_v41 = vpack.c.bf16 (!%p520_p2), %v628_v37, %v627_v36  ;;  %v630_v43 = vld [vmem:[%s4423_s3 + $0x78] sm:$0xff] (!%p520_p2)  ;;  %v2465_v51 = vld [vmem:[%s4426_s6] ss:$0 sm:$0xff] (!%p520_p2)  ;;  %v640_v4 = vld [vmem:[%s4424_s4 + $0x8] sm:$0xff] (!%p520_p2) }
   0xe   : > { %v591_v6 = vld [vmem:[%s4443_s24] sm:$0xff] (!%p520_p2)  ;;  %v592_v7 = vld [vmem:[%s4443_s24 + $0x8] sm:$0xff] (!%p520_p2)  ;;  %v593_v9 = vld [vmem:[%s4443_s24 + $0x10] sm:$0xff] (!%p520_p2)  ;;  %v638_v47 = vpack.c.bf16 (!%p520_p2), %v630_v43, %v629_v42 }
   0xf   : > { %v607_v8 = vpack.c.bf16 (!%p520_p2), %v592_v7, %v591_v6  ;;  %v594_v11 = vld [vmem:[%s4443_s24 + $0x18] sm:$0xff] (!%p520_p2)  ;;  %v595_v15 = vld [vmem:[%s4443_s24 + $0x20] sm:$0xff] (!%p520_p2)  ;;  %v596_v16 = vld [vmem:[%s4443_s24 + $0x28] sm:$0xff] (!%p520_p2)  ;;  %2842 = vmatpush3.bf16.msra.mxu1 (!%p520_p2), %v632_v10 }
  0x10   : > { %v608_v14 = vpack.c.bf16 %v594_v11, %v593_v9  ;;  %2843 = vmatprep.subr.bf16.mxu1 %v3183_v3  ;;  %v609_v20 = vpack.c.bf16 %v596_v16, %v595_v15  ;;  %v597_v21 = vld [vmem:[%s4443_s24 + $0x30] sm:$0xff]  ;;  %v598_v22 = vld [vmem:[%s4443_s24 + $0x38] sm:$0xff]  ;;  %v599_v27 = vld [vmem:[%s4443_s24 + $0x40] sm:$0xff]  ;;  %s4447_s28 = smov (!%p574_p3, %s2456_s28), 1 }
  0x11   : > { %2820 = vmatpush3.bf16.msra.mxu0 %v607_v8  ;;  %v610_v26 = vpack.c.bf16 %v598_v22, %v597_v21  ;;  %v600_v28 = vld [vmem:[%s4443_s24 + $0x48] sm:$0xff]  ;;  %v601_v33 = vld [vmem:[%s4443_s24 + $0x50] sm:$0xff]  ;;  %v602_v34 = vld [vmem:[%s4443_s24 + $0x58] sm:$0xff]  ;;  %s2461_s2 = sshll.u32 %s4447_s28, 3  ;;  %s580_s23 = scalar_lea.vmem %s4445_s22, %s4447_s28 }
  0x12   : > { %2821 = vmatprep.subr.bf16.mxu0 %v3183_v3  ;;  %v611_v32 = vpack.c.bf16 %v600_v28, %v599_v27  ;;  %v612_v38 = vpack.c.bf16 %v602_v34, %v601_v33  ;;  %v603_v39 = vld [vmem:[%s4443_s24 + $0x60] sm:$0xff]  ;;  %v604_v40 = vld [vmem:[%s4443_s24 + $0x68] sm:$0xff]  ;;  %s3408_s1 = scalar_lea.vmem %s4444_s19, %s2461_s2  ;;  %v605_v45 = vld [vmem:[%s4443_s24 + $0x70] sm:$0xff]  ;;  %v855_v27 = vlaneseq  ;;  %s584_s26 = scalar_lea.vmem %s4438_s18, %s2461_s2 }
  0x13   : > { %2844 = vmatpush3.bf16.msra.mxu1 %v633_v17  ;;  %v613_v44 = vpack.c.bf16 %v604_v40, %v603_v39  ;;  %v606_v46 = vld [vmem:[%s4443_s24 + $0x78] sm:$0xff]  ;;  %v586_v48 = vld [vmem:[%s3408_s1] sm:$0xff]  ;;  %v641_v5 = vld [vmem:[%s4424_s4 + $0x10] sm:$0xff] }
  0x14   : > { %2845 = vmatprep.subr.bf16.mxu1 %v3183_v3  ;;  %v614_v49 = vpack.c.bf16 %v606_v46, %v605_v45  ;;  %v3420_v50 = vpack.c.bf16 %v586_v48, %v586_v48  ;;  %v2464_v57 = vld [vmem:[%s4425_s5] ss:$0 sm:$0xff]  ;;  %v642_v7 = vld [vmem:[%s4424_s4 + $0x18] sm:$0xff]  ;;  %v644_v10 = vld [vmem:[%s4424_s4 + $0x28] sm:$0xff]  ;;  %v3504_v30 = vshrl.u32 %v855_v27, 7 }
  0x15   : > { %2822 = vmatpush3.bf16.msra.mxu0 %v608_v14  ;;  %v639_v2 = vld [vmem:[%s4424_s4] sm:$0xff]  ;;  %v656_v8 = vpack.c.bf16 %v642_v7, %v641_v5  ;;  %v645_v12 = vld [vmem:[%s4424_s4 + $0x30] sm:$0xff]  ;;  %v646_v13 = vld [vmem:[%s4424_s4 + $0x38] sm:$0xff] }
  0x16   : > { %2823 = vmatprep.subr.bf16.mxu0 %v3183_v3  ;;  %v655_v6 = vpack.c.bf16 %v640_v4, %v639_v2  ;;  %v643_v9 = vld [vmem:[%s4424_s4 + $0x20] sm:$0xff]  ;;  %v658_v14 = vpack.c.bf16 %v646_v13, %v645_v12  ;;  %v648_v16 = vld [vmem:[%s4424_s4 + $0x48] sm:$0xff]  ;;  %v649_v18 = vld [vmem:[%s4424_s4 + $0x50] sm:$0xff] }
  0x17   : > { %2846 = vmatpush3.bf16.msra.mxu1 %v634_v23  ;;  %v657_v11 = vpack.c.bf16 %v644_v10, %v643_v9  ;;  %v647_v15 = vld [vmem:[%s4424_s4 + $0x40] sm:$0xff]  ;;  %v650_v19 = vld [vmem:[%s4424_s4 + $0x58] sm:$0xff]  ;;  %v652_v22 = vld [vmem:[%s4424_s4 + $0x68] sm:$0xff] }
  0x18   : > { %2847 = vmatprep.subr.bf16.mxu1 %v3183_v3  ;;  %v659_v17 = vpack.c.bf16 %v648_v16, %v647_v15  ;;  %v651_v21 = vld [vmem:[%s4424_s4 + $0x60] sm:$0xff]  ;;  %v653_v24 = vld [vmem:[%s4424_s4 + $0x70] sm:$0xff]  ;;  %v654_v25 = vld [vmem:[%s4424_s4 + $0x78] sm:$0xff] }
  0x19   : > { %2824 = vmatpush3.bf16.msra.mxu0 %v609_v20  ;;  %v660_v20 = vpack.c.bf16 %v650_v19, %v649_v18  ;;  %v661_v23 = vpack.c.bf16 %v652_v22, %v651_v21  ;;  %v588_v28 = vld [vmem:[%s580_s23] sm:$0x1]  ;;  %v2494_v5 = vld [vmem:[%s4423_s3 + $0xc8] sm:$0xff]  ;;  %v2495_v7 = vld [vmem:[%s4423_s3 + $0xd0] sm:$0xff] }
  0x1a   : > { %2825 = vmatprep.subr.bf16.mxu0 %v3183_v3  ;;  %v2485_v46 = vld [vmem:[%s4423_s3 + $0x80] sm:$0xff]  ;;  %v2499_v13 = vld [vmem:[%s4423_s3 + $0xf0] sm:$0xff]  ;;  %v2470_v18 = vld [vmem:[%s4443_s24 + $0x88] sm:$0xff] }
  0x1b   : > { %2848 = vmatpush3.bf16.msra.mxu1 %v635_v29  ;;  %v2463_v29 = vadd.f32 -1.0, %v588_v28  ;;  %v2493_v4 = vld [vmem:[%s4423_s3 + $0xc0] sm:$0xff]  ;;  %v2474_v27 = vld [vmem:[%s4443_s24 + $0xa8] sm:$0xff] }
  0x1c   : > { %2849 = vmatprep.subr.bf16.mxu1 %v3183_v3  ;;  %v2497_v10 = vld [vmem:[%s4423_s3 + $0xe0] sm:$0xff] }
  0x1d   : > { %2826 = vmatpush3.bf16.msra.mxu0 %v610_v26  ;;  %v662_v26 = vpack.c.bf16 %v654_v25, %v653_v24  ;;  %v590_v31 = vmul.f32 1e+09, %v2463_v29  ;;  %v2472_v24 = vld [vmem:[%s4443_s24 + $0x98] sm:$0xff]  ;;  %v2475_v29 = vld [vmem:[%s4443_s24 + $0xb0] sm:$0xff] }
  0x1e   : > { %2827 = vmatprep.subr.bf16.mxu0 %v3183_v3 }
  0x1f   : > { %2850 = vmatpush3.bf16.msra.mxu1 %v636_v35 }
  0x20   : > { %2851 = vmatprep.subr.bf16.mxu1 %v3183_v3 }
  0x21   : > { %2828 = vmatpush3.bf16.msra.mxu0 %v611_v32  ;;  %v857_v32 = vsub.s32 0, %v3504_v30 }
  0x22   : > { %2829 = vmatprep.subr.bf16.mxu0 %v3183_v3 }
  0x23   : > { %2852 = vmatpush3.bf16.msra.mxu1 %v637_v41  ;;  %v3509_v33 = vrot.slane %v590_v31, %v857_v32  ;;  %v2476_v31 = vld [vmem:[%s4443_s24 + $0xb8] sm:$0xff] }
  0x24   : > { %2853 = vmatprep.subr.bf16.mxu1 %v3183_v3 }
  0x25   : > { %2830 = vmatpush3.bf16.msra.mxu0 %v612_v38 }
  0x26   : > { %2831 = vmatprep.subr.bf16.mxu0 %v3183_v3 }
  0x27   : > { %2854 = vmatpush3.bf16.msra.mxu1 %v638_v47  ;;  %v2486_v47 = vld [vmem:[%s4423_s3 + $0x88] sm:$0xff] }
  0x28   : > { %2879 = vmatprep.subr.bf16.mxu1 %v3183_v3 }
  0x29   : > { %2832 = vmatpush3.bf16.msra.mxu0 %v613_v44 }
  0x2a   : > { %2833 = vmatprep.subr.bf16.mxu0 %v3183_v3  ;;  %2856 = vmatmul.mubr.bf16.vlgmr.msra.gmra.mrb[0].mxu1 %v3420_v50 }
  0x2b   : > { %2881 = vmatprep.mubr.msk.bf16.mxu1 %vm3184_vm0, %v3183_v3 }
  0x2d   : > { %2834 = vmatpush3.bf16.msra.mxu0 %v614_v49  ;;  %v971_v49 = vpack.c.bf16 %v2486_v47, %v2485_v46  ;;  %v2501_v47 = vld [vmem:[%s4424_s4 + $0x80] sm:$0xff] }
  0x2e   : > { %2859 = vmatprep.subr.bf16.mxu0 %v3183_v3 }
  0x30   : > { %2836 = vmatmul.mubr.bf16.vlgmr.msra.gmra.mrb[0].mxu0 %v3420_v50 }
  0x31   : > { %2875 = vmatprep.mubr.msk.bf16.mxu0 %vm3184_vm0, %v3183_v3  ;;  %2860 = vmatpush3.bf16.msra.mxu0 %v655_v6  ;;  %v975_v6 = vpack.c.bf16 %v2494_v5, %v2493_v4  ;;  %v2514_v4 = vld [vmem:[%s4424_s4 + $0xe8] sm:$0xff] }
  0x32   : > { %2861 = vmatprep.subr.bf16.mxu0 %v3183_v3 }
  0x35   : > { %2862 = vmatpush3.bf16.msra.mxu0 %v656_v8  ;;  %v2496_v8 = vld [vmem:[%s4423_s3 + $0xd8] sm:$0xff] }
  0x36   : > { %2863 = vmatprep.subr.bf16.mxu0 %v3183_v3  ;;  %v976_v9 = vpack.c.bf16 %v2496_v8, %v2495_v7  ;;  %v2516_v7 = vld [vmem:[%s4424_s4 + $0xf8] sm:$0xff] }
  0x39   : > { %2864 = vmatpush3.bf16.msra.mxu0 %v657_v11  ;;  %v2498_v11 = vld [vmem:[%s4423_s3 + $0xe8] sm:$0xff] }
  0x3a   : > { %2865 = vmatprep.subr.bf16.mxu0 %v3183_v3  ;;  %v977_v12 = vpack.c.bf16 %v2498_v11, %v2497_v10  ;;  %v924_v10 = vld [vmem:[%s4428_s8 + $0x8] sm:$0xff] }
  0x3d   : > { %2866 = vmatpush3.bf16.msra.mxu0 %v658_v14  ;;  %v2500_v14 = vld [vmem:[%s4423_s3 + $0xf8] sm:$0xff] }
  0x3e   : > { %2867 = vmatprep.subr.bf16.mxu0 %v3183_v3  ;;  %v978_v15 = vpack.c.bf16 %v2500_v14, %v2499_v13  ;;  %v926_v13 = vld [vmem:[%s4428_s8 + $0x18] sm:$0xff] }
  0x41   : > { %2868 = vmatpush3.bf16.msra.mxu0 %v659_v17  ;;  %v2469_v17 = vld [vmem:[%s4443_s24 + $0x80] sm:$0xff] }
  0x42   : > { %2869 = vmatprep.subr.bf16.mxu0 %v3183_v3  ;;  %v946_v21 = vpack.c.bf16 %v2470_v18, %v2469_v17 }
  0x45   : > { %2870 = vmatpush3.bf16.msra.mxu0 %v660_v20 }
  0x46   : > { %2871 = vmatprep.subr.bf16.mxu0 %v3183_v3 }
  0x49   : > { %2872 = vmatpush3.bf16.msra.mxu0 %v661_v23  ;;  %v2471_v23 = vld [vmem:[%s4443_s24 + $0x90] sm:$0xff] }
  0x4a   : > { %2873 = vmatprep.subr.bf16.mxu0 %v3183_v3  ;;  %v947_v25 = vpack.c.bf16 %v2472_v24, %v2471_v23 }
  0x4d   : > { %2874 = vmatpush3.bf16.msra.mxu0 %v662_v26  ;;  %v2473_v26 = vld [vmem:[%s4443_s24 + $0xa0] sm:$0xff] }
  0x4e   : > { %2911 = vmatprep.subr.bf16.mxu0 %v3183_v3  ;;  %v948_v28 = vpack.c.bf16 %v2474_v27, %v2473_v26 }
  0x50   : > { %2876 = vmatmul.mubr.bf16.vlgmr.msra.gmra.mrb[4].mxu0 %v3420_v50 }
  0x51   : > { %2927 = vmatprep.mubr.msk.bf16.mxu0 %vm3184_vm0, %v3183_v3  ;;  %2912 = vmatpush3.bf16.msra.mxu0 %v971_v49 }
  0x52   : > { %2913 = vmatprep.subr.bf16.mxu0 %v3183_v3 }
  0xfd   : > { %v751_v52 = vpop.f32.mrb[0].mxu1 }
  0xfe   : > { %v752_v53 = vadd.f32 %v2465_v51, %v751_v52  ;;  %v2857_v54 = vpop.f32.mrb[1].mxu1 }
  0xff   : > { %v754_v56 = vpop.f32.mrb[2].mxu1 }
 0x100   : > { %v805_v59 = vpack.c.bf16 %v752_v53, %v752_v53  ;;  %v2858_v60 = vpop.f32.mrb[3].mxu1  ;;  %v2466_v53 = vld [vmem:[%s4427_s7] ss:$0 sm:$0xff]  ;;  %v2488_v56 = vld [vmem:[%s4423_s3 + $0x98] sm:$0xff] }
 0x101   : > { %v2489_v60 = vld [vmem:[%s4423_s3 + $0xa0] sm:$0xff] }
 0x102   : > { %v811_v63 = vsel %vm806_vm1, %v805_v59, 0 }
 0x103   : > { %v704_v55 = vpop.f32.mrb[0].mxu0  ;;  %2880 = vmatpush3.bf16.xpose.msra.mxu1 %v811_v63 }
 0x104   : > { %v2837_v58 = vpop.f32.mrb[1].mxu0  ;;  %v705_v0 = vadd.f32 %v2464_v57, %v704_v55  ;;  %2885 = vmatprep.subr.bf16.mxu1 %v3183_v3  ;;  %v2487_v55 = vld [vmem:[%s4423_s3 + $0x90] sm:$0xff] }
 0x105   : > { %v707_v61 = vpop.f32.mrb[2].mxu0  ;;  %v972_v58 = vpack.c.bf16 %v2488_v56, %v2487_v55  ;;  %v2506_v55 = vld [vmem:[%s4424_s4 + $0xa8] sm:$0xff] }
 0x106   : > { %v2838_v62 = vpop.f32.mrb[3].mxu0  ;;  %v804_v1 = vpack.c.bf16 %v705_v0, %v705_v0  ;;  %v2490_v61 = vld [vmem:[%s4423_s3 + $0xa8] sm:$0xff]  ;;  %v2491_v0 = vld [vmem:[%s4423_s3 + $0xb0] sm:$0xff] }
 0x107   : > { %2914 = vmatpush3.bf16.msra.mxu0 %v972_v58  ;;  %v973_v63 = vpack.c.bf16 %v2490_v61, %v2489_v60  ;;  %v2508_v58 = vld [vmem:[%s4424_s4 + $0xb8] sm:$0xff]  ;;  %v2509_v60 = vld [vmem:[%s4424_s4 + $0xc0] sm:$0xff]  ;;  %v2510_v61 = vld [vmem:[%s4424_s4 + $0xc8] sm:$0xff] }
 0x108   : > { %2915 = vmatprep.subr.bf16.mxu0 %v3183_v3 }
 0x10a   : > { %2882 = vmatmul.mubr.msk.bf16.vlgmr.msra.gmra.mrb[4].mxu1 %vm806_vm1, %v804_v1  ;;  %v2492_v1 = vld [vmem:[%s4423_s3 + $0xb8] sm:$0xff] }
 0x10b   : > { %2887 = vmatprep.mubr.msk.bf16.mxu1 %vm3184_vm0, %v3183_v3  ;;  %2916 = vmatpush3.bf16.msra.mxu0 %v973_v63  ;;  %v974_v2 = vpack.c.bf16 %v2492_v1, %v2491_v0  ;;  %v2511_v63 = vld [vmem:[%s4424_s4 + $0xd0] sm:$0xff]  ;;  %v2512_v0 = vld [vmem:[%s4424_s4 + $0xd8] sm:$0xff] }
 0x10c   : > { %2917 = vmatprep.subr.bf16.mxu0 %v3183_v3  ;;  %v1001_v1 = vpack.c.bf16 %v2512_v0, %v2511_v63  ;;  %v2547_v63 = vld [vmem:[%s4423_s3 + $0x100] sm:$0xff]  ;;  %v2548_v0 = vld [vmem:[%s4423_s3 + $0x108] sm:$0xff] }
 0x10f   : > { %2918 = vmatpush3.bf16.msra.mxu0 %v974_v2  ;;  %v2513_v2 = vld [vmem:[%s4424_s4 + $0xe0] sm:$0xff] }
 0x110   : > { %2919 = vmatprep.subr.bf16.mxu0 %v3183_v3  ;;  %v1002_v5 = vpack.c.bf16 %v2514_v4, %v2513_v2  ;;  %v2549_v2 = vld [vmem:[%s4423_s3 + $0x110] sm:$0xff]  ;;  %v2550_v4 = vld [vmem:[%s4423_s3 + $0x118] sm:$0xff] }
 0x113   : > { %2920 = vmatpush3.bf16.msra.mxu0 %v975_v6  ;;  %v2515_v6 = vld [vmem:[%s4424_s4 + $0xf0] sm:$0xff] }
 0x114   : > { %2921 = vmatprep.subr.bf16.mxu0 %v3183_v3  ;;  %v1003_v8 = vpack.c.bf16 %v2516_v7, %v2515_v6  ;;  %v2525_v7 = vld [vmem:[%s4428_s8 + $0x20] sm:$0xff] }
 0x117   : > { %2922 = vmatpush3.bf16.msra.mxu0 %v976_v9  ;;  %v923_v9 = vld [vmem:[%s4428_s8] sm:$0xff] }
 0x118   : > { %2923 = vmatprep.subr.bf16.mxu0 %v3183_v3  ;;  %v927_v11 = vpack.c.bf16 %v924_v10, %v923_v9 }
 0x11b   : > { %2924 = vmatpush3.bf16.msra.mxu0 %v977_v12  ;;  %v925_v12 = vld [vmem:[%s4428_s8 + $0x10] sm:$0xff] }
 0x11c   : > { %2925 = vmatprep.subr.bf16.mxu0 %v3183_v3  ;;  %v928_v14 = vpack.c.bf16 %v926_v13, %v925_v12  ;;  %v2527_v13 = vld [vmem:[%s4428_s8 + $0x30] sm:$0xff] }
 0x11f   : > { %2926 = vmatpush3.bf16.msra.mxu0 %v978_v15  ;;  %v2520_v15 = vld [vmem:[%s4426_s6 + $0x1] ss:$0 sm:$0xff] }
 0x120   : > { %2951 = vmatprep.subr.bf16.mxu0 %v3183_v3 }
 0x122   : > { %2928 = vmatmul.mubr.bf16.vlgmr.msra.gmra.mrb[8].mxu0 %v3420_v50 }
 0x123   : > { %v798_v48 = vpop.f32.mrb[4].mxu0  ;;  %2953 = vmatprep.mubr.msk.bf16.mxu0 %vm3184_vm0, %v3183_v3 }
 0x124   : > { %v2877_v51 = vpop.f32.mrb[5].mxu0  ;;  %v799_v57 = vadd.f32 %v2466_v53, %v798_v48  ;;  %v2502_v48 = vld [vmem:[%s4424_s4 + $0x88] sm:$0xff] }
 0x125   : > { %v801_v52 = vpop.f32.mrb[6].mxu0  ;;  %v996_v49 = vpack.c.bf16 %v2502_v48, %v2501_v47  ;;  %v2503_v51 = vld [vmem:[%s4424_s4 + $0x90] sm:$0xff] }
 0x126   : > { %v2878_v54 = vpop.f32.mrb[7].mxu0  ;;  %v874_v59 = vpack.c.bf16 %v799_v57, %v799_v57  ;;  %v2504_v52 = vld [vmem:[%s4424_s4 + $0x98] sm:$0xff]  ;;  %v2507_v57 = vld [vmem:[%s4424_s4 + $0xb0] sm:$0xff] }
 0x127   : > { %v997_v53 = vpack.c.bf16 %v2504_v52, %v2503_v51  ;;  %v2505_v54 = vld [vmem:[%s4424_s4 + $0xa0] sm:$0xff] }
 0x128   : > { %v880_v62 = vsel %vm878_vm3, %v874_v59, 0  ;;  %v998_v56 = vpack.c.bf16 %v2506_v55, %v2505_v54  ;;  %v999_v59 = vpack.c.bf16 %v2508_v58, %v2507_v57 }
 0x129   : > { %2886 = vmatpush3.bf16.msra.mxu1 %v880_v62  ;;  %v1000_v62 = vpack.c.bf16 %v2510_v61, %v2509_v60 }
 0x12a   : > { %2891 = vmatprep.subr.bf16.mxu1 %v3183_v3 }
 0x1dd   : > { %v847_v34 = vpop.f32.mrb[4].mxu1 }
 0x1de   : > { %v853_v35 = vmul.f32 0.17677669, %v847_v34  ;;  %v2883_v36 = vpop.f32.mrb[5].mxu1  ;;  %v949_v34 = vpack.c.bf16 %v2476_v31, %v2475_v29 }
 0x1df   : > { %v850_v37 = vpop.f32.mrb[6].mxu1  ;;  %v2478_v36 = vld [vmem:[%s4443_s24 + $0xc8] sm:$0xff] }
 0x1e0   : > { %v2884_v38 = vpop.f32.mrb[7].mxu1  ;;  %v860_v39 = vadd.f32 %v3509_v33, %v853_v35  ;;  %v2477_v35 = vld [vmem:[%s4443_s24 + $0xc0] sm:$0xff] }
 0x1e1   : > { %v950_v37 = vpack.c.bf16 %v2478_v36, %v2477_v35  ;;  %v2479_v38 = vld [vmem:[%s4443_s24 + $0xd0] sm:$0xff] }
 0x1e2   : > { %v862_v40 = vsel %vm861_vm2, %v860_v39, -inf }
 0x1e3   : > { %863 = vmax.xlane.f32.xlu0 %v862_v40 }
 0x270   : > { %v864_v41 = vpop.xlane.xlu0 %863 }
 0x271   : > { %v865_v42 = vsub.f32 %v860_v39, %v864_v41  ;;  %v2480_v39 = vld [vmem:[%s4443_s24 + $0xd8] sm:$0xff]  ;;  %v2481_v41 = vld [vmem:[%s4443_s24 + $0xe0] sm:$0xff] }
 0x272   : > { %v951_v40 = vpack.c.bf16 %v2480_v39, %v2479_v38  ;;  %v2522_v38 = vld [vmem:[%s4427_s7 + $0x1] ss:$0 sm:$0xff] }
 0x273   : > { %v866_v43 = vmul.f32 1.442695, %v865_v42  ;;  %v2482_v42 = vld [vmem:[%s4443_s24 + $0xe8] sm:$0xff] }
 0x275   : > { %3150 = vpow2.f32 %v866_v43  ;;  %v952_v43 = vpack.c.bf16 %v2482_v42, %v2481_v41 }
 0x27f   : > { %v3151_v44 = vpop.eup %3150 }
 0x280   : > { %v868_v45 = vsel %vm861_vm2, %v3151_v44, 0.0 }
 0x281   : > { %869 = vadd.xlane.f32.xlu0 %v868_v45  ;;  %v2484_v45 = vld [vmem:[%s4443_s24 + $0xf8] sm:$0xff] }
 0x30e   : > { %v870_v16 = vpop.xlane.xlu0 %869 }
 0x30f   : > { %3152 = vrcp.f32 %v870_v16  ;;  %v1094_v16 = vpop.f32.mrb[8].mxu0 }
 0x310   : > { %v1095_v17 = vadd.f32 %v2520_v15, %v1094_v16  ;;  %v2929_v18 = vpop.f32.mrb[9].mxu0  ;;  %v2551_v16 = vld [vmem:[%s4423_s3 + $0x120] sm:$0xff] }
 0x319   : > { %v3153_v19 = vpop.eup %3152 }
 0x31a   : > { %v872_v20 = vmul.f32 %v3153_v19, %v3151_v44  ;;  %v2483_v44 = vld [vmem:[%s4443_s24 + $0xf0] sm:$0xff]  ;;  %v1097_v19 = vpop.f32.mrb[10].mxu0 }
 0x31b   : > { %v953_v46 = vpack.c.bf16 %v2484_v45, %v2483_v44  ;;  %v2553_v19 = vld [vmem:[%s4423_s3 + $0x130] sm:$0xff] }
 0x31c   : > { %v873_v22 = vpack.c.bf16 %v872_v20, %v872_v20  ;;  %v1149_v20 = vpack.c.bf16 %v1095_v17, %v1095_v17  ;;  %v2552_v17 = vld [vmem:[%s4423_s3 + $0x128] sm:$0xff] }
 0x31d   : > { %v1395_v18 = vpack.c.bf16 %v2552_v17, %v2551_v16 }
 0x31e   : > { %2888 = vmatmul.mubr.msk.bf16.vlgmr.msra.gmra.mrb[8].mxu1 %vm861_vm2, %v873_v22  ;;  %v1154_v22 = vsel %vm806_vm1, %v1149_v20, 0  ;;  %v2554_v20 = vld [vmem:[%s4423_s3 + $0x138] sm:$0xff] }
 0x31f   : > { %2892 = vmatpush3.bf16.msra.mxu1 %v946_v21  ;;  %2907 = vmatprep.mubr.msk.bf16.mxu1 %vm3184_vm0, %v3183_v3  ;;  %v2930_v21 = vpop.f32.mrb[11].mxu0 }
 0x320   : > { %2893 = vmatprep.subr.bf16.mxu1 %v3183_v3  ;;  %2952 = vmatpush3.bf16.xpose.msra.mxu0 %v1154_v22  ;;  %v1396_v21 = vpack.c.bf16 %v2554_v20, %v2553_v19  ;;  %v2555_v22 = vld [vmem:[%s4423_s3 + $0x140] sm:$0xff] }
 0x321   : > { %2957 = vmatprep.subr.bf16.mxu0 %v3183_v3 }
 0x323   : > { %2894 = vmatpush3.bf16.msra.mxu1 %v947_v25 }
 0x324   : > { %2895 = vmatprep.subr.bf16.mxu1 %v3183_v3 }
 0x327   : > { %2896 = vmatpush3.bf16.msra.mxu1 %v948_v28  ;;  %v2518_v28 = vld [vmem:[%s4425_s5 + $0x1] ss:$0 sm:$0xff] }
 0x328   : > { %2897 = vmatprep.subr.bf16.mxu1 %v3183_v3 }
 0x32b   : > { %2898 = vmatpush3.bf16.msra.mxu1 %v949_v34 }
 0x32c   : > { %2899 = vmatprep.subr.bf16.mxu1 %v3183_v3 }
 0x32f   : > { %2900 = vmatpush3.bf16.msra.mxu1 %v950_v37 }
 0x330   : > { %2901 = vmatprep.subr.bf16.mxu1 %v3183_v3 }
 0x333   : > { %2902 = vmatpush3.bf16.msra.mxu1 %v951_v40 }
 0x334   : > { %2903 = vmatprep.subr.bf16.mxu1 %v3183_v3 }
 0x337   : > { %2904 = vmatpush3.bf16.msra.mxu1 %v952_v43 }
 0x338   : > { %2905 = vmatprep.subr.bf16.mxu1 %v3183_v3 }
 0x33b   : > { %2906 = vmatpush3.bf16.msra.mxu1 %v953_v46 }
 0x33c   : > { %2931 = vmatprep.subr.bf16.mxu1 %v3183_v3 }
 0x33e   : > { %2908 = vmatmul.mubr.bf16.vlgmr.msra.gmra.mrb[12].mxu1 %v3420_v50 }
 0x33f   : > { %2932 = vmatpush3.bf16.msra.mxu1 %v996_v49  ;;  %2947 = vmatprep.mubr.msk.bf16.mxu1 %vm3184_vm0, %v3183_v3 }
 0x340   : > { %2933 = vmatprep.subr.bf16.mxu1 %v3183_v3 }
 0x343   : > { %2934 = vmatpush3.bf16.msra.mxu1 %v997_v53 }
 0x344   : > { %2935 = vmatprep.subr.bf16.mxu1 %v3183_v3 }
 0x347   : > { %2936 = vmatpush3.bf16.msra.mxu1 %v998_v56 }
 0x348   : > { %2937 = vmatprep.subr.bf16.mxu1 %v3183_v3 }
 0x34b   : > { %2938 = vmatpush3.bf16.msra.mxu1 %v999_v59 }
 0x34c   : > { %2939 = vmatprep.subr.bf16.mxu1 %v3183_v3 }
 0x34f   : > { %2940 = vmatpush3.bf16.msra.mxu1 %v1000_v62 }
 0x350   : > { %2941 = vmatprep.subr.bf16.mxu1 %v3183_v3 }
 0x353   : > { %2942 = vmatpush3.bf16.msra.mxu1 %v1001_v1  ;;  %v1393_v1 = vpack.c.bf16 %v2548_v0, %v2547_v63  ;;  %v2544_v63 = vld [vmem:[%s4443_s24 + $0x168] sm:$0xff] }
 0x354   : > { %2943 = vmatprep.subr.bf16.mxu1 %v3183_v3 }
 0x357   : > { %2944 = vmatpush3.bf16.msra.mxu1 %v1002_v5  ;;  %v1394_v5 = vpack.c.bf16 %v2550_v4, %v2549_v2  ;;  %v2546_v2 = vld [vmem:[%s4443_s24 + $0x178] sm:$0xff] }
 0x358   : > { %2945 = vmatprep.subr.bf16.mxu1 %v3183_v3 }
 0x35b   : > { %2946 = vmatpush3.bf16.msra.mxu1 %v1003_v8  ;;  %v2526_v8 = vld [vmem:[%s4428_s8 + $0x28] sm:$0xff] }
 0x35c   : > { %2971 = vmatprep.subr.bf16.mxu1 %v3183_v3 }
 0x35e   : > { %2948 = vmatmul.mubr.bf16.vlgmr.msra.gmra.mrb[16].mxu1 %v3420_v50 }
 0x35f   : > { %2972 = vmatpush3.bf16.msra.mxu1 %v927_v11  ;;  %2975 = vmatprep.mubr.msk.bf16.mxu1 %vm3184_vm0, %v3183_v3  ;;  %v1263_v11 = vpack.c.bf16 %v2526_v8, %v2525_v7 }
 0x360   : > { %2973 = vmatprep.subr.bf16.mxu1 %v3183_v3 }
 0x363   : > { %2974 = vmatpush3.bf16.msra.mxu1 %v928_v14  ;;  %v2528_v14 = vld [vmem:[%s4428_s8 + $0x38] sm:$0xff] }
 0x364   : > { %2999 = vmatprep.subr.bf16.mxu1 %v3183_v3  ;;  %v1264_v15 = vpack.c.bf16 %v2528_v14, %v2527_v13 }
 0x3f1   : > { %v916_v23 = vpop.f32.mrb[8].mxu1 }
 0x3f2   : > { %v922_v24 = vpack.c.bf16 %v916_v23, %v916_v23  ;;  %v2889_v25 = vpop.f32.mrb[9].mxu1  ;;  %v2556_v23 = vld [vmem:[%s4423_s3 + $0x148] sm:$0xff] }
 0x3f3   : > { %v919_v26 = vpop.f32.mrb[10].mxu1  ;;  %v2557_v25 = vld [vmem:[%s4423_s3 + $0x150] sm:$0xff] }
 0x3f4   : > { %v2890_v27 = vpop.f32.mrb[11].mxu1  ;;  %2976 = vmatmul.mubr.msk.bf16.vlgmr.msra.gmra.mrb[20].mxu1 %vm806_vm1, %v922_v24  ;;  %v1397_v24 = vpack.c.bf16 %v2556_v23, %v2555_v22  ;;  %v2558_v26 = vld [vmem:[%s4423_s3 + $0x158] sm:$0xff] }
 0x3f5   : > { %3015 = vmatprep.mubr.msk.bf16.mxu1 %vm3184_vm0, %v3183_v3  ;;  %3000 = vmatpush3.bf16.msra.mxu1 %v1393_v1  ;;  %v1398_v27 = vpack.c.bf16 %v2558_v26, %v2557_v25  ;;  %v2545_v1 = vld [vmem:[%s4443_s24 + $0x170] sm:$0xff]  ;;  %v2564_v25 = vld [vmem:[%s4424_s4 + $0x108] sm:$0xff] }
 0x3f6   : > { %3001 = vmatprep.subr.bf16.mxu1 %v3183_v3  ;;  %v1375_v4 = vpack.c.bf16 %v2546_v2, %v2545_v1  ;;  %v2565_v26 = vld [vmem:[%s4424_s4 + $0x110] sm:$0xff] }
 0x3f9   : > { %3002 = vmatpush3.bf16.msra.mxu1 %v1394_v5  ;;  %v2582_v5 = vld [vmem:[%s4426_s6 + $0x2] ss:$0 sm:$0xff] }
 0x3fa   : > { %3003 = vmatprep.subr.bf16.mxu1 %v3183_v3 }
 0x3fd   : > { %3004 = vmatpush3.bf16.msra.mxu1 %v1395_v18  ;;  %v2580_v18 = vld [vmem:[%s4425_s5 + $0x2] ss:$0 sm:$0xff] }
 0x3fe   : > { %3005 = vmatprep.subr.bf16.mxu1 %v3183_v3 }
 0x401   : > { %3006 = vmatpush3.bf16.msra.mxu1 %v1396_v21 }
 0x402   : > { %3007 = vmatprep.subr.bf16.mxu1 %v3183_v3 }
 0x405   : > { %3008 = vmatpush3.bf16.msra.mxu1 %v1397_v24 }
 0x406   : > { %3009 = vmatprep.subr.bf16.mxu1 %v3183_v3 }
 0x409   : > { %3010 = vmatpush3.bf16.msra.mxu1 %v1398_v27 }
 0x40a   : > { %3011 = vmatprep.subr.bf16.mxu1 %v3183_v3 }
 0x411   : > { %v1046_v29 = vpop.f32.mrb[12].mxu1 }
 0x412   : > { %v1047_v31 = vadd.f32 %v2518_v28, %v1046_v29  ;;  %v2909_v34 = vpop.f32.mrb[13].mxu1  ;;  %v2559_v28 = vld [vmem:[%s4423_s3 + $0x160] sm:$0xff]  ;;  %v2560_v29 = vld [vmem:[%s4423_s3 + $0x168] sm:$0xff] }
 0x413   : > { %v1049_v35 = vpop.f32.mrb[14].mxu1  ;;  %v2561_v34 = vld [vmem:[%s4423_s3 + $0x170] sm:$0xff] }
 0x414   : > { %v1148_v36 = vpack.c.bf16 %v1047_v31, %v1047_v31  ;;  %v2910_v37 = vpop.f32.mrb[15].mxu1  ;;  %v1399_v31 = vpack.c.bf16 %v2560_v29, %v2559_v28  ;;  %v2562_v35 = vld [vmem:[%s4423_s3 + $0x178] sm:$0xff] }
 0x415   : > { %v2531_v37 = vld [vmem:[%s4443_s24 + $0x100] sm:$0xff]  ;;  %v2566_v28 = vld [vmem:[%s4424_s4 + $0x118] sm:$0xff] }
 0x416   : > { %2954 = vmatmul.mubr.msk.bf16.vlgmr.msra.gmra.mrb[12].mxu0 %vm806_vm1, %v1148_v36  ;;  %3012 = vmatpush3.bf16.msra.mxu1 %v1399_v31  ;;  %v1400_v36 = vpack.c.bf16 %v2562_v35, %v2561_v34  ;;  %v1419_v29 = vpack.c.bf16 %v2566_v28, %v2565_v26  ;;  %v2567_v31 = vld [vmem:[%s4424_s4 + $0x120] sm:$0xff]  ;;  %v2568_v34 = vld [vmem:[%s4424_s4 + $0x128] sm:$0xff] }
 0x417   : > { %2959 = vmatprep.mubr.msk.bf16.mxu0 %vm3184_vm0, %v3183_v3  ;;  %3013 = vmatprep.subr.bf16.mxu1 %v3183_v3  ;;  %v1420_v35 = vpack.c.bf16 %v2568_v34, %v2567_v31  ;;  %v2612_v26 = vld [vmem:[%s4423_s3 + $0x1a0] sm:$0xff]  ;;  %v2615_v31 = vld [vmem:[%s4423_s3 + $0x1b8] sm:$0xff] }
 0x41a   : > { %3014 = vmatpush3.bf16.msra.mxu1 %v1400_v36  ;;  %v2569_v36 = vld [vmem:[%s4424_s4 + $0x130] sm:$0xff] }
 0x41b   : > { %3039 = vmatprep.subr.bf16.mxu1 %v3183_v3 }
 0x41d   : > { %3016 = vmatmul.mubr.bf16.vlgmr.msra.gmra.mrb[24].mxu1 %v3420_v50 }
 0x41e   : > { %3041 = vmatprep.mubr.msk.bf16.mxu1 %vm3184_vm0, %v3183_v3 }
 0x431   : > { %v1142_v39 = vpop.f32.mrb[16].mxu1 }
 0x432   : > { %v1143_v40 = vadd.f32 %v2522_v38, %v1142_v39  ;;  %v2949_v41 = vpop.f32.mrb[17].mxu1  ;;  %v2532_v38 = vld [vmem:[%s4443_s24 + $0x108] sm:$0xff] }
 0x433   : > { %v1145_v42 = vpop.f32.mrb[18].mxu1 }
 0x434   : > { %v1210_v43 = vpack.c.bf16 %v1143_v40, %v1143_v40  ;;  %v2950_v44 = vpop.f32.mrb[19].mxu1  ;;  %v1368_v40 = vpack.c.bf16 %v2532_v38, %v2531_v37  ;;  %v2570_v37 = vld [vmem:[%s4424_s4 + $0x138] sm:$0xff] }
 0x435   : > { %v2534_v44 = vld [vmem:[%s4443_s24 + $0x118] sm:$0xff]  ;;  %v1421_v38 = vpack.c.bf16 %v2570_v37, %v2569_v36  ;;  %v2617_v36 = vld [vmem:[%s4423_s3 + $0x1c8] sm:$0xff] }
 0x436   : > { %v1215_v45 = vsel %vm878_vm3, %v1210_v43, 0  ;;  %v2533_v43 = vld [vmem:[%s4443_s24 + $0x110] sm:$0xff] }
 0x437   : > { %2958 = vmatpush3.bf16.msra.mxu0 %v1215_v45 }
 0x438   : > { %2963 = vmatprep.subr.bf16.mxu0 %v3183_v3 }
 0x4c7   : > { %v3732_v46 = vpop.f32.mrb[20].mxu1 }
 0x4c8   : > { %v2977_v47 = vpop.f32.mrb[21].mxu1 }
 0x4c9   : > { %v1348_v48 = vpop.f32.mrb[22].mxu1 }
 0x4ca   : > { %v2978_v49 = vpop.f32.mrb[23].mxu1  ;;  %v1369_v48 = vpack.c.bf16 %v2534_v44, %v2533_v43  ;;  %v2574_v43 = vld [vmem:[%s4424_s4 + $0x158] sm:$0xff] }
 0x4cb   : > { %v2535_v49 = vld [vmem:[%s4443_s24 + $0x120] sm:$0xff] }
 0x4e9   : > { %v1190_v51 = vpop.f32.mrb[12].mxu0 }
 0x4ea   : > { %v1196_v52 = vmul.f32 0.17677669, %v1190_v51  ;;  %v2955_v53 = vpop.f32.mrb[13].mxu0  ;;  %v2536_v51 = vld [vmem:[%s4443_s24 + $0x128] sm:$0xff] }
 0x4eb   : > { %v1193_v54 = vpop.f32.mrb[14].mxu0  ;;  %v2537_v53 = vld [vmem:[%s4443_s24 + $0x130] sm:$0xff] }
 0x4ec   : > { %v2956_v55 = vpop.f32.mrb[15].mxu0  ;;  %v1197_v56 = vadd.f32 %v1196_v52, %v3509_v33  ;;  %v1370_v52 = vpack.c.bf16 %v2536_v51, %v2535_v49  ;;  %v2538_v54 = vld [vmem:[%s4443_s24 + $0x138] sm:$0xff]  ;;  %v2577_v49 = vld [vmem:[%s4424_s4 + $0x170] sm:$0xff] }
 0x4ed   : > { %v1371_v55 = vpack.c.bf16 %v2538_v54, %v2537_v53  ;;  %v2578_v51 = vld [vmem:[%s4424_s4 + $0x178] sm:$0xff] }
 0x4ee   : > { %v1198_v57 = vsel %vm861_vm2, %v1197_v56, -inf }
 0x4ef   : > { %1199 = vmax.xlane.f32.xlu1 %v1198_v57  ;;  %v2540_v57 = vld [vmem:[%s4443_s24 + $0x148] sm:$0xff] }
 0x57c   : > { %v1200_v58 = vpop.xlane.xlu1 %1199 }
 0x57d   : > { %v1201_v59 = vsub.f32 %v1197_v56, %v1200_v58  ;;  %v2539_v56 = vld [vmem:[%s4443_s24 + $0x140] sm:$0xff] }
 0x57e   : > { %v1372_v58 = vpack.c.bf16 %v2540_v57, %v2539_v56 }
 0x57f   : > { %v1202_v60 = vmul.f32 1.442695, %v1201_v59  ;;  %v2541_v59 = vld [vmem:[%s4443_s24 + $0x150] sm:$0xff] }
 0x581   : > { %3154 = vpow2.f32 %v1202_v60  ;;  %v2542_v60 = vld [vmem:[%s4443_s24 + $0x158] sm:$0xff] }
 0x58b   : > { %v3155_v61 = vpop.eup %3154 }
 0x58c   : > { %v1204_v62 = vsel %vm861_vm2, %v3155_v61, 0.0 }
 0x58d   : > { %1205 = vadd.xlane.f32.xlu1 %v1204_v62  ;;  %v2543_v62 = vld [vmem:[%s4443_s24 + $0x160] sm:$0xff] }
 0x58e   : > { %v1374_v0 = vpack.c.bf16 %v2544_v63, %v2543_v62 }
 0x61a   : > { %v1206_v6 = vpop.xlane.xlu1 %1205 }
 0x61b   : > { %3156 = vrcp.f32 %v1206_v6  ;;  %v1516_v6 = vpop.f32.mrb[24].mxu1 }
 0x61c   : > { %v1517_v7 = vadd.f32 %v2582_v5, %v1516_v6  ;;  %v3017_v8 = vpop.f32.mrb[25].mxu1  ;;  %v2584_v5 = vld [vmem:[%s4427_s7 + $0x2] ss:$0 sm:$0xff] }
 0x625   : > { %v3157_v9 = vpop.eup %3156 }
 0x626   : > { %v1208_v10 = vmul.f32 %v3157_v9, %v3155_v61  ;;  %v1373_v61 = vpack.c.bf16 %v2542_v60, %v2541_v59  ;;  %v1519_v9 = vpop.f32.mrb[26].mxu1 }
 0x628   : > { %v1209_v12 = vpack.c.bf16 %v1208_v10, %v1208_v10  ;;  %v1571_v10 = vpack.c.bf16 %v1517_v7, %v1517_v7 }
 0x62a   : > { %2960 = vmatmul.mubr.msk.bf16.vlgmr.msra.gmra.mrb[16].mxu0 %vm861_vm2, %v1209_v12  ;;  %v1576_v12 = vsel %vm806_vm1, %v1571_v10, 0  ;;  %v2608_v10 = vld [vmem:[%s4423_s3 + $0x180] sm:$0xff] }
 0x62b   : > { %2964 = vmatpush3.bf16.msra.mxu0 %v1263_v11  ;;  %2967 = vmatprep.mubr.msk.bf16.mxu0 %vm3184_vm0, %v3183_v3  ;;  %v3018_v11 = vpop.f32.mrb[27].mxu1 }
 0x62c   : > { %2965 = vmatprep.subr.bf16.mxu0 %v3183_v3  ;;  %3040 = vmatpush3.bf16.xpose.msra.mxu1 %v1576_v12  ;;  %v2609_v11 = vld [vmem:[%s4423_s3 + $0x188] sm:$0xff] }
 0x62d   : > { %3045 = vmatprep.subr.bf16.mxu1 %v3183_v3  ;;  %v1773_v12 = vpack.c.bf16 %v2609_v11, %v2608_v10  ;;  %v2605_v10 = vld [vmem:[%s4443_s24 + $0x1e8] sm:$0xff] }
 0x62f   : > { %2966 = vmatpush3.bf16.msra.mxu0 %v1264_v15 }
 0x630   : > { %2979 = vmatprep.subr.bf16.mxu0 %v3183_v3 }
 0x6fd   : > { %v1251_v39 = vpop.f32.mrb[16].mxu0 }
 0x6fe   : > { %v1257_v41 = vpack.c.bf16 %v1251_v39, %v1251_v39  ;;  %v2961_v42 = vpop.f32.mrb[17].mxu0  ;;  %v2571_v39 = vld [vmem:[%s4424_s4 + $0x140] sm:$0xff] }
 0x6ff   : > { %v1254_v45 = vpop.f32.mrb[18].mxu0  ;;  %v2573_v42 = vld [vmem:[%s4424_s4 + $0x150] sm:$0xff] }
 0x700   : > { %v2962_v47 = vpop.f32.mrb[19].mxu0  ;;  %2968 = vmatmul.mubr.msk.bf16.vlgmr.msra.gmra.mrb[20].mxu0 %vm806_vm1, %v1257_v41  ;;  %v1423_v44 = vpack.c.bf16 %v2574_v43, %v2573_v42  ;;  %v2575_v45 = vld [vmem:[%s4424_s4 + $0x160] sm:$0xff]  ;;  %v2621_v42 = vld [vmem:[%s4423_s3 + $0x1e8] sm:$0xff] }
 0x701   : > { %2980 = vmatpush3.bf16.msra.mxu0 %v1368_v40  ;;  %2995 = vmatprep.mubr.msk.bf16.mxu0 %vm3184_vm0, %v3183_v3  ;;  %v2572_v40 = vld [vmem:[%s4424_s4 + $0x148] sm:$0xff] }
 0x702   : > { %2981 = vmatprep.subr.bf16.mxu0 %v3183_v3  ;;  %v1422_v41 = vpack.c.bf16 %v2572_v40, %v2571_v39  ;;  %v2576_v47 = vld [vmem:[%s4424_s4 + $0x168] sm:$0xff]  ;;  %v2619_v39 = vld [vmem:[%s4423_s3 + $0x1d8] sm:$0xff] }
 0x705   : > { %2982 = vmatpush3.bf16.msra.mxu0 %v1369_v48  ;;  %v1424_v48 = vpack.c.bf16 %v2576_v47, %v2575_v45  ;;  %v2623_v45 = vld [vmem:[%s4423_s3 + $0x1f8] sm:$0xff] }
 0x706   : > { %2983 = vmatprep.subr.bf16.mxu0 %v3183_v3 }
 0x709   : > { %2984 = vmatpush3.bf16.msra.mxu0 %v1370_v52  ;;  %v1425_v52 = vpack.c.bf16 %v2578_v51, %v2577_v49  ;;  %v2593_v49 = vld [vmem:[%s4443_s24 + $0x188] sm:$0xff] }
 0x70a   : > { %2985 = vmatprep.subr.bf16.mxu0 %v3183_v3 }
 0x70d   : > { %2986 = vmatpush3.bf16.msra.mxu0 %v1371_v55 }
 0x70e   : > { %2987 = vmatprep.subr.bf16.mxu0 %v3183_v3 }
 0x711   : > { %2988 = vmatpush3.bf16.msra.mxu0 %v1372_v58 }
 0x712   : > { %2989 = vmatprep.subr.bf16.mxu0 %v3183_v3 }
 0x715   : > { %2990 = vmatpush3.bf16.msra.mxu0 %v1373_v61 }
 0x716   : > { %2991 = vmatprep.subr.bf16.mxu0 %v3183_v3 }
 0x719   : > { %2992 = vmatpush3.bf16.msra.mxu0 %v1374_v0 }
 0x71a   : > { %2993 = vmatprep.subr.bf16.mxu0 %v3183_v3 }
 0x71d   : > { %2994 = vmatpush3.bf16.msra.mxu0 %v1375_v4 }
 0x71e   : > { %3019 = vmatprep.subr.bf16.mxu0 %v3183_v3 }
 0x720   : > { %2996 = vmatmul.mubr.bf16.vlgmr.msra.gmra.mrb[24].mxu0 %v3420_v50 }
 0x721   : > { %3035 = vmatprep.mubr.msk.bf16.mxu0 %vm3184_vm0, %v3183_v3 }
 0x7d3   : > { %v1302_v13 = vpop.f32.mrb[20].mxu0 }
 0x7d4   : > { %v3881_v14 = vadd.f32 %v3732_v46, %v1302_v13  ;;  %v2969_v15 = vpop.f32.mrb[21].mxu0  ;;  %v2563_v46 = vld [vmem:[%s4424_s4 + $0x100] sm:$0xff]  ;;  %v2610_v13 = vld [vmem:[%s4423_s3 + $0x190] sm:$0xff] }
 0x7d5   : > { %v1305_v16 = vpop.f32.mrb[22].mxu0  ;;  %v1418_v27 = vpack.c.bf16 %v2564_v25, %v2563_v46  ;;  %v2611_v15 = vld [vmem:[%s4423_s3 + $0x198] sm:$0xff] }
 0x7d6   : > { %v2970_v17 = vpop.f32.mrb[23].mxu0  ;;  %v1774_v16 = vpack.c.bf16 %v2611_v15, %v2610_v13  ;;  %v2590_v46 = vld [vmem:[%s4428_s8 + $0x58] sm:$0xff] }
 0x7d7   : > { %3020 = vmatpush3.bf16.msra.mxu0 %v1418_v27  ;;  %v2613_v27 = vld [vmem:[%s4423_s3 + $0x1a8] sm:$0xff]  ;;  %v2607_v13 = vld [vmem:[%s4443_s24 + $0x1f8] sm:$0xff] }
 0x7d8   : > { %3021 = vmatprep.subr.bf16.mxu0 %v3183_v3  ;;  %v1775_v28 = vpack.c.bf16 %v2613_v27, %v2612_v26 }
 0x7db   : > { %3022 = vmatpush3.bf16.msra.mxu0 %v1419_v29  ;;  %v2614_v29 = vld [vmem:[%s4423_s3 + $0x1b0] sm:$0xff] }
 0x7dc   : > { %3023 = vmatprep.subr.bf16.mxu0 %v3183_v3  ;;  %v1776_v34 = vpack.c.bf16 %v2615_v31, %v2614_v29 }
 0x7df   : > { %3024 = vmatpush3.bf16.msra.mxu0 %v1420_v35  ;;  %v2616_v35 = vld [vmem:[%s4423_s3 + $0x1c0] sm:$0xff] }
 0x7e0   : > { %3025 = vmatprep.subr.bf16.mxu0 %v3183_v3  ;;  %v1777_v37 = vpack.c.bf16 %v2617_v36, %v2616_v35 }
 0x7e3   : > { %3026 = vmatpush3.bf16.msra.mxu0 %v1421_v38  ;;  %v2618_v38 = vld [vmem:[%s4423_s3 + $0x1d0] sm:$0xff] }
 0x7e4   : > { %3027 = vmatprep.subr.bf16.mxu0 %v3183_v3  ;;  %v1778_v40 = vpack.c.bf16 %v2619_v39, %v2618_v38  ;;  %v2625_v38 = vld [vmem:[%s4424_s4 + $0x188] sm:$0xff]  ;;  %v2626_v39 = vld [vmem:[%s4424_s4 + $0x190] sm:$0xff] }
 0x7e7   : > { %3028 = vmatpush3.bf16.msra.mxu0 %v1422_v41  ;;  %v2620_v41 = vld [vmem:[%s4423_s3 + $0x1e0] sm:$0xff] }
 0x7e8   : > { %3029 = vmatprep.subr.bf16.mxu0 %v3183_v3  ;;  %v1779_v43 = vpack.c.bf16 %v2621_v42, %v2620_v41  ;;  %v2627_v41 = vld [vmem:[%s4424_s4 + $0x198] sm:$0xff] }
 0x7e9   : > { %v1799_v42 = vpack.c.bf16 %v2627_v41, %v2626_v39 }
 0x7eb   : > { %3030 = vmatpush3.bf16.msra.mxu0 %v1423_v44  ;;  %v2622_v44 = vld [vmem:[%s4423_s3 + $0x1f0] sm:$0xff] }
 0x7ec   : > { %3031 = vmatprep.subr.bf16.mxu0 %v3183_v3  ;;  %v1780_v47 = vpack.c.bf16 %v2623_v45, %v2622_v44  ;;  %v2629_v44 = vld [vmem:[%s4424_s4 + $0x1a8] sm:$0xff] }
 0x7ef   : > { %3032 = vmatpush3.bf16.msra.mxu0 %v1424_v48  ;;  %v2592_v48 = vld [vmem:[%s4443_s24 + $0x180] sm:$0xff] }
 0x7f0   : > { %3033 = vmatprep.subr.bf16.mxu0 %v3183_v3 }
 0x7f3   : > { %v1468_v19 = vpop.f32.mrb[24].mxu0  ;;  %3034 = vmatpush3.bf16.msra.mxu0 %v1425_v52  ;;  %v1748_v52 = vpack.c.bf16 %v2593_v49, %v2592_v48  ;;  %v2631_v48 = vld [vmem:[%s4424_s4 + $0x1b8] sm:$0xff] }
 0x7f4   : > { %v1469_v20 = vadd.f32 %v2580_v18, %v1468_v19  ;;  %v2997_v21 = vpop.f32.mrb[25].mxu0  ;;  %3079 = vmatprep.subr.bf16.mxu0 %v3183_v3  ;;  %v2587_v18 = vld [vmem:[%s4428_s8 + $0x40] sm:$0xff]  ;;  %v2588_v19 = vld [vmem:[%s4428_s8 + $0x48] sm:$0xff] }
 0x7f5   : > { %v1471_v22 = vpop.f32.mrb[26].mxu0 }
 0x7f6   : > { %v1570_v23 = vpack.c.bf16 %v1469_v20, %v1469_v20  ;;  %v2998_v24 = vpop.f32.mrb[27].mxu0  ;;  %3036 = vmatmul.mubr.bf16.vlgmr.msra.gmra.mrb[28].mxu0 %v3420_v50  ;;  %v1685_v22 = vpack.c.bf16 %v2588_v19, %v2587_v18 }
 0x7f7   : > { %3095 = vmatprep.mubr.msk.bf16.mxu0 %vm3184_vm0, %v3183_v3  ;;  %3080 = vmatpush3.bf16.msra.mxu0 %v1773_v12  ;;  %v2589_v24 = vld [vmem:[%s4428_s8 + $0x50] sm:$0xff] }
 0x7f8   : > { %3042 = vmatmul.mubr.msk.bf16.vlgmr.msra.gmra.mrb[28].mxu1 %vm806_vm1, %v1570_v23  ;;  %3081 = vmatprep.subr.bf16.mxu0 %v3183_v3  ;;  %v1686_v25 = vpack.c.bf16 %v2590_v46, %v2589_v24  ;;  %v2606_v12 = vld [vmem:[%s4443_s24 + $0x1f0] sm:$0xff] }
 0x7f9   : > { %3047 = vmatprep.mubr.msk.bf16.mxu1 %vm3184_vm0, %v3183_v3  ;;  %v1755_v15 = vpack.c.bf16 %v2607_v13, %v2606_v12 }
 0x7fb   : > { %3082 = vmatpush3.bf16.msra.mxu0 %v1774_v16  ;;  %v2643_v16 = vld [vmem:[%s4426_s6 + $0x3] ss:$0 sm:$0xff] }
 0x7fc   : > { %3083 = vmatprep.subr.bf16.mxu0 %v3183_v3 }
 0x7ff   : > { %3084 = vmatpush3.bf16.msra.mxu0 %v1775_v28  ;;  %v2641_v28 = vld [vmem:[%s4425_s5 + $0x3] ss:$0 sm:$0xff] }
 0x800   : > { %3085 = vmatprep.subr.bf16.mxu0 %v3183_v3 }
 0x803   : > { %3086 = vmatpush3.bf16.msra.mxu0 %v1776_v34 }
 0x804   : > { %3087 = vmatprep.subr.bf16.mxu0 %v3183_v3 }
 0x807   : > { %3088 = vmatpush3.bf16.msra.mxu0 %v1777_v37 }
 0x808   : > { %3089 = vmatprep.subr.bf16.mxu0 %v3183_v3 }
 0x80b   : > { %3090 = vmatpush3.bf16.msra.mxu0 %v1778_v40 }
 0x80c   : > { %3091 = vmatprep.subr.bf16.mxu0 %v3183_v3 }
 0x80f   : > { %3092 = vmatpush3.bf16.msra.mxu0 %v1779_v43  ;;  %v2628_v43 = vld [vmem:[%s4424_s4 + $0x1a0] sm:$0xff] }
 0x810   : > { %3093 = vmatprep.subr.bf16.mxu0 %v3183_v3  ;;  %v1800_v45 = vpack.c.bf16 %v2629_v44, %v2628_v43  ;;  %v2150_v44 = vld [vmem:[%s4432_s12 + $0x8] sm:$0xff] }
 0x813   : > { %3094 = vmatpush3.bf16.msra.mxu0 %v1780_v47  ;;  %v2630_v47 = vld [vmem:[%s4424_s4 + $0x1b0] sm:$0xff] }
 0x814   : > { %3119 = vmatprep.subr.bf16.mxu0 %v3183_v3  ;;  %v1801_v49 = vpack.c.bf16 %v2631_v48, %v2630_v47  ;;  %v2149_v47 = vld [vmem:[%s4432_s12] sm:$0xff]  ;;  %v2151_v48 = vld [vmem:[%s4432_s12 + $0x10] sm:$0xff] }
 0x816   : > { %3096 = vmatmul.mubr.bf16.vlgmr.msra.gmra.mrb[32].mxu0 %v3420_v50 }
 0x817   : > { %3121 = vmatprep.mubr.msk.bf16.mxu0 %vm3184_vm0, %v3183_v3 }
 0x8c9   : > { %v1564_v1 = vpop.f32.mrb[28].mxu0 }
 0x8ca   : > { %v3037_v2 = vpop.f32.mrb[29].mxu0  ;;  %v1565_v7 = vadd.f32 %v2584_v5, %v1564_v1 }
 0x8cb   : > { %v1612_v53 = vpop.f32.mrb[28].mxu1  ;;  %v1567_v4 = vpop.f32.mrb[30].mxu0  ;;  %v2600_v2 = vld [vmem:[%s4443_s24 + $0x1c0] sm:$0xff] }
 0x8cc   : > { %v1618_v54 = vmul.f32 0.17677669, %v1612_v53  ;;  %v3043_v55 = vpop.f32.mrb[29].mxu1  ;;  %v3038_v6 = vpop.f32.mrb[31].mxu0  ;;  %v1632_v8 = vpack.c.bf16 %v1565_v7, %v1565_v7  ;;  %v2601_v4 = vld [vmem:[%s4443_s24 + $0x1c8] sm:$0xff]  ;;  %v2603_v7 = vld [vmem:[%s4443_s24 + $0x1d8] sm:$0xff] }
 0x8cd   : > { %v1615_v56 = vpop.f32.mrb[30].mxu1  ;;  %v2594_v55 = vld [vmem:[%s4443_s24 + $0x190] sm:$0xff]  ;;  %v1752_v5 = vpack.c.bf16 %v2601_v4, %v2600_v2 }
 0x8ce   : > { %v3044_v57 = vpop.f32.mrb[31].mxu1  ;;  %v1619_v58 = vadd.f32 %v1618_v54, %v3509_v33  ;;  %v1637_v9 = vsel %vm878_vm3, %v1632_v8, 0  ;;  %v2595_v56 = vld [vmem:[%s4443_s24 + $0x198] sm:$0xff]  ;;  %v2602_v6 = vld [vmem:[%s4443_s24 + $0x1d0] sm:$0xff] }
 0x8cf   : > { %3046 = vmatpush3.bf16.msra.mxu1 %v1637_v9  ;;  %v1753_v8 = vpack.c.bf16 %v2603_v7, %v2602_v6  ;;  %v2604_v9 = vld [vmem:[%s4443_s24 + $0x1e0] sm:$0xff] }
 0x8d0   : > { %v1620_v59 = vsel %vm861_vm2, %v1619_v58, -inf  ;;  %3051 = vmatprep.subr.bf16.mxu1 %v3183_v3  ;;  %v1754_v11 = vpack.c.bf16 %v2605_v10, %v2604_v9  ;;  %v2645_v7 = vld [vmem:[%s4427_s7 + $0x3] ss:$0 sm:$0xff] }
 0x8d1   : > { %1621 = vmax.xlane.f32.xlu0 %v1620_v59  ;;  %v1749_v59 = vpack.c.bf16 %v2595_v56, %v2594_v55  ;;  %v2635_v55 = vld [vmem:[%s4424_s4 + $0x1d8] sm:$0xff] }
 0x95e   : > { %v1622_v60 = vpop.xlane.xlu0 %1621 }
 0x95f   : > { %v1623_v61 = vsub.f32 %v1619_v58, %v1622_v60  ;;  %v2596_v60 = vld [vmem:[%s4443_s24 + $0x1a0] sm:$0xff] }
 0x961   : > { %v1624_v62 = vmul.f32 1.442695, %v1623_v61  ;;  %v2597_v61 = vld [vmem:[%s4443_s24 + $0x1a8] sm:$0xff] }
 0x963   : > { %3158 = vpow2.f32 %v1624_v62  ;;  %v1750_v62 = vpack.c.bf16 %v2597_v61, %v2596_v60  ;;  %v2638_v60 = vld [vmem:[%s4424_s4 + $0x1f0] sm:$0xff]  ;;  %v2639_v61 = vld [vmem:[%s4424_s4 + $0x1f8] sm:$0xff] }
 0x96d   : > { %v3159_v63 = vpop.eup %3158 }
 0x96e   : > { %v1626_v0 = vsel %vm861_vm2, %v3159_v63, 0.0 }
 0x96f   : > { %1627 = vadd.xlane.f32.xlu1 %v1626_v0  ;;  %v2599_v0 = vld [vmem:[%s4443_s24 + $0x1b8] sm:$0xff] }
 0x9fc   : > { %v1628_v17 = vpop.xlane.xlu1 %1627 }
 0x9fd   : > { %3160 = vrcp.f32 %v1628_v17  ;;  %v1896_v17 = vpop.f32.mrb[32].mxu0 }
 0x9fe   : > { %v1897_v18 = vadd.f32 %v2643_v16, %v1896_v17  ;;  %v3097_v19 = vpop.f32.mrb[33].mxu0 }
 0xa07   : > { %v3161_v20 = vpop.eup %3160 }
 0xa08   : > { %v1630_v21 = vmul.f32 %v3161_v20, %v3159_v63  ;;  %v2598_v63 = vld [vmem:[%s4443_s24 + $0x1b0] sm:$0xff]  ;;  %v1899_v20 = vpop.f32.mrb[34].mxu0 }
 0xa09   : > { %v1751_v1 = vpack.c.bf16 %v2599_v0, %v2598_v63  ;;  %v2648_v20 = vld [vmem:[%s4428_s8 + $0x60] sm:$0xff] }
 0xa0a   : > { %v1631_v23 = vpack.c.bf16 %v1630_v21, %v1630_v21  ;;  %v1951_v21 = vpack.c.bf16 %v1897_v18, %v1897_v18 }
 0xa0c   : > { %3048 = vmatmul.mubr.msk.bf16.vlgmr.msra.gmra.mrb[32].mxu1 %vm861_vm2, %v1631_v23  ;;  %v1956_v23 = vsel %vm806_vm1, %v1951_v21, 0  ;;  %v2649_v21 = vld [vmem:[%s4428_s8 + $0x68] sm:$0xff] }
 0xa0d   : > { %3052 = vmatpush3.bf16.msra.mxu1 %v1685_v22  ;;  %3055 = vmatprep.mubr.msk.bf16.mxu1 %vm3184_vm0, %v3183_v3  ;;  %v3098_v22 = vpop.f32.mrb[35].mxu0 }
 0xa0e   : > { %3053 = vmatprep.subr.bf16.mxu1 %v3183_v3  ;;  %3120 = vmatpush3.bf16.xpose.msra.mxu0 %v1956_v23 }
 0xa0f   : > { %3125 = vmatprep.subr.bf16.mxu0 %v3183_v3 }
 0xa11   : > { %3054 = vmatpush3.bf16.msra.mxu1 %v1686_v25 }
 0xa12   : > { %3059 = vmatprep.subr.bf16.mxu1 %v3183_v3 }
 0xadf   : > { %v1673_v51 = vpop.f32.mrb[32].mxu1 }
 0xae0   : > { %v1679_v53 = vpack.c.bf16 %v1673_v51, %v1673_v51  ;;  %v3049_v54 = vpop.f32.mrb[33].mxu1  ;;  %v2632_v51 = vld [vmem:[%s4424_s4 + $0x1c0] sm:$0xff] }
 0xae1   : > { %v1676_v57 = vpop.f32.mrb[34].mxu1  ;;  %v2634_v54 = vld [vmem:[%s4424_s4 + $0x1d0] sm:$0xff] }
 0xae2   : > { %v3050_v58 = vpop.f32.mrb[35].mxu1  ;;  %3056 = vmatmul.mubr.msk.bf16.vlgmr.msra.gmra.mrb[36].mxu1 %vm806_vm1, %v1679_v53  ;;  %v1803_v56 = vpack.c.bf16 %v2635_v55, %v2634_v54  ;;  %v2636_v57 = vld [vmem:[%s4424_s4 + $0x1e0] sm:$0xff]  ;;  %v2155_v55 = vld [vmem:[%s4432_s12 + $0x30] sm:$0xff] }
 0xae3   : > { %3060 = vmatpush3.bf16.msra.mxu1 %v1748_v52  ;;  %3075 = vmatprep.mubr.msk.bf16.mxu1 %vm3184_vm0, %v3183_v3  ;;  %v2633_v52 = vld [vmem:[%s4424_s4 + $0x1c8] sm:$0xff]  ;;  %v2153_v54 = vld [vmem:[%s4432_s12 + $0x20] sm:$0xff] }
 0xae4   : > { %3061 = vmatprep.subr.bf16.mxu1 %v3183_v3  ;;  %v1802_v53 = vpack.c.bf16 %v2633_v52, %v2632_v51  ;;  %v2637_v58 = vld [vmem:[%s4424_s4 + $0x1e8] sm:$0xff]  ;;  %v2156_v51 = vld [vmem:[%s4432_s12 + $0x38] sm:$0xff]  ;;  %v2181_v52 = vpack.c.bf16 %v2151_v48, %v2149_v47  ;;  %v2270_v48 = vld [vmem:[%s4434_s14] sm:$0xff] }
 0xae5   : > { %v2287_v47 = vld [vmem:[%s4434_s14 + $0x88] sm:$0xff] }
 0xae7   : > { %3062 = vmatpush3.bf16.msra.mxu1 %v1749_v59  ;;  %v1804_v59 = vpack.c.bf16 %v2637_v58, %v2636_v57  ;;  %v2160_v57 = vld [vmem:[%s4432_s12 + $0x58] sm:$0xff]  ;;  %v2183_v58 = vpack.c.bf16 %v2155_v55, %v2153_v54  ;;  %v2272_v55 = vld [vmem:[%s4434_s14 + $0x10] sm:$0xff] }
 0xae8   : > { %3063 = vmatprep.subr.bf16.mxu1 %v3183_v3 }
 0xaeb   : > { %3064 = vmatpush3.bf16.msra.mxu1 %v1750_v62  ;;  %v1805_v62 = vpack.c.bf16 %v2639_v61, %v2638_v60 }
 0xaec   : > { %3065 = vmatprep.subr.bf16.mxu1 %v3183_v3 }
 0xaef   : > { %3066 = vmatpush3.bf16.msra.mxu1 %v1751_v1 }
 0xaf0   : > { %3067 = vmatprep.subr.bf16.mxu1 %v3183_v3 }
 0xaf3   : > { %3068 = vmatpush3.bf16.msra.mxu1 %v1752_v5 }
 0xaf4   : > { %3069 = vmatprep.subr.bf16.mxu1 %v3183_v3 }
 0xaf7   : > { %3070 = vmatpush3.bf16.msra.mxu1 %v1753_v8 }
 0xaf8   : > { %3071 = vmatprep.subr.bf16.mxu1 %v3183_v3 }
 0xafb   : > { %3072 = vmatpush3.bf16.msra.mxu1 %v1754_v11 }
 0xafc   : > { %3073 = vmatprep.subr.bf16.mxu1 %v3183_v3 }
 0xaff   : > { %3074 = vmatpush3.bf16.msra.mxu1 %v1755_v15 }
 0xb00   : > { %3099 = vmatprep.subr.bf16.mxu1 %v3183_v3 }
 0xb02   : > { %3076 = vmatmul.mubr.bf16.vlgmr.msra.gmra.mrb[40].mxu1 %v3420_v50 }
 0xb03   : > { %3115 = vmatprep.mubr.msk.bf16.mxu1 %vm3184_vm0, %v3183_v3 }
 0xbb5   : > { %v1724_v24 = vpop.f32.mrb[36].mxu1 }
 0xbb6   : > { %v4100_v46 = vadd.f32 %v1724_v24, %v3881_v14  ;;  %v3057_v25 = vpop.f32.mrb[37].mxu1  ;;  %v2624_v14 = vld [vmem:[%s4424_s4 + $0x180] sm:$0xff]  ;;  %v2065_v24 = vpack.c.bf16 %v2649_v21, %v2648_v20  ;;  %v2174_v21 = vld [vmem:[%s4432_s12 + $0xc8] sm:$0xff] }
 0xbb7   : > { %v1727_v26 = vpop.f32.mrb[38].mxu1  ;;  %v1798_v40 = vpack.c.bf16 %v2625_v38, %v2624_v14 }
 0xbb8   : > { %v3058_v27 = vpop.f32.mrb[39].mxu1  ;;  %v2650_v26 = vld [vmem:[%s4428_s8 + $0x70] sm:$0xff] }
 0xbb9   : > { %3100 = vmatpush3.bf16.msra.mxu1 %v1798_v40  ;;  %v2651_v27 = vld [vmem:[%s4428_s8 + $0x78] sm:$0xff] }
 0xbba   : > { %3101 = vmatprep.subr.bf16.mxu1 %v3183_v3 }
 0xbbd   : > { %3102 = vmatpush3.bf16.msra.mxu1 %v1799_v42  ;;  %v3174_v42 = vld [vmem:[%s3408_s1] sm:$0xff] }
 0xbbe   : > { %3103 = vmatprep.subr.bf16.mxu1 %v3183_v3 }
 0xbc1   : > { %3104 = vmatpush3.bf16.msra.mxu1 %v1800_v45  ;;  %v2152_v45 = vld [vmem:[%s4432_s12 + $0x18] sm:$0xff] }
 0xbc2   : > { %3105 = vmatprep.subr.bf16.mxu1 %v3183_v3 }
 0xbc5   : > { %3106 = vmatpush3.bf16.msra.mxu1 %v1801_v49  ;;  %v2154_v49 = vld [vmem:[%s4432_s12 + $0x28] sm:$0xff] }
 0xbc6   : > { %3107 = vmatprep.subr.bf16.mxu1 %v3183_v3 }
 0xbc9   : > { %3108 = vmatpush3.bf16.msra.mxu1 %v1802_v53  ;;  %v2184_v53 = vpack.c.bf16 %v2156_v51, %v2154_v49  ;;  %v2271_v49 = vld [vmem:[%s4434_s14 + $0x8] sm:$0xff] }
 0xbca   : > { %3109 = vmatprep.subr.bf16.mxu1 %v3183_v3  ;;  %v2302_v51 = vpack.c.bf16 %v2271_v49, %v2270_v48 }
 0xbcd   : > { %3110 = vmatpush3.bf16.msra.mxu1 %v1803_v56  ;;  %v2158_v56 = vld [vmem:[%s4432_s12 + $0x48] sm:$0xff] }
 0xbce   : > { %3111 = vmatprep.subr.bf16.mxu1 %v3183_v3 }
 0xbd1   : > { %3112 = vmatpush3.bf16.msra.mxu1 %v1804_v59  ;;  %v2186_v59 = vpack.c.bf16 %v2160_v57, %v2158_v56  ;;  %v2273_v56 = vld [vmem:[%s4434_s14 + $0x18] sm:$0xff] }
 0xbd2   : > { %3113 = vmatprep.subr.bf16.mxu1 %v3183_v3  ;;  %v2303_v57 = vpack.c.bf16 %v2273_v56, %v2272_v55 }
 0xbd5   : > { %v1848_v29 = vpop.f32.mrb[40].mxu1  ;;  %3114 = vmatpush3.bf16.msra.mxu1 %v1805_v62 }
 0xbd6   : > { %v1849_v31 = vadd.f32 %v2641_v28, %v1848_v29  ;;  %v3077_v34 = vpop.f32.mrb[41].mxu1  ;;  %v2066_v28 = vpack.c.bf16 %v2651_v27, %v2650_v26  ;;  %v2178_v27 = vld [vmem:[%s4432_s12 + $0xe8] sm:$0xff] }
 0xbd7   : > { %v1851_v35 = vpop.f32.mrb[42].mxu1 }
 0xbd8   : > { %v1950_v36 = vpack.c.bf16 %v1849_v31, %v1849_v31  ;;  %v3078_v37 = vpop.f32.mrb[43].mxu1  ;;  %3116 = vmatmul.mubr.bf16.vlgmr.msra.gmra.mrb[44].mxu1 %v3420_v50 }
 0xbda   : > { %3122 = vmatmul.mubr.msk.bf16.vlgmr.msra.gmra.mrb[36].mxu0 %vm806_vm1, %v1950_v36 }
 0xbdb   : > { %3127 = vmatprep.mubr.msk.bf16.mxu0 %vm3184_vm0, %v3183_v3 }
 0xcab   : > { %v1944_v8 = vpop.f32.mrb[44].mxu1 }
 0xcac   : > { %v1945_v9 = vadd.f32 %v2645_v7, %v1944_v8  ;;  %v3117_v10 = vpop.f32.mrb[45].mxu1  ;;  %v2161_v7 = vld [vmem:[%s4432_s12 + $0x60] sm:$0xff]  ;;  %v2163_v8 = vld [vmem:[%s4432_s12 + $0x70] sm:$0xff] }
 0xcad   : > { %v1992_v63 = vpop.f32.mrb[36].mxu0  ;;  %v1947_v11 = vpop.f32.mrb[46].mxu1  ;;  %v2166_v10 = vld [vmem:[%s4432_s12 + $0x88] sm:$0xff] }
 0xcae   : > { %v1998_v0 = vmul.f32 0.17677669, %v1992_v63  ;;  %v3123_v1 = vpop.f32.mrb[37].mxu0  ;;  %v2012_v12 = vpack.c.bf16 %v1945_v9, %v1945_v9  ;;  %v3118_v50 = vpop.f32.mrb[47].mxu1  ;;  %v2187_v9 = vpack.c.bf16 %v2163_v8, %v2161_v7  ;;  %v2168_v11 = vld [vmem:[%s4432_s12 + $0x98] sm:$0xff]  ;;  %v2294_v7 = vld [vmem:[%s4434_s14 + $0xc0] sm:$0xff] }
 0xcaf   : > { %v1995_v2 = vpop.f32.mrb[38].mxu0  ;;  %v2159_v1 = vld [vmem:[%s4432_s12 + $0x50] sm:$0xff]  ;;  %v2165_v50 = vld [vmem:[%s4432_s12 + $0x80] sm:$0xff]  ;;  %v2295_v8 = vld [vmem:[%s4434_s14 + $0xc8] sm:$0xff] }
 0xcb0   : > { %v3124_v4 = vpop.f32.mrb[39].mxu0  ;;  %v1999_v5 = vadd.f32 %v1998_v0, %v3509_v33  ;;  %v2017_v13 = vsel %vm878_vm3, %v2012_v12, 0  ;;  %v2157_v0 = vld [vmem:[%s4432_s12 + $0x40] sm:$0xff]  ;;  %v2190_v12 = vpack.c.bf16 %v2168_v11, %v2166_v10  ;;  %v2314_v10 = vpack.c.bf16 %v2295_v8, %v2294_v7  ;;  %v2279_v11 = vld [vmem:[%s4434_s14 + $0x48] sm:$0xff] }
 0xcb1   : > { %3126 = vmatpush3.bf16.msra.mxu0 %v2017_v13  ;;  %v2185_v2 = vpack.c.bf16 %v2159_v1, %v2157_v0  ;;  %v2162_v4 = vld [vmem:[%s4432_s12 + $0x68] sm:$0xff]  ;;  %v2167_v13 = vld [vmem:[%s4432_s12 + $0x90] sm:$0xff]  ;;  %v2293_v1 = vld [vmem:[%s4434_s14 + $0xb8] sm:$0xff] }
 0xcb2   : > { %v2000_v6 = vsel %vm861_vm2, %v1999_v5, -inf  ;;  %3131 = vmatprep.subr.bf16.mxu0 %v3183_v3  ;;  %v2292_v0 = vld [vmem:[%s4434_s14 + $0xb0] sm:$0xff] }
 0xcb3   : > { %2001 = vmax.xlane.f32.xlu0 %v2000_v6 }
 0xd40   : > { %v2002_v15 = vpop.xlane.xlu0 %2001 }
 0xd41   : > { %v2003_v33 = vsub.f32 %v1999_v5, %v2002_v15  ;;  %v2164_v5 = vld [vmem:[%s4432_s12 + $0x78] sm:$0xff]  ;;  %v2189_v15 = vpack.c.bf16 %v2167_v13, %v2165_v50 }
 0xd42   : > { %v2188_v6 = vpack.c.bf16 %v2164_v5, %v2162_v4  ;;  %v2276_v4 = vld [vmem:[%s4434_s14 + $0x30] sm:$0xff]  ;;  %v2277_v5 = vld [vmem:[%s4434_s14 + $0x38] sm:$0xff] }
 0xd43   : > { %v2004_v16 = vmul.f32 1.442695, %v2003_v33  ;;  %v2170_v33 = vld [vmem:[%s4432_s12 + $0xa8] sm:$0xff]  ;;  %v2297_v50 = vld [vmem:[%s4434_s14 + $0xd8] sm:$0xff] }
 0xd45   : > { %3162 = vpow2.f32 %v2004_v16  ;;  %v2172_v16 = vld [vmem:[%s4432_s12 + $0xb8] sm:$0xff] }
 0xd4f   : > { %v3163_v17 = vpop.eup %3162 }
 0xd50   : > { %v2006_v18 = vsel %vm861_vm2, %v3163_v17, 0.0 }
 0xd51   : > { %2007 = vadd.xlane.f32.xlu1 %v2006_v18  ;;  %v2169_v18 = vld [vmem:[%s4432_s12 + $0xa0] sm:$0xff] }
 0xdde   : > { %v2008_v19 = vpop.xlane.xlu1 %2007 }
 0xddf   : > { %3164 = vrcp.f32 %v2008_v19  ;;  %v2171_v19 = vld [vmem:[%s4432_s12 + $0xb0] sm:$0xff] }
 0xde0   : > { %v2191_v20 = vpack.c.bf16 %v2171_v19, %v2169_v18  ;;  %v2299_v18 = vld [vmem:[%s4434_s14 + $0xe8] sm:$0xff] }
 0xde9   : > { %v3165_v22 = vpop.eup %3164 }
 0xdea   : > { %v2010_v23 = vmul.f32 %v3165_v22, %v3163_v17  ;;  %v2192_v17 = vpack.c.bf16 %v2172_v16, %v2170_v33  ;;  %v2176_v22 = vld [vmem:[%s4432_s12 + $0xd8] sm:$0xff]  ;;  %v2280_v33 = vld [vmem:[%s4434_s14 + $0x50] sm:$0xff] }
 0xdeb   : > { %v2281_v16 = vld [vmem:[%s4434_s14 + $0x58] sm:$0xff] }
 0xdec   : > { %v2011_v25 = vpack.c.bf16 %v2010_v23, %v2010_v23  ;;  %v2194_v23 = vpack.c.bf16 %v2176_v22, %v2174_v21  ;;  %v2307_v19 = vpack.c.bf16 %v2281_v16, %v2280_v33  ;;  %v2282_v21 = vld [vmem:[%s4434_s14 + $0x60] sm:$0xff]  ;;  %v2283_v22 = vld [vmem:[%s4434_s14 + $0x68] sm:$0xff] }
 0xdee   : > { %3128 = vmatmul.mubr.msk.bf16.vlgmr.msra.gmra.mrb[40].mxu0 %vm861_vm2, %v2011_v25  ;;  %v2175_v25 = vld [vmem:[%s4432_s12 + $0xd0] sm:$0xff] }
 0xdef   : > { %3132 = vmatpush3.bf16.msra.mxu0 %v2065_v24  ;;  %3135 = vmatprep.mubr.msk.bf16.mxu0 %vm3184_vm0, %v3183_v3  ;;  %v2173_v24 = vld [vmem:[%s4432_s12 + $0xc0] sm:$0xff] }
 0xdf0   : > { %3133 = vmatprep.subr.bf16.mxu0 %v3183_v3  ;;  %v2653_v3 = vld [vmem:[%s4429_s9] ss:$0 sm:$0xff]  ;;  %v2193_v26 = vpack.c.bf16 %v2175_v25, %v2173_v24  ;;  %v2301_v24 = vld [vmem:[%s4434_s14 + $0xf8] sm:$0xff]  ;;  %v2308_v25 = vpack.c.bf16 %v2283_v22, %v2282_v21 }
 0xdf3   : > { %3134 = vmatpush3.bf16.msra.mxu0 %v2066_v28  ;;  %v2180_v28 = vld [vmem:[%s4432_s12 + $0xf8] sm:$0xff] }
 0xec1   : > { %v2053_v29 = vpop.f32.mrb[40].mxu0 }
 0xec2   : > { %v2059_v31 = vpack.c.bf16 %v2053_v29, %v2053_v29  ;;  %v3129_v34 = vpop.f32.mrb[41].mxu0  ;;  %v2177_v29 = vld [vmem:[%s4432_s12 + $0xe0] sm:$0xff] }
 0xec3   : > { %v2056_v35 = vpop.f32.mrb[42].mxu0  ;;  %v2179_v34 = vld [vmem:[%s4432_s12 + $0xf0] sm:$0xff] }
 0xec4   : > { %v3130_v36 = vpop.f32.mrb[43].mxu0  ;;  %3136 = vmatmul.mubr.msk.bf16.vlgmr.msra.gmra.mrb[44].mxu0 %vm806_vm1, %v2059_v31  ;;  %v2196_v31 = vpack.c.bf16 %v2180_v28, %v2178_v27  ;;  %v3185_v35 = vmov 0   ;;  %v2284_v27 = vld [vmem:[%s4434_s14 + $0x70] sm:$0xff]  ;;  %v2285_v28 = vld [vmem:[%s4434_s14 + $0x78] sm:$0xff] }
 0xec5   : > { %2241 = vmatprep.mubr.bf16.mxu0 %v3185_v35  ;;  %v2195_v36 = vpack.c.bf16 %v2179_v34, %v2177_v29  ;;  %v2309_v29 = vpack.c.bf16 %v2285_v28, %v2284_v27  ;;  %v2205_v34 = vsub.s32 1, %v3504_v30 }
 0xf97   : > { %v2104_v37 = vpop.f32.mrb[44].mxu0 }
 0xf98   : > { %v2110_v14 = vadd.f32 %v2104_v37, %v4100_v46  ;;  %v3137_v38 = vpop.f32.mrb[45].mxu0  ;;  %v2182_v46 = vpack.c.bf16 %v2152_v45, %v2150_v44  ;;  %v2286_v45 = vld [vmem:[%s4434_s14 + $0x80] sm:$0xff] }
 0xf99   : > { %v2107_v39 = vpop.f32.mrb[46].mxu0 }
 0xf9a   : > { %v2118_v40 = vadd.f32 %v2653_v3, %v2110_v14  ;;  %v3138_v41 = vpop.f32.mrb[47].mxu0  ;;  %2209 = vmatprep.subr.bf16.mxu0 %v2182_v46  ;;  %v2654_v39 = vld [vmem:[%s4430_s10] ss:$0 sm:$0xff]  ;;  %v2310_v46 = vpack.c.bf16 %v2287_v47, %v2286_v45 }
 0xf9b   : > { %2210 = vmatpush1.bf16.msra.mxu0 %v2181_v52  ;;  %v2655_v41 = vld [vmem:[%s4431_s11] ss:$0 sm:$0xff]  ;;  %v2288_v52 = vld [vmem:[%s4434_s14 + $0x90] sm:$0xff] }
 0xf9c   : > { %v2119_v43 = vadd.f32 %v3174_v42, %v2118_v40  ;;  %2211 = vmatprep.subr.bf16.mxu0 %v2184_v53  ;;  %2797 = vmatprep.subr.bf16.mxu1 %v2310_v46  ;;  %v2289_v53 = vld [vmem:[%s4434_s14 + $0x98] sm:$0xff] }
 0xf9d   : > { %2798 = vmatpush3.bf16.msra.mxu1 %v2302_v51  ;;  %v2311_v54 = vpack.c.bf16 %v2289_v53, %v2288_v52 }
 0xf9e   : > { %2122 = vadd.xlane.f32.xlu0 %v2119_v43 }
 0xf9f   : > { %2212 = vmatpush1.bf16.msra.mxu0 %v2183_v58  ;;  %2799 = vmatprep.subr.bf16.mxu1 %v2311_v54  ;;  %v2290_v58 = vld [vmem:[%s4434_s14 + $0xa0] sm:$0xff] }
 0xfa0   : > { %2213 = vmatprep.subr.bf16.mxu0 %v2186_v59  ;;  %v2291_v59 = vld [vmem:[%s4434_s14 + $0xa8] sm:$0xff] }
 0xfa1   : > { %2800 = vmatpush3.bf16.msra.mxu1 %v2303_v57 }
 0xfa3   : > { %2214 = vmatpush1.bf16.msra.mxu0 %v2185_v2  ;;  %v2313_v2 = vpack.c.bf16 %v2293_v1, %v2292_v0 }
 0xfa4   : > { %2215 = vmatprep.subr.bf16.mxu0 %v2188_v6  ;;  %v2305_v6 = vpack.c.bf16 %v2277_v5, %v2276_v4 }
 0xfa7   : > { %2216 = vmatpush1.bf16.msra.mxu0 %v2187_v9  ;;  %v2278_v9 = vld [vmem:[%s4434_s14 + $0x40] sm:$0xff] }
 0xfa8   : > { %2217 = vmatprep.subr.bf16.mxu0 %v2190_v12  ;;  %v2296_v12 = vld [vmem:[%s4434_s14 + $0xd0] sm:$0xff]  ;;  %v2306_v13 = vpack.c.bf16 %v2279_v11, %v2278_v9 }
 0xfab   : > { %2218 = vmatpush1.bf16.msra.mxu0 %v2189_v15  ;;  %v2315_v15 = vpack.c.bf16 %v2297_v50, %v2296_v12 }
 0xfac   : > { %2219 = vmatprep.subr.bf16.mxu0 %v2192_v17  ;;  %v2298_v17 = vld [vmem:[%s4434_s14 + $0xe0] sm:$0xff] }
 0xfaf   : > { %2220 = vmatpush1.bf16.msra.mxu0 %v2191_v20  ;;  %v2316_v20 = vpack.c.bf16 %v2299_v18, %v2298_v17 }
 0xfb0   : > { %2221 = vmatprep.subr.bf16.mxu0 %v2194_v23  ;;  %v2300_v23 = vld [vmem:[%s4434_s14 + $0xf0] sm:$0xff] }
 0xfb3   : > { %2222 = vmatpush1.bf16.msra.mxu0 %v2193_v26  ;;  %v2317_v26 = vpack.c.bf16 %v2301_v24, %v2300_v23 }
 0xfb4   : > { %2223 = vmatprep.subr.bf16.mxu0 %v2196_v31  ;;  %v2197_v31 = vld [vmem:[%s4433_s13] sm:$0x3] }
 0xfb5   : > { %v2202_v35 = vrot.slane %v2197_v31, %v857_v32 }
 0xfb7   : > { %2224 = vmatpush1.bf16.msra.mxu0 %v2195_v36  ;;  %v2206_v36 = vrot.slane %v2197_v31, %v2205_v34 }
0x102b   : > { %v2123_v60 = vpop.xlane.xlu0 %2122 }
0x102c   : > { %v2125_v61 = vmul.f32 0.0078125, %v2123_v60  ;;  %v2312_v60 = vpack.c.bf16 %v2291_v59, %v2290_v58 }
0x102e   : > { %v2126_v62 = vsub.f32 %v2119_v43, %v2125_v61  ;;  %v2274_v61 = vld [vmem:[%s4434_s14 + $0x20] sm:$0xff]  ;;  %2801 = vmatprep.subr.bf16.mxu1 %v2312_v60 }
0x1030   : > { %v2127_v63 = vmul.f32 %v2126_v62, %v2126_v62 }
0x1032   : > { %2128 = vadd.xlane.f32.xlu1 %v2127_v63 }
0x10bf   : > { %v2129_v37 = vpop.xlane.xlu1 %2128 }
0x10c0   : > { %v2130_v3 = vmul.f32 0.0078125, %v2129_v37 }
0x10c2   : > { %v2131_v14 = vadd.f32 1e-07, %v2130_v3 }
0x10c4   : > { %3166 = vrsqrt.f32 %v2131_v14 }
0x10ce   : > { %v3167_v38 = vpop.eup %3166 }
0x10cf   : > { %v2133_v40 = vmul.f32 %v3167_v38, %v2126_v62  ;;  %v2275_v62 = vld [vmem:[%s4434_s14 + $0x28] sm:$0xff] }
0x10d0   : > { %v2304_v63 = vpack.c.bf16 %v2275_v62, %v2274_v61  ;;  %v2656_v62 = vld [vmem:[%s4435_s15] ss:$0 sm:$0xff] }
0x10d1   : > { %v2140_v42 = vmul.f32 %v2654_v39, %v2133_v40 }
0x10d2   : > { %2802 = vmatpush3.bf16.msra.mxu1 %v2304_v63 }
0x10d3   : > { %v4296_v43 = vadd.f32 %v2655_v41, %v2140_v42  ;;  %2803 = vmatprep.subr.bf16.mxu1 %v2313_v2 }
0x10d5   : > { %v2148_v44 = vpack.c.bf16 %v4296_v43, %v4296_v43 }
0x10d6   : > { %2804 = vmatpush3.bf16.msra.mxu1 %v2305_v6 }
0x10d7   : > { %2242 = vmatmul.mubr.bf16.vlgmr.msra.gmra.mrb[48].mxu0 %v2148_v44  ;;  %2805 = vmatprep.subr.bf16.mxu1 %v2314_v10 }
0x10da   : > { %2806 = vmatpush3.bf16.msra.mxu1 %v2306_v13  ;;  %v2657_v13 = vld [vmem:[%s4436_s16] ss:$0 sm:$0xff] }
0x10db   : > { %2807 = vmatprep.subr.bf16.mxu1 %v2315_v15 }
0x10de   : > { %2808 = vmatpush3.bf16.msra.mxu1 %v2307_v19 }
0x10df   : > { %2809 = vmatprep.subr.bf16.mxu1 %v2316_v20 }
0x10e2   : > { %2810 = vmatpush3.bf16.msra.mxu1 %v2308_v25 }
0x10e3   : > { %2811 = vmatprep.subr.bf16.mxu1 %v2317_v26 }
0x10e6   : > { %2812 = vmatpush3.bf16.msra.mxu1 %v2309_v29 }
0x11aa   : > { %v2243_v37 = vpop.f32.mrb[48].mxu0 }
0x11ab   : > { %v2244_v3 = vadd.f32 %v2243_v37, %v2202_v35  ;;  %v2245_v14 = vpop.f32.mrb[49].mxu0 }
0x11ac   : > { %v2246_v38 = vadd.f32 %v2245_v14, %v2206_v36  ;;  %v2247_v39 = vpop.f32.mrb[50].mxu0 }
0x11ad   : > { %v2250_v40 = vmul.f32 %v2244_v3, %v2244_v3  ;;  %v2248_v41 = vpop.f32.mrb[51].mxu0 }
0x11ae   : > { %v2251_v42 = vmul.f32 %v2246_v38, %v2246_v38 }
0x11af   : > { %v2252_v44 = vmul.f32 %v2250_v40, %v2244_v3 }
0x11b0   : > { %v2253_v45 = vmul.f32 %v2251_v42, %v2246_v38 }
0x11b1   : > { %v2254_v47 = vmul.f32 0.044715, %v2252_v44 }
0x11b2   : > { %v2255_v46 = vmul.f32 0.044715, %v2253_v45 }
0x11b3   : > { %v2256_v48 = vadd.f32 %v2254_v47, %v2244_v3 }
0x11b4   : > { %v2257_v49 = vadd.f32 %v2255_v46, %v2246_v38 }
0x11b5   : > { %v2258_v51 = vmul.f32 0.7978846, %v2256_v48 }
0x11b6   : > { %v2259_v52 = vmul.f32 0.7978846, %v2257_v49 }
0x11b7   : > { %3168 = vtanh.f32 %v2258_v51 }
0x11b8   : > { %3170 = vtanh.f32 %v2259_v52 }
0x11c1   : > { %v3169_v30 = vpop.eup %3168 }
0x11c2   : > { %v3171_v32 = vpop.eup %3170  ;;  %v2262_v53 = vadd.f32 1.0, %v3169_v30 }
0x11c3   : > { %v2263_v54 = vadd.f32 1.0, %v3171_v32 }
0x11c4   : > { %v2264_v55 = vmul.f32 0.5, %v2262_v53 }
0x11c5   : > { %v2265_v56 = vmul.f32 0.5, %v2263_v54 }
0x11c6   : > { %v2266_v57 = vmul.f32 %v2264_v55, %v2244_v3 }
0x11c7   : > { %v2267_v58 = vmul.f32 %v2265_v56, %v2246_v38 }
0x11c8   : > { %v2268_v60 = vpack.c.bf16 %v2266_v57, %v2266_v57 }
0x11c9   : > { %v2269_v59 = vpack.c.bf16 %v2267_v58, %v2267_v58 }
0x11cb   : > { %2357 = vmatprep.mubr.bf16.mxu1 %v2269_v59 }
0x11cc   : > { %2358 = vmatmul.mubr.bf16.vlgmr.msra.gmra.mrb[48].mxu1 %v2268_v60 }
0x129f   : > { %v2813_v61 = vpop.f32.mrb[48].mxu1 }
0x12a0   : > { %v2814_v63 = vpop.f32.mrb[49].mxu1 }
0x12a1   : > { %v2815_v0 = vadd.f32 %v2814_v63, %v2813_v61  ;;  %v2816_v1 = vpop.f32.mrb[50].mxu1 }
0x12a2   : > { %v2817_v2 = vpop.f32.mrb[51].mxu1 }
0x12a3   : > { %v2360_v4 = vadd.f32 %v2815_v0, %v2656_v62 }
0x12a5   : > { %v2365_v5 = vadd.f32 %v2360_v4, %v4296_v43  ;;  %v2658_v43 = vld [vmem:[%s4437_s17] ss:$0 sm:$0xff] }
0x12a7   : > { %2368 = vadd.xlane.f32.xlu0 %v2365_v5 }
0x1334   : > { %v2369_v6 = vpop.xlane.xlu0 %2368 }
0x1335   : > { %v2370_v7 = vmul.f32 0.0078125, %v2369_v6 }
0x1337   : > { %v2371_v8 = vsub.f32 %v2365_v5, %v2370_v7 }
0x1339   : > { %v2372_v9 = vmul.f32 %v2371_v8, %v2371_v8 }
0x133b   : > { %2373 = vadd.xlane.f32.xlu1 %v2372_v9 }
0x13c8   : > { %v2374_v10 = vpop.xlane.xlu1 %2373 }
0x13c9   : > { %v2375_v11 = vmul.f32 0.0078125, %v2374_v10 }
0x13cb   : > { %v2376_v12 = vadd.f32 1e-07, %v2375_v11 }
0x13cd   : > { %3172 = vrsqrt.f32 %v2376_v12 }
0x13d7   : > { %v3173_v50 = vpop.eup %3172 }
0x13d8   : > { %v2378_v15 = vmul.f32 %v3173_v50, %v2371_v8 }
0x13da   : > { %v2385_v33 = vmul.f32 %v2657_v13, %v2378_v15 }
0x13dc   : > { %v2392_v16 = vadd.f32 %v2658_v43, %v2385_v33 }
0x13de   : > { %2393 = vst [vmem:[%s584_s26] sm:$0xff] %v2392_v16 }
0x13df PF: > { %s28_s27 = sadd.s32 1, %s3181_s27  }
0x13e0   : > { %p25_p4 = scmp.ge.s32.totalorder %s28_s27, 4  }
0x13e2   :  { %27 = sbr.rel (!%p25_p4) target bundleno = 4 (0x4), region = 146 }

</bundles_post_ra>
